<compile_context>
chip_gen: v6e
topology: v6e:2x2x1
jax: 0.10.0
libtpu: 0.0.40
codegen_flags: <defaults>
</compile_context>

<pallas_src>
import jax
import jax.numpy as jnp
from jax import lax
from jax.experimental import pallas as pl
from jax.experimental.pallas import tpu as pltpu


# ----------------------------------------------------------------------------
# math helpers
# ----------------------------------------------------------------------------
def _gelu_exact(x):
    # PyTorch nn.GELU() default: exact, erf-based (used in reference / wrapper).
    return 0.5 * x * (1.0 + lax.erf(x / jnp.sqrt(2.0).astype(x.dtype)))


def _gelu_tanh(x):
    # tanh approximation (EUP-friendly); |err| <~ 3e-3, validated vs reference.
    c = 0.7978845608028654  # sqrt(2/pi)
    return 0.5 * x * (1.0 + jnp.tanh(c * (x + 0.044715 * x * x * x)))


def _sigmoid_fast(x):
    # exp on the EUP + approximate reciprocal (vrcp) -> no VALU divide.
    return pl.reciprocal(1.0 + jnp.exp(-x), approx=True)


def dfe_layer1_spatial(x_nchw, p):
    """DFEUnit.layer1: 5x5 conv (reflect pad 2) then depthwise 7x7, dilation 3
    (reflect pad 9).  Plain JAX, bf16 activations/weights, f32 accumulation.
    # TODO(synk): spatial reflect-padded / dilated convs are left to XLA,
    # not implemented as a Pallas kernel."""
    C = x_nchw.shape[1]
    dt = x_nchw.dtype
    xp = jnp.pad(x_nchw, ((0, 0), (0, 0), (2, 2), (2, 2)), mode="reflect")
    y = lax.conv_general_dilated(
        xp, p["dfe_w5"].astype(dt), window_strides=(1, 1), padding="VALID",
        dimension_numbers=("NCHW", "OIHW", "NCHW"),
        preferred_element_type=jnp.float32) + p["dfe_b5"].reshape(1, C, 1, 1)
    y = y.astype(dt)
    yp = jnp.pad(y, ((0, 0), (0, 0), (9, 9), (9, 9)), mode="reflect")
    z = lax.conv_general_dilated(
        yp, p["dfe_w7"].astype(dt), window_strides=(1, 1), padding="VALID",
        rhs_dilation=(3, 3), feature_group_count=C,
        dimension_numbers=("NCHW", "OIHW", "NCHW"),
        preferred_element_type=jnp.float32) + p["dfe_b7"].reshape(1, C, 1, 1)
    return z.astype(dt)


# ----------------------------------------------------------------------------
# Pallas kernel 1: modulations + DFEUnit.conv1 (1x1)
# ----------------------------------------------------------------------------
def pre_kernel(inp_ref, dark_ref, aff_ref, w_ref, b_ref, out_ref):
    f32 = jnp.float32
    aff = aff_ref[0]                                          # (C, 6) f32
    x1 = inp_ref[0].astype(f32) * aff[:, 0:1] + aff[:, 1:2]   # BN1 + att mod.
    dkm = dark_ref[0].astype(f32) * aff[:, 2:3] + aff[:, 3:4]  # dark mod.
    dfe_in = (x1 * dkm).astype(jnp.bfloat16)
    c1 = jnp.dot(w_ref[...], dfe_in, preferred_element_type=f32) + b_ref[...]
    out_ref[0] = c1.astype(out_ref.dtype)


# ----------------------------------------------------------------------------
# Pallas kernel 2a ("mid"): DFE tail gate, mlp1 + residual, hx + pooled sum.
# hw-tile grid axis is a reduction for the pooled output -> "arbitrary".
# ----------------------------------------------------------------------------
def mid_kernel(inp_ref, aff_ref, c1_ref, l1_ref,
               w_cc_ref, w_up_ref, w_dn_ref, b_c_ref, b_up_ref,
               x2_ref, pooled_ref):
    f32, bf16 = jnp.float32, jnp.bfloat16
    C = inp_ref.shape[1]
    aff = aff_ref[0]                                          # (C, 6)

    # ---- DFEUnit tail: dfe_out = layer1(c1) * sigmoid(1x1(c1))
    c1 = c1_ref[0]                                            # (C, T) bf16
    l2 = _sigmoid_fast(jnp.dot(w_cc_ref[0:C, :], c1,
                               preferred_element_type=f32) + b_c_ref[:, 0:1])
    dfe_b = (l1_ref[0].astype(f32) * l2).astype(bf16)

    # norm1 + att modulation (recomputed; bf16 at definition)
    x1_b = (inp_ref[0].astype(f32) * aff[:, 0:1] + aff[:, 1:2]).astype(bf16)

    # ---- mlp1 on the (implicit) concat [x1, dfe_out]: two K=C dots, no copy
    h = _gelu_tanh(
        jnp.dot(w_up_ref[0:4 * C, :], x1_b, preferred_element_type=f32)
        + jnp.dot(w_up_ref[4 * C:8 * C, :], dfe_b, preferred_element_type=f32)
        + b_up_ref[...])
    m1 = (jnp.dot(w_dn_ref[...], h.astype(bf16), preferred_element_type=f32)
          + b_c_ref[:, 2:3])
    x2 = inp_ref[0].astype(f32) + m1                          # re-read: 1 vld
    x2_ref[0] = x2.astype(bf16)

    # ---- HFO conv1 on the modulated x2, only for the global-average pool
    x3_b = (x2 * aff[:, 4:5] + aff[:, 5:6]).astype(bf16)
    hx = (jnp.dot(w_cc_ref[C:2 * C, :], x3_b, preferred_element_type=f32)
          + b_c_ref[:, 1:2])
    tile_sum = jnp.sum(hx, axis=1, keepdims=True)             # (C, 1)

    @pl.when(pl.program_id(1) == 0)
    def _():
        pooled_ref[0] = jnp.zeros_like(tile_sum)
    pooled_ref[0] = pooled_ref[0] + tile_sum


# ----------------------------------------------------------------------------
# Pallas kernel 2b ("tail"): HFO attention + mlp2 + residual.
# hx / x3 are recomputed from x2 (cheaper than an HBM round-trip).
# ----------------------------------------------------------------------------
def tail_kernel(x2_ref, dark_ref, aff_ref, ca_ref,
                w_cc_ref, w_pa1_ref, w_up_ref, w_dn_ref,
                b_c_ref, b_up_ref, pa_ref, out_ref):
    f32, bf16 = jnp.float32, jnp.bfloat16
    C = x2_ref.shape[1]
    aff = aff_ref[0]

    # norm2 + ffn modulation (recomputed)
    x3_b = (x2_ref[0].astype(f32) * aff[:, 4:5] + aff[:, 5:6]).astype(bf16)

    # ---- HFOUnit: hx (recompute), ca precomputed in wrapper, pa from dark
    hx = (jnp.dot(w_cc_ref[...], x3_b, preferred_element_type=f32)
          + b_c_ref[:, 0:1])
    dkm_b = (dark_ref[0].astype(f32) * aff[:, 2:3] + aff[:, 3:4]).astype(bf16)
    pp = _gelu_tanh(jnp.dot(w_pa1_ref[...], dkm_b, preferred_element_type=f32)
                    + pa_ref[:, 0:1])                         # (Cr, T)
    # pa second projection (K=Cr, N=1): VPU multiply + sublane reduce.
    pa = jnp.sum(pp * pa_ref[:, 1:2], axis=0, keepdims=True) + pa_ref[0:1, 2:3]
    atten = _sigmoid_fast(ca_ref[0] * pa)                     # (C, T)
    hfo_b = (hx * atten).astype(bf16)

    # ---- mlp2 on the (implicit) concat [x3, hfo]
    g = _gelu_tanh(
        jnp.dot(w_up_ref[0:4 * C, :], x3_b, preferred_element_type=f32)
        + jnp.dot(w_up_ref[4 * C:8 * C, :], hfo_b, preferred_element_type=f32)
        + b_up_ref[...])
    m2 = (jnp.dot(w_dn_ref[...], g.astype(bf16), preferred_element_type=f32)
          + b_c_ref[:, 1:2])
    out_ref[0] = (x2_ref[0].astype(f32) + m2).astype(out_ref.dtype)


# ----------------------------------------------------------------------------
# wrapper helpers: affine folding, weight packing, tile / VMEM sizing
# ----------------------------------------------------------------------------
def _fold_affine(time_vec, p, N, C):
    """time MLP + eval-mode BatchNorm folded into per-(batch, channel) affines.
    Columns: [A_att, B_att, A_dark, B_dark, A_ffn, B_ffn]  -> (N, C, 6)."""
    f32 = jnp.float32
    t = _gelu_exact(time_vec.astype(f32))
    temb = t @ p["wt"].T + p["bt"]                            # (N, 6C)
    sh_att, sc_att, sh_ffn, sc_ffn, sh_dk, sc_dk = jnp.split(temb, 6, axis=1)
    eps = 1e-5
    s1 = p["bn1_g"] / jnp.sqrt(p["bn1_v"] + eps)
    o1 = p["bn1_b"] - p["bn1_m"] * s1
    s2 = p["bn2_g"] / jnp.sqrt(p["bn2_v"] + eps)
    o2 = p["bn2_b"] - p["bn2_m"] * s2
    A_att = s1[None, :] * (sc_att + 1.0)
    B_att = o1[None, :] * (sc_att + 1.0) + sh_att
    A_dk = sc_dk + 1.0
    B_dk = sh_dk
    A_ffn = s2[None, :] * (sc_ffn + 1.0)
    B_ffn = o2[None, :] * (sc_ffn + 1.0) + sh_ffn
    return jnp.stack([A_att, B_att, A_dk, B_dk, A_ffn, B_ffn],
                     axis=-1).astype(f32)                     # (N, C, 6)


def _pack_params(p, C):
    """Pack 1x1-conv weights/biases into a few slabs; mlp first layers are
    split into two K=C row-slabs (x-half rows 0:4C, gate-half rows 4C:8C) so
    the kernels never materialize a concat."""
    f32 = jnp.float32
    Cr = C // 8
    b16 = lambda a: a.astype(jnp.bfloat16)
    col = lambda v: v.reshape(-1, 1).astype(f32)

    bp2_col = jnp.zeros((Cr,), f32).at[0].set(p["pa_b2"][0])
    return dict(
        # kernel 1
        w_pre=b16(p["dfe_w1"]), b_pre=col(p["dfe_b1"]),
        # kernel 2a (mid)
        w_mid_cc=b16(jnp.concatenate([p["dfe_w2"], p["hfo_w1"]], axis=0)),
        w_mid_up=b16(jnp.concatenate([p["m1_wa"][:, :C], p["m1_wa"][:, C:]],
                                     axis=0)),
        w_mid_dn=b16(p["m1_wb"]),
        b_mid_c=jnp.stack([p["dfe_b2"], p["hfo_b1"], p["m1_bb"]],
                          axis=1).astype(f32),
        b_mid_up=col(p["m1_ba"]),
        # kernel 2b (tail)
        w_tail_cc=b16(p["hfo_w1"]),
        w_tail_pa1=b16(p["pa_w1"]),
        w_tail_up=b16(jnp.concatenate([p["m2_wa"][:, :C], p["m2_wa"][:, C:]],
                                      axis=0)),
        w_tail_dn=b16(p["m2_wb"]),
        b_tail_c=jnp.stack([p["hfo_b1"], p["m2_bb"]], axis=1).astype(f32),
        b_tail_up=col(p["m2_ba"]),
        pa_misc=jnp.stack([p["pa_b1"], p["pa_w2"].reshape(-1), bp2_col],
                          axis=1).astype(f32),
    )


def _pick_hw_tile(HW):
    """Lane-dense HW tile (multiple of 128 dividing HW); prefer >= 2 tiles per
    image so the pipeline / megacore get >= 2 steps; cap at 2048 lanes."""
    if HW <= 128 or HW % 128 != 0:
        return HW
    for t in (2048, 1024, 512, 256, 128):
        if t <= HW // 2 and HW % t == 0:
            return t
    return HW


def _nbytes(*arrs):
    return int(sum(int(a.size) * a.dtype.itemsize for a in arrs))


def _vmem_limit(n_act_blocks, C, THW, weight_bytes):
    act = n_act_blocks * C * THW * 2            # bf16 activation blocks
    inter = 4 * (4 * C) * THW * 4               # a few (4C, T) f32 intermediates
    total = 2 * act + 2 * weight_bytes + inter  # double-buffered acts / weights
    return int(min(max(2 * total, 4 << 20), 64 << 20))


# ----------------------------------------------------------------------------
# wrapper
# ----------------------------------------------------------------------------
def dff_block_pallas(inp_nchw, time_vec, dark_nchw, p):
    N, C, H, W = inp_nchw.shape
    HW = H * W
    Cr = C // 8
    assert HW % 128 == 0 and C % 8 == 0 and Cr >= 1

    THW = _pick_hw_tile(HW)
    T = HW // THW

    affine = _fold_affine(time_vec, p, N, C)
    pk = _pack_params(p, C)

    inp_cl = inp_nchw.reshape(N, C, HW).astype(jnp.bfloat16)
    dark_cl = dark_nchw.reshape(N, C, HW).astype(jnp.bfloat16)

    act_spec = pl.BlockSpec((1, C, THW), lambda b, t: (b, 0, t))
    aff_spec = pl.BlockSpec((1, C, 6), lambda b, t: (b, 0, 0))
    vec_spec = pl.BlockSpec((1, C, 1), lambda b, t: (b, 0, 0))
    wfull = lambda shape: pl.BlockSpec(shape, lambda b, t: (0, 0))

    # ------------------------------------------------------------------ k1
    w1_bytes = _nbytes(pk["w_pre"], pk["b_pre"])
    cost1 = pl.CostEstimate(
        flops=2 * N * HW * C * C + 8 * N * HW * C, transcendentals=0,
        bytes_accessed=3 * N * C * HW * 2 + N * C * 6 * 4 + w1_bytes)
    dfe_c1 = pl.pallas_call(
        pre_kernel,
        out_shape=jax.ShapeDtypeStruct((N, C, HW), jnp.bfloat16),
        grid_spec=pltpu.PrefetchScalarGridSpec(
            num_scalar_prefetch=0, grid=(N, T),
            in_specs=[act_spec, act_spec, aff_spec,
                      wfull((C, C)), wfull((C, 1))],
            out_specs=act_spec),
        compiler_params=pltpu.CompilerParams(
            dimension_semantics=("parallel", "parallel"),
            vmem_limit_bytes=_vmem_limit(3, C, THW, w1_bytes)),
        cost_estimate=cost1,
    )(inp_cl, dark_cl, affine, pk["w_pre"], pk["b_pre"])

    # ---------------------------------------------- DFE layer1 (plain JAX)
    dfe_l1 = dfe_layer1_spatial(dfe_c1.reshape(N, C, H, W), p).reshape(N, C, HW)

    # ------------------------------------------------------------------ k2a
    wm_bytes = _nbytes(pk["w_mid_cc"], pk["w_mid_up"], pk["w_mid_dn"],
                       pk["b_mid_c"], pk["b_mid_up"])
    cost_mid = pl.CostEstimate(
        flops=2 * N * HW * 14 * C * C + 24 * N * HW * C,
        transcendentals=5 * N * HW * C,
        bytes_accessed=4 * N * C * HW * 2 + N * C * 4 + N * C * 6 * 4 + wm_bytes)
    x2_cl, pooled_sum = pl.pallas_call(
        mid_kernel,
        out_shape=(jax.ShapeDtypeStruct((N, C, HW), jnp.bfloat16),
                   jax.ShapeDtypeStruct((N, C, 1), jnp.float32)),
        grid_spec=pltpu.PrefetchScalarGridSpec(
            num_scalar_prefetch=0, grid=(N, T),
            in_specs=[act_spec, aff_spec, act_spec, act_spec,
                      wfull((2 * C, C)), wfull((8 * C, C)), wfull((C, 4 * C)),
                      wfull((C, 3)), wfull((4 * C, 1))],
            out_specs=(act_spec, vec_spec)),
        compiler_params=pltpu.CompilerParams(
            dimension_semantics=("parallel", "arbitrary"),
            vmem_limit_bytes=_vmem_limit(4, C, THW, wm_bytes)),
        cost_estimate=cost_mid,
    )(inp_cl, affine, dfe_c1, dfe_l1,
      pk["w_mid_cc"], pk["w_mid_up"], pk["w_mid_dn"],
      pk["b_mid_c"], pk["b_mid_up"])

    # ---- channel-attention ("ca") branch: two (C,C)@(C,1) mat-vecs per image;
    # computed in plain JAX between the two calls (off the MXU).
    pooled_mean = pooled_sum.reshape(N, C) / float(HW)
    cah = _gelu_exact(pooled_mean @ p["ca_w1"].T + p["ca_b1"])
    ca_vec = (cah @ p["ca_w2"].T + p["ca_b2"]).astype(jnp.float32)
    ca_vec = ca_vec.reshape(N, C, 1)

    # ------------------------------------------------------------------ k2b
    wt_bytes = _nbytes(pk["w_tail_cc"], pk["w_tail_pa1"], pk["w_tail_up"],
                       pk["w_tail_dn"], pk["b_tail_c"], pk["b_tail_up"],
                       pk["pa_misc"])
    cost_tail = pl.CostEstimate(
        flops=2 * N * HW * (13 * C * C + Cr * C + Cr) + 24 * N * HW * C,
        transcendentals=N * HW * (5 * C + 3 * Cr + 2),
        bytes_accessed=3 * N * C * HW * 2 + N * C * (6 + 1) * 4 + wt_bytes)
    out_cl = pl.pallas_call(
        tail_kernel,
        out_shape=jax.ShapeDtypeStruct((N, C, HW), jnp.bfloat16),
        grid_spec=pltpu.PrefetchScalarGridSpec(
            num_scalar_prefetch=0, grid=(N, T),
            in_specs=[act_spec, act_spec, aff_spec, vec_spec,
                      wfull((C, C)), wfull((Cr, C)), wfull((8 * C, C)),
                      wfull((C, 4 * C)), wfull((C, 2)), wfull((4 * C, 1)),
                      wfull((Cr, 3))],
            out_specs=act_spec),
        compiler_params=pltpu.CompilerParams(
            dimension_semantics=("parallel", "parallel"),
            vmem_limit_bytes=_vmem_limit(3, C, THW, wt_bytes)),
        cost_estimate=cost_tail,
    )(x2_cl, dark_cl, affine, ca_vec,
      pk["w_tail_cc"], pk["w_tail_pa1"], pk["w_tail_up"], pk["w_tail_dn"],
      pk["b_tail_c"], pk["b_tail_up"], pk["pa_misc"])

    return out_cl.reshape(N, C, H, W)


# ----------------------------------------------------------------------------
# pure-JAX reference (NCHW, exact GELU / sigmoid; mirrors bf16 HBM boundaries)
# ----------------------------------------------------------------------------
def dff_block_reference(inp, time_vec, dark, p):
    f32 = jnp.float32
    N, C, H, W = inp.shape
    bf = lambda a: a.astype(jnp.bfloat16)

    def conv1x1(x, w, b):
        y = jnp.einsum("oi,nihw->nohw", bf(w), bf(x), preferred_element_type=f32)
        return y + b.reshape(1, -1, 1, 1)

    col = lambda v: v.reshape(N, C, 1, 1)

    temb = _gelu_exact(time_vec.astype(f32)) @ p["wt"].T + p["bt"]
    sh_att, sc_att, sh_ffn, sc_ffn, sh_dk, sc_dk = jnp.split(temb, 6, axis=1)

    dark_m = bf(dark).astype(f32) * (col(sc_dk) + 1.0) + col(sh_dk)

    x = bf(inp).astype(f32)
    identity = x
    s1 = p["bn1_g"] / jnp.sqrt(p["bn1_v"] + 1e-5)
    o1 = p["bn1_b"] - p["bn1_m"] * s1
    x = x * s1.reshape(1, C, 1, 1) + o1.reshape(1, C, 1, 1)
    x = x * (col(sc_att) + 1.0) + col(sh_att)

    d_c1 = bf(conv1x1(x * dark_m, p["dfe_w1"], p["dfe_b1"]))  # HBM boundary
    d_l1 = dfe_layer1_spatial(d_c1, p).astype(f32)
    d_l2 = jax.nn.sigmoid(conv1x1(d_c1.astype(f32), p["dfe_w2"], p["dfe_b2"]))
    d_out = d_l1 * d_l2

    h = _gelu_exact(conv1x1(jnp.concatenate([x, d_out], axis=1),
                            p["m1_wa"], p["m1_ba"]))
    x = identity + conv1x1(h, p["m1_wb"], p["m1_bb"])

    identity = x
    s2 = p["bn2_g"] / jnp.sqrt(p["bn2_v"] + 1e-5)
    o2 = p["bn2_b"] - p["bn2_m"] * s2
    x = x * s2.reshape(1, C, 1, 1) + o2.reshape(1, C, 1, 1)
    x = x * (col(sc_ffn) + 1.0) + col(sh_ffn)

    hx = conv1x1(x, p["hfo_w1"], p["hfo_b1"])
    pooled = jnp.mean(hx, axis=(2, 3), keepdims=True)
    ca = conv1x1(_gelu_exact(conv1x1(pooled, p["ca_w1"], p["ca_b1"])),
                 p["ca_w2"], p["ca_b2"])
    pa_h = _gelu_exact(conv1x1(dark_m, p["pa_w1"], p["pa_b1"]))
    pa = jnp.einsum("oi,nihw->nohw", p["pa_w2"], pa_h,
                    preferred_element_type=f32) + p["pa_b2"].reshape(1, 1, 1, 1)
    atten = jax.nn.sigmoid(ca * pa)
    hfo = hx * atten

    g = _gelu_exact(conv1x1(jnp.concatenate([x, hfo], axis=1),
                            p["m2_wa"], p["m2_ba"]))
    x = identity + conv1x1(g, p["m2_wb"], p["m2_bb"])
    return x


# ----------------------------------------------------------------------------
# deterministic synthetic parameters (shapes match DFFBlock(dim, time_dim))
# ----------------------------------------------------------------------------
def make_params(key, dim, time_dim):
    Cr = dim // 8
    keys = jax.random.split(key, 40)
    it = iter(keys)
    f32 = jnp.float32

    def mat(shape, fan_in):
        return jax.random.normal(next(it), shape, f32) / jnp.sqrt(jnp.float32(fan_in))

    def bn(prefix, d):
        return {
            prefix + "_g": 1.0 + 0.1 * jax.random.normal(next(it), (d,), f32),
            prefix + "_b": 0.1 * jax.random.normal(next(it), (d,), f32),
            prefix + "_m": 0.1 * jax.random.normal(next(it), (d,), f32),
            prefix + "_v": 1.0 + 0.1 * jax.random.uniform(next(it), (d,), f32),
        }

    p = {}
    p.update(bn("bn1", dim))
    p.update(bn("bn2", dim))
    p.update({
        "dfe_w1": mat((dim, dim), dim), "dfe_b1": mat((dim,), dim),
        "dfe_w5": mat((dim, dim, 5, 5), dim * 25), "dfe_b5": mat((dim,), dim * 25),
        "dfe_w7": mat((dim, 1, 7, 7), 49), "dfe_b7": mat((dim,), 49),
        "dfe_w2": mat((dim, dim), dim), "dfe_b2": mat((dim,), dim),
        "hfo_w1": mat((dim, dim), dim), "hfo_b1": mat((dim,), dim),
        "ca_w1": mat((dim, dim), dim), "ca_b1": mat((dim,), dim),
        "ca_w2": mat((dim, dim), dim), "ca_b2": mat((dim,), dim),
        "pa_w1": mat((Cr, dim), dim), "pa_b1": mat((Cr,), dim),
        "pa_w2": mat((1, Cr), Cr), "pa_b2": mat((1,), Cr),
        "m1_wa": mat((4 * dim, 2 * dim), 2 * dim), "m1_ba": mat((4 * dim,), 2 * dim),
        "m1_wb": mat((dim, 4 * dim), 4 * dim), "m1_bb": mat((dim,), 4 * dim),
        "m2_wa": mat((4 * dim, 2 * dim), 2 * dim), "m2_ba": mat((4 * dim,), 2 * dim),
        "m2_wb": mat((dim, 4 * dim), 4 * dim), "m2_bb": mat((dim,), 4 * dim),
        "wt": mat((6 * dim, time_dim), time_dim), "bt": mat((6 * dim,), time_dim),
    })
    return p


if __name__ == "__main__":
    key = jax.random.PRNGKey(0)
    k_inp, k_dark, k_time, k_par = jax.random.split(key, 4)

    N, C, H, W = 2, 32, 16, 16          # dim=32 -> dim//8=4 ; HW=256, tile=128
    T = 32                              # time_emb_dim
    inp = jax.random.normal(k_inp, (N, C, H, W), jnp.float32)
    dark = jax.random.normal(k_dark, (N, C, H, W), jnp.float32)
    time_vec = jax.random.normal(k_time, (N, T), jnp.float32)
    params = make_params(k_par, C, T)

    out = jax.jit(dff_block_pallas)(inp, time_vec, dark, params)
    out = jax.block_until_ready(out)
    assert out.shape == (N, C, H, W)

    ref = dff_block_reference(inp, time_vec, dark, params)
    ref = ref.astype(jnp.bfloat16).astype(jnp.float32)   # compare at bf16 output precision
    assert jnp.allclose(out.astype(jnp.float32), ref, atol=5e-2, rtol=5e-2), \
        "mismatch vs reference"

    print("KERNEL_OK")
</pallas_src>

<mosaic_0001>
module attributes {stable_mosaic.version = 11 : i64} {
  func.func @pre_kernel(%arg0: i32, %arg1: i32, %arg2: memref<1x32x128xbf16, #tpu.memory_space<vmem>>, %arg3: memref<1x32x128xbf16, #tpu.memory_space<vmem>>, %arg4: memref<1x32x6xf32, #tpu.memory_space<vmem>>, %arg5: memref<32x32xbf16, #tpu.memory_space<vmem>>, %arg6: memref<32x1xf32, #tpu.memory_space<vmem>>, %arg7: memref<1x32x128xbf16, #tpu.memory_space<vmem>>) attributes {dimension_semantics = [#tpu.dimension_semantics<parallel>, #tpu.dimension_semantics<parallel>], iteration_bounds = array<i64: 2, 2>, scalar_prefetch = 0 : i64, scratch_operands = 0 : i64, tpu.core_type = #tpu.core_type<tc>, window_params = [{transform_indices = @transform_0, window_bounds = array<i64: 1, 32, 128>}, {transform_indices = @transform_1, window_bounds = array<i64: 1, 32, 128>}, {transform_indices = @transform_2, window_bounds = array<i64: 1, 32, 6>}, {pipeline_mode = #tpu.pipeline_mode<synchronous>, transform_indices = @transform_3, window_bounds = array<i64: 32, 32>}, {pipeline_mode = #tpu.pipeline_mode<synchronous>, transform_indices = @transform_4, window_bounds = array<i64: 32, 1>}, {transform_indices = @transform_5, window_bounds = array<i64: 1, 32, 128>}]} {
    %c0 = arith.constant 0 : index
    %c0_0 = arith.constant 0 : index
    %c0_1 = arith.constant 0 : index
    %0 = vector.load %arg4[%c0, %c0_0, %c0_1] : memref<1x32x6xf32, #tpu.memory_space<vmem>>, vector<1x32x6xf32>
    %1 = vector.shape_cast %0 : vector<1x32x6xf32> to vector<32x6xf32>
    %c0_2 = arith.constant 0 : index
    %c0_3 = arith.constant 0 : index
    %c0_4 = arith.constant 0 : index
    %2 = vector.load %arg2[%c0_2, %c0_3, %c0_4] : memref<1x32x128xbf16, #tpu.memory_space<vmem>>, vector<1x32x128xbf16>
    %3 = vector.shape_cast %2 : vector<1x32x128xbf16> to vector<32x128xbf16>
    %4 = arith.extf %3 : vector<32x128xbf16> to vector<32x128xf32>
    %5 = vector.extract_strided_slice %1 {offsets = [0, 0], sizes = [32, 1], strides = [1, 1]} : vector<32x6xf32> to vector<32x1xf32>
    %6 = vector.broadcast %5 : vector<32x1xf32> to vector<32x128xf32>
    %7 = arith.mulf %4, %6 : vector<32x128xf32>
    %8 = vector.extract_strided_slice %1 {offsets = [0, 1], sizes = [32, 1], strides = [1, 1]} : vector<32x6xf32> to vector<32x1xf32>
    %9 = vector.broadcast %8 : vector<32x1xf32> to vector<32x128xf32>
    %10 = arith.addf %7, %9 : vector<32x128xf32>
    %c0_5 = arith.constant 0 : index
    %c0_6 = arith.constant 0 : index
    %c0_7 = arith.constant 0 : index
    %11 = vector.load %arg3[%c0_5, %c0_6, %c0_7] : memref<1x32x128xbf16, #tpu.memory_space<vmem>>, vector<1x32x128xbf16>
    %12 = vector.shape_cast %11 : vector<1x32x128xbf16> to vector<32x128xbf16>
    %13 = arith.extf %12 : vector<32x128xbf16> to vector<32x128xf32>
    %14 = vector.extract_strided_slice %1 {offsets = [0, 2], sizes = [32, 1], strides = [1, 1]} : vector<32x6xf32> to vector<32x1xf32>
    %15 = vector.broadcast %14 : vector<32x1xf32> to vector<32x128xf32>
    %16 = arith.mulf %13, %15 : vector<32x128xf32>
    %17 = vector.extract_strided_slice %1 {offsets = [0, 3], sizes = [32, 1], strides = [1, 1]} : vector<32x6xf32> to vector<32x1xf32>
    %18 = vector.broadcast %17 : vector<32x1xf32> to vector<32x128xf32>
    %19 = arith.addf %16, %18 : vector<32x128xf32>
    %20 = arith.mulf %10, %19 : vector<32x128xf32>
    %21 = arith.truncf %20 : vector<32x128xf32> to vector<32x128xbf16>
    %c0_8 = arith.constant 0 : index
    %c0_9 = arith.constant 0 : index
    %22 = vector.load %arg5[%c0_8, %c0_9] : memref<32x32xbf16, #tpu.memory_space<vmem>>, vector<32x32xbf16>
    %cst = arith.constant dense<0.000000e+00> : vector<32x128xf32>
    %23 = tpu.matmul %22, %21, %cst {dimension_numbers = #tpu.dot_dimension_numbers<[1], [0], [0], [1], [0, 0, 1, 1], [], []>} : vector<32x32xbf16>, vector<32x128xbf16>, vector<32x128xf32> -> vector<32x128xf32>
    %c0_10 = arith.constant 0 : index
    %c0_11 = arith.constant 0 : index
    %24 = vector.load %arg6[%c0_10, %c0_11] : memref<32x1xf32, #tpu.memory_space<vmem>>, vector<32x1xf32>
    %25 = vector.broadcast %24 : vector<32x1xf32> to vector<32x128xf32>
    %26 = arith.addf %23, %25 : vector<32x128xf32>
    %27 = arith.truncf %26 : vector<32x128xf32> to vector<32x128xbf16>
    %c0_12 = arith.constant 0 : index
    %c0_13 = arith.constant 0 : index
    %c0_14 = arith.constant 0 : index
    %28 = vector.load %arg7[%c0_12, %c0_13, %c0_14] : memref<1x32x128xbf16, #tpu.memory_space<vmem>>, vector<1x32x128xbf16>
    %29 = vector.shape_cast %28 : vector<1x32x128xbf16> to vector<32x128xbf16>
    %30 = vector.shape_cast %27 : vector<32x128xbf16> to vector<1x32x128xbf16>
    tpu.vector_store %arg7[%c0_12, %c0_13, %c0_14], %30 {strides = array<i32>} : memref<1x32x128xbf16, #tpu.memory_space<vmem>>, vector<1x32x128xbf16>,
    return
  }
  func.func @transform_0(%arg0: i32, %arg1: i32) -> (i32, i32, i32) {
    %c0_i32 = arith.constant 0 : i32
    %c0_i32_0 = arith.constant 0 : i32
    return %arg0, %c0_i32, %arg1 : i32, i32, i32
  }
  func.func @transform_1(%arg0: i32, %arg1: i32) -> (i32, i32, i32) {
    %c0_i32 = arith.constant 0 : i32
    %c0_i32_0 = arith.constant 0 : i32
    return %arg0, %c0_i32, %arg1 : i32, i32, i32
  }
  func.func @transform_2(%arg0: i32, %arg1: i32) -> (i32, i32, i32) {
    %c0_i32 = arith.constant 0 : i32
    %c0_i32_0 = arith.constant 0 : i32
    %c0_i32_1 = arith.constant 0 : i32
    return %arg0, %c0_i32, %c0_i32_0 : i32, i32, i32
  }
  func.func @transform_3(%arg0: i32, %arg1: i32) -> (i32, i32) {
    %c0_i32 = arith.constant 0 : i32
    %c0_i32_0 = arith.constant 0 : i32
    %c0_i32_1 = arith.constant 0 : i32
    return %c0_i32, %c0_i32_0 : i32, i32
  }
  func.func @transform_4(%arg0: i32, %arg1: i32) -> (i32, i32) {
    %c0_i32 = arith.constant 0 : i32
    %c0_i32_0 = arith.constant 0 : i32
    %c0_i32_1 = arith.constant 0 : i32
    return %c0_i32, %c0_i32_0 : i32, i32
  }
  func.func @transform_5(%arg0: i32, %arg1: i32) -> (i32, i32, i32) {
    %c0_i32 = arith.constant 0 : i32
    %c0_i32_0 = arith.constant 0 : i32
    return %arg0, %c0_i32, %arg1 : i32, i32, i32
  }
}

module attributes {stable_mosaic.version = 11 : i64} {
  func.func @mid_kernel(%arg0: i32, %arg1: i32, %arg2: memref<1x32x128xbf16, #tpu.memory_space<vmem>>, %arg3: memref<1x32x6xf32, #tpu.memory_space<vmem>>, %arg4: memref<1x32x128xbf16, #tpu.memory_space<vmem>>, %arg5: memref<1x32x128xbf16, #tpu.memory_space<vmem>>, %arg6: memref<64x32xbf16, #tpu.memory_space<vmem>>, %arg7: memref<256x32xbf16, #tpu.memory_space<vmem>>, %arg8: memref<32x128xbf16, #tpu.memory_space<vmem>>, %arg9: memref<32x3xf32, #tpu.memory_space<vmem>>, %arg10: memref<128x1xf32, #tpu.memory_space<vmem>>, %arg11: memref<1x32x128xbf16, #tpu.memory_space<vmem>>, %arg12: memref<1x32x1xf32, #tpu.memory_space<vmem>>) attributes {dimension_semantics = [#tpu.dimension_semantics<parallel>, #tpu.dimension_semantics<arbitrary>], iteration_bounds = array<i64: 2, 2>, scalar_prefetch = 0 : i64, scratch_operands = 0 : i64, tpu.core_type = #tpu.core_type<tc>, window_params = [{transform_indices = @transform_0, window_bounds = array<i64: 1, 32, 128>}, {transform_indices = @transform_1, window_bounds = array<i64: 1, 32, 6>}, {transform_indices = @transform_2, window_bounds = array<i64: 1, 32, 128>}, {transform_indices = @transform_3, window_bounds = array<i64: 1, 32, 128>}, {pipeline_mode = #tpu.pipeline_mode<synchronous>, transform_indices = @transform_4, window_bounds = array<i64: 64, 32>}, {pipeline_mode = #tpu.pipeline_mode<synchronous>, transform_indices = @transform_5, window_bounds = array<i64: 256, 32>}, {pipeline_mode = #tpu.pipeline_mode<synchronous>, transform_indices = @transform_6, window_bounds = array<i64: 32, 128>}, {pipeline_mode = #tpu.pipeline_mode<synchronous>, transform_indices = @transform_7, window_bounds = array<i64: 32, 3>}, {pipeline_mode = #tpu.pipeline_mode<synchronous>, transform_indices = @transform_8, window_bounds = array<i64: 128, 1>}, {transform_indices = @transform_9, window_bounds = array<i64: 1, 32, 128>}, {transform_indices = @transform_10, window_bounds = array<i64: 1, 32, 1>}]} {
    %c0 = arith.constant 0 : index
    %c0_0 = arith.constant 0 : index
    %c0_1 = arith.constant 0 : index
    %0 = vector.load %arg3[%c0, %c0_0, %c0_1] : memref<1x32x6xf32, #tpu.memory_space<vmem>>, vector<1x32x6xf32>
    %1 = vector.shape_cast %0 : vector<1x32x6xf32> to vector<32x6xf32>
    %c0_2 = arith.constant 0 : index
    %c0_3 = arith.constant 0 : index
    %c0_4 = arith.constant 0 : index
    %2 = vector.load %arg4[%c0_2, %c0_3, %c0_4] : memref<1x32x128xbf16, #tpu.memory_space<vmem>>, vector<1x32x128xbf16>
    %3 = vector.shape_cast %2 : vector<1x32x128xbf16> to vector<32x128xbf16>
    %c0_5 = arith.constant 0 : index
    %c0_6 = arith.constant 0 : index
    %4 = vector.load %arg6[%c0_5, %c0_6] : memref<64x32xbf16, #tpu.memory_space<vmem>>, vector<32x32xbf16>
    %cst = arith.constant dense<0.000000e+00> : vector<32x128xf32>
    %5 = tpu.matmul %4, %3, %cst {dimension_numbers = #tpu.dot_dimension_numbers<[1], [0], [0], [1], [0, 0, 1, 1], [], []>} : vector<32x32xbf16>, vector<32x128xbf16>, vector<32x128xf32> -> vector<32x128xf32>
    %c0_7 = arith.constant 0 : index
    %c0_8 = arith.constant 0 : index
    %6 = vector.load %arg9[%c0_7, %c0_8] : memref<32x3xf32, #tpu.memory_space<vmem>>, vector<32x1xf32>
    %7 = vector.broadcast %6 : vector<32x1xf32> to vector<32x128xf32>
    %8 = arith.addf %5, %7 : vector<32x128xf32>
    %cst_9 = arith.constant 0.000000e+00 : f32
    %9 = vector.broadcast %cst_9 : f32 to vector<32x128xf32>
    %10 = arith.subf %9, %8 : vector<32x128xf32>
    %11 = math.exp %10 : vector<32x128xf32>
    %cst_10 = arith.constant 1.000000e+00 : f32
    %12 = vector.broadcast %cst_10 : f32 to vector<32x128xf32>
    %13 = arith.addf %12, %11 : vector<32x128xf32>
    %14 = tpu.reciprocal %13 {approx = true} : vector<32x128xf32> -> vector<32x128xf32>
    %c0_11 = arith.constant 0 : index
    %c0_12 = arith.constant 0 : index
    %c0_13 = arith.constant 0 : index
    %15 = vector.load %arg5[%c0_11, %c0_12, %c0_13] : memref<1x32x128xbf16, #tpu.memory_space<vmem>>, vector<1x32x128xbf16>
    %16 = vector.shape_cast %15 : vector<1x32x128xbf16> to vector<32x128xbf16>
    %17 = arith.extf %16 : vector<32x128xbf16> to vector<32x128xf32>
    %18 = arith.mulf %17, %14 : vector<32x128xf32>
    %19 = arith.truncf %18 : vector<32x128xf32> to vector<32x128xbf16>
    %c0_14 = arith.constant 0 : index
    %c0_15 = arith.constant 0 : index
    %c0_16 = arith.constant 0 : index
    %20 = vector.load %arg2[%c0_14, %c0_15, %c0_16] : memref<1x32x128xbf16, #tpu.memory_space<vmem>>, vector<1x32x128xbf16>
    %21 = vector.shape_cast %20 : vector<1x32x128xbf16> to vector<32x128xbf16>
    %22 = arith.extf %21 : vector<32x128xbf16> to vector<32x128xf32>
    %23 = vector.extract_strided_slice %1 {offsets = [0, 0], sizes = [32, 1], strides = [1, 1]} : vector<32x6xf32> to vector<32x1xf32>
    %24 = vector.broadcast %23 : vector<32x1xf32> to vector<32x128xf32>
    %25 = arith.mulf %22, %24 : vector<32x128xf32>
    %26 = vector.extract_strided_slice %1 {offsets = [0, 1], sizes = [32, 1], strides = [1, 1]} : vector<32x6xf32> to vector<32x1xf32>
    %27 = vector.broadcast %26 : vector<32x1xf32> to vector<32x128xf32>
    %28 = arith.addf %25, %27 : vector<32x128xf32>
    %29 = arith.truncf %28 : vector<32x128xf32> to vector<32x128xbf16>
    %c0_17 = arith.constant 0 : index
    %c0_18 = arith.constant 0 : index
    %30 = vector.load %arg7[%c0_17, %c0_18] : memref<256x32xbf16, #tpu.memory_space<vmem>>, vector<128x32xbf16>
    %cst_19 = arith.constant dense<0.000000e+00> : vector<128x128xf32>
    %31 = tpu.matmul %30, %29, %cst_19 {dimension_numbers = #tpu.dot_dimension_numbers<[1], [0], [0], [1], [0, 0, 1, 1], [], []>} : vector<128x32xbf16>, vector<32x128xbf16>, vector<128x128xf32> -> vector<128x128xf32>
    %c128 = arith.constant 128 : index
    %c0_20 = arith.constant 0 : index
    %32 = vector.load %arg7[%c128, %c0_20] : memref<256x32xbf16, #tpu.memory_space<vmem>>, vector<128x32xbf16>
    %cst_21 = arith.constant dense<0.000000e+00> : vector<128x128xf32>
    %33 = tpu.matmul %32, %19, %cst_21 {dimension_numbers = #tpu.dot_dimension_numbers<[1], [0], [0], [1], [0, 0, 1, 1], [], []>} : vector<128x32xbf16>, vector<32x128xbf16>, vector<128x128xf32> -> vector<128x128xf32>
    %34 = arith.addf %31, %33 : vector<128x128xf32>
    %c0_22 = arith.constant 0 : index
    %c0_23 = arith.constant 0 : index
    %35 = vector.load %arg10[%c0_22, %c0_23] : memref<128x1xf32, #tpu.memory_space<vmem>>, vector<128x1xf32>
    %36 = vector.broadcast %35 : vector<128x1xf32> to vector<128x128xf32>
    %37 = arith.addf %34, %36 : vector<128x128xf32>
    %cst_24 = arith.constant 5.000000e-01 : f32
    %38 = vector.broadcast %cst_24 : f32 to vector<128x128xf32>
    %39 = arith.mulf %38, %37 : vector<128x128xf32>
    %cst_25 = arith.constant 4.471500e-02 : f32
    %40 = vector.broadcast %cst_25 : f32 to vector<128x128xf32>
    %41 = arith.mulf %40, %37 : vector<128x128xf32>
    %42 = arith.mulf %41, %37 : vector<128x128xf32>
    %43 = arith.mulf %42, %37 : vector<128x128xf32>
    %44 = arith.addf %37, %43 : vector<128x128xf32>
    %cst_26 = arith.constant 0.797884583 : f32
    %45 = vector.broadcast %cst_26 : f32 to vector<128x128xf32>
    %46 = arith.mulf %45, %44 : vector<128x128xf32>
    %47 = math.tanh %46 : vector<128x128xf32>
    %cst_27 = arith.constant 1.000000e+00 : f32
    %48 = vector.broadcast %cst_27 : f32 to vector<128x128xf32>
    %49 = arith.addf %48, %47 : vector<128x128xf32>
    %50 = arith.mulf %39, %49 : vector<128x128xf32>
    %c0_28 = arith.constant 0 : index
    %c0_29 = arith.constant 0 : index
    %51 = vector.load %arg8[%c0_28, %c0_29] : memref<32x128xbf16, #tpu.memory_space<vmem>>, vector<32x128xbf16>
    %52 = arith.truncf %50 : vector<128x128xf32> to vector<128x128xbf16>
    %cst_30 = arith.constant dense<0.000000e+00> : vector<32x128xf32>
    %53 = tpu.matmul %51, %52, %cst_30 {dimension_numbers = #tpu.dot_dimension_numbers<[1], [0], [0], [1], [0, 0, 1, 1], [], []>} : vector<32x128xbf16>, vector<128x128xbf16>, vector<32x128xf32> -> vector<32x128xf32>
    %c0_31 = arith.constant 0 : index
    %c2 = arith.constant 2 : index
    %54 = vector.load %arg9[%c0_31, %c2] : memref<32x3xf32, #tpu.memory_space<vmem>>, vector<32x1xf32>
    %55 = vector.broadcast %54 : vector<32x1xf32> to vector<32x128xf32>
    %56 = arith.addf %53, %55 : vector<32x128xf32>
    %c0_32 = arith.constant 0 : index
    %c0_33 = arith.constant 0 : index
    %c0_34 = arith.constant 0 : index
    %57 = vector.load %arg2[%c0_32, %c0_33, %c0_34] : memref<1x32x128xbf16, #tpu.memory_space<vmem>>, vector<1x32x128xbf16>
    %58 = vector.shape_cast %57 : vector<1x32x128xbf16> to vector<32x128xbf16>
    %59 = arith.extf %58 : vector<32x128xbf16> to vector<32x128xf32>
    %60 = arith.addf %59, %56 : vector<32x128xf32>
    %61 = arith.truncf %60 : vector<32x128xf32> to vector<32x128xbf16>
    %c0_35 = arith.constant 0 : index
    %c0_36 = arith.constant 0 : index
    %c0_37 = arith.constant 0 : index
    %62 = vector.load %arg11[%c0_35, %c0_36, %c0_37] : memref<1x32x128xbf16, #tpu.memory_space<vmem>>, vector<1x32x128xbf16>
    %63 = vector.shape_cast %62 : vector<1x32x128xbf16> to vector<32x128xbf16>
    %64 = vector.shape_cast %61 : vector<32x128xbf16> to vector<1x32x128xbf16>
    tpu.vector_store %arg11[%c0_35, %c0_36, %c0_37], %64 {strides = array<i32>} : memref<1x32x128xbf16, #tpu.memory_space<vmem>>, vector<1x32x128xbf16>,
    %65 = vector.extract_strided_slice %1 {offsets = [0, 4], sizes = [32, 1], strides = [1, 1]} : vector<32x6xf32> to vector<32x1xf32>
    %66 = vector.broadcast %65 : vector<32x1xf32> to vector<32x128xf32>
    %67 = arith.mulf %60, %66 : vector<32x128xf32>
    %68 = vector.extract_strided_slice %1 {offsets = [0, 5], sizes = [32, 1], strides = [1, 1]} : vector<32x6xf32> to vector<32x1xf32>
    %69 = vector.broadcast %68 : vector<32x1xf32> to vector<32x128xf32>
    %70 = arith.addf %67, %69 : vector<32x128xf32>
    %71 = arith.truncf %70 : vector<32x128xf32> to vector<32x128xbf16>
    %c32 = arith.constant 32 : index
    %c0_38 = arith.constant 0 : index
    %72 = vector.load %arg6[%c32, %c0_38] : memref<64x32xbf16, #tpu.memory_space<vmem>>, vector<32x32xbf16>
    %cst_39 = arith.constant dense<0.000000e+00> : vector<32x128xf32>
    %73 = tpu.matmul %72, %71, %cst_39 {dimension_numbers = #tpu.dot_dimension_numbers<[1], [0], [0], [1], [0, 0, 1, 1], [], []>} : vector<32x32xbf16>, vector<32x128xbf16>, vector<32x128xf32> -> vector<32x128xf32>
    %c0_40 = arith.constant 0 : index
    %c1 = arith.constant 1 : index
    %74 = vector.load %arg9[%c0_40, %c1] : memref<32x3xf32, #tpu.memory_space<vmem>>, vector<32x1xf32>
    %75 = vector.broadcast %74 : vector<32x1xf32> to vector<32x128xf32>
    %76 = arith.addf %73, %75 : vector<32x128xf32>
    %cst_41 = arith.constant dense<0.000000e+00> : vector<32xf32>
    %77 = vector.multi_reduction <add>, %76, %cst_41 [1] : vector<32x128xf32> to vector<32xf32>
    %78 = vector.shape_cast %77 : vector<32xf32> to vector<32x1xf32>
    %c0_i32 = arith.constant 0 : i32
    %79 = arith.cmpi eq, %arg1, %c0_i32 : i32
    %80 = arith.extui %79 : i1 to i32
    %c0_i32_42 = arith.constant 0 : i32
    %81 = arith.cmpi ne, %80, %c0_i32_42 : i32
    scf.if %81 {
      %cst_49 = arith.constant 0.000000e+00 : f32
      %88 = vector.broadcast %cst_49 : f32 to vector<32x1xf32>
      %c0_50 = arith.constant 0 : index
      %c0_51 = arith.constant 0 : index
      %c0_52 = arith.constant 0 : index
      %89 = vector.load %arg12[%c0_50, %c0_51, %c0_52] : memref<1x32x1xf32, #tpu.memory_space<vmem>>, vector<1x32x1xf32>
      %90 = vector.shape_cast %89 : vector<1x32x1xf32> to vector<32x1xf32>
      %91 = vector.shape_cast %88 : vector<32x1xf32> to vector<1x32x1xf32>
      tpu.vector_store %arg12[%c0_50, %c0_51, %c0_52], %91 {strides = array<i32>} : memref<1x32x1xf32, #tpu.memory_space<vmem>>, vector<1x32x1xf32>,
    } else {
    }
    %c0_43 = arith.constant 0 : index
    %c0_44 = arith.constant 0 : index
    %c0_45 = arith.constant 0 : index
    %82 = vector.load %arg12[%c0_43, %c0_44, %c0_45] : memref<1x32x1xf32, #tpu.memory_space<vmem>>, vector<1x32x1xf32>
    %83 = vector.shape_cast %82 : vector<1x32x1xf32> to vector<32x1xf32>
    %84 = arith.addf %83, %78 : vector<32x1xf32>
    %c0_46 = arith.constant 0 : index
    %c0_47 = arith.constant 0 : index
    %c0_48 = arith.constant 0 : index
    %85 = vector.load %arg12[%c0_46, %c0_47, %c0_48] : memref<1x32x1xf32, #tpu.memory_space<vmem>>, vector<1x32x1xf32>
    %86 = vector.shape_cast %85 : vector<1x32x1xf32> to vector<32x1xf32>
    %87 = vector.shape_cast %84 : vector<32x1xf32> to vector<1x32x1xf32>
    tpu.vector_store %arg12[%c0_46, %c0_47, %c0_48], %87 {strides = array<i32>} : memref<1x32x1xf32, #tpu.memory_space<vmem>>, vector<1x32x1xf32>,
    return
  }
  func.func @transform_0(%arg0: i32, %arg1: i32) -> (i32, i32, i32) {
    %c0_i32 = arith.constant 0 : i32
    %c0_i32_0 = arith.constant 0 : i32
    return %arg0, %c0_i32, %arg1 : i32, i32, i32
  }
  func.func @transform_1(%arg0: i32, %arg1: i32) -> (i32, i32, i32) {
    %c0_i32 = arith.constant 0 : i32
    %c0_i32_0 = arith.constant 0 : i32
    %c0_i32_1 = arith.constant 0 : i32
    return %arg0, %c0_i32, %c0_i32_0 : i32, i32, i32
  }
  func.func @transform_2(%arg0: i32, %arg1: i32) -> (i32, i32, i32) {
    %c0_i32 = arith.constant 0 : i32
    %c0_i32_0 = arith.constant 0 : i32
    return %arg0, %c0_i32, %arg1 : i32, i32, i32
  }
  func.func @transform_3(%arg0: i32, %arg1: i32) -> (i32, i32, i32) {
    %c0_i32 = arith.constant 0 : i32
    %c0_i32_0 = arith.constant 0 : i32
    return %arg0, %c0_i32, %arg1 : i32, i32, i32
  }
  func.func @transform_4(%arg0: i32, %arg1: i32) -> (i32, i32) {
    %c0_i32 = arith.constant 0 : i32
    %c0_i32_0 = arith.constant 0 : i32
    %c0_i32_1 = arith.constant 0 : i32
    return %c0_i32, %c0_i32_0 : i32, i32
  }
  func.func @transform_5(%arg0: i32, %arg1: i32) -> (i32, i32) {
    %c0_i32 = arith.constant 0 : i32
    %c0_i32_0 = arith.constant 0 : i32
    %c0_i32_1 = arith.constant 0 : i32
    return %c0_i32, %c0_i32_0 : i32, i32
  }
  func.func @transform_6(%arg0: i32, %arg1: i32) -> (i32, i32) {
    %c0_i32 = arith.constant 0 : i32
    %c0_i32_0 = arith.constant 0 : i32
    %c0_i32_1 = arith.constant 0 : i32
    return %c0_i32, %c0_i32_0 : i32, i32
  }
  func.func @transform_7(%arg0: i32, %arg1: i32) -> (i32, i32) {
    %c0_i32 = arith.constant 0 : i32
    %c0_i32_0 = arith.constant 0 : i32
    %c0_i32_1 = arith.constant 0 : i32
    return %c0_i32, %c0_i32_0 : i32, i32
  }
  func.func @transform_8(%arg0: i32, %arg1: i32) -> (i32, i32) {
    %c0_i32 = arith.constant 0 : i32
    %c0_i32_0 = arith.constant 0 : i32
    %c0_i32_1 = arith.constant 0 : i32
    return %c0_i32, %c0_i32_0 : i32, i32
  }
  func.func @transform_9(%arg0: i32, %arg1: i32) -> (i32, i32, i32) {
    %c0_i32 = arith.constant 0 : i32
    %c0_i32_0 = arith.constant 0 : i32
    return %arg0, %c0_i32, %arg1 : i32, i32, i32
  }
  func.func @transform_10(%arg0: i32, %arg1: i32) -> (i32, i32, i32) {
    %c0_i32 = arith.constant 0 : i32
    %c0_i32_0 = arith.constant 0 : i32
    %c0_i32_1 = arith.constant 0 : i32
    return %arg0, %c0_i32, %c0_i32_0 : i32, i32, i32
  }
}

module attributes {stable_mosaic.version = 11 : i64} {
  func.func @tail_kernel(%arg0: i32, %arg1: i32, %arg2: memref<1x32x128xbf16, #tpu.memory_space<vmem>>, %arg3: memref<1x32x128xbf16, #tpu.memory_space<vmem>>, %arg4: memref<1x32x6xf32, #tpu.memory_space<vmem>>, %arg5: memref<1x32x1xf32, #tpu.memory_space<vmem>>, %arg6: memref<32x32xbf16, #tpu.memory_space<vmem>>, %arg7: memref<4x32xbf16, #tpu.memory_space<vmem>>, %arg8: memref<256x32xbf16, #tpu.memory_space<vmem>>, %arg9: memref<32x128xbf16, #tpu.memory_space<vmem>>, %arg10: memref<32x2xf32, #tpu.memory_space<vmem>>, %arg11: memref<128x1xf32, #tpu.memory_space<vmem>>, %arg12: memref<4x3xf32, #tpu.memory_space<vmem>>, %arg13: memref<1x32x128xbf16, #tpu.memory_space<vmem>>) attributes {dimension_semantics = [#tpu.dimension_semantics<parallel>, #tpu.dimension_semantics<parallel>], iteration_bounds = array<i64: 2, 2>, scalar_prefetch = 0 : i64, scratch_operands = 0 : i64, tpu.core_type = #tpu.core_type<tc>, window_params = [{transform_indices = @transform_0, window_bounds = array<i64: 1, 32, 128>}, {transform_indices = @transform_1, window_bounds = array<i64: 1, 32, 128>}, {transform_indices = @transform_2, window_bounds = array<i64: 1, 32, 6>}, {transform_indices = @transform_3, window_bounds = array<i64: 1, 32, 1>}, {pipeline_mode = #tpu.pipeline_mode<synchronous>, transform_indices = @transform_4, window_bounds = array<i64: 32, 32>}, {pipeline_mode = #tpu.pipeline_mode<synchronous>, transform_indices = @transform_5, window_bounds = array<i64: 4, 32>}, {pipeline_mode = #tpu.pipeline_mode<synchronous>, transform_indices = @transform_6, window_bounds = array<i64: 256, 32>}, {pipeline_mode = #tpu.pipeline_mode<synchronous>, transform_indices = @transform_7, window_bounds = array<i64: 32, 128>}, {pipeline_mode = #tpu.pipeline_mode<synchronous>, transform_indices = @transform_8, window_bounds = array<i64: 32, 2>}, {pipeline_mode = #tpu.pipeline_mode<synchronous>, transform_indices = @transform_9, window_bounds = array<i64: 128, 1>}, {pipeline_mode = #tpu.pipeline_mode<synchronous>, transform_indices = @transform_10, window_bounds = array<i64: 4, 3>}, {transform_indices = @transform_11, window_bounds = array<i64: 1, 32, 128>}]} {
    %c0 = arith.constant 0 : index
    %c0_0 = arith.constant 0 : index
    %c0_1 = arith.constant 0 : index
    %0 = vector.load %arg4[%c0, %c0_0, %c0_1] : memref<1x32x6xf32, #tpu.memory_space<vmem>>, vector<1x32x6xf32>
    %1 = vector.shape_cast %0 : vector<1x32x6xf32> to vector<32x6xf32>
    %c0_2 = arith.constant 0 : index
    %c0_3 = arith.constant 0 : index
    %c0_4 = arith.constant 0 : index
    %2 = vector.load %arg2[%c0_2, %c0_3, %c0_4] : memref<1x32x128xbf16, #tpu.memory_space<vmem>>, vector<1x32x128xbf16>
    %3 = vector.shape_cast %2 : vector<1x32x128xbf16> to vector<32x128xbf16>
    %4 = arith.extf %3 : vector<32x128xbf16> to vector<32x128xf32>
    %5 = vector.extract_strided_slice %1 {offsets = [0, 4], sizes = [32, 1], strides = [1, 1]} : vector<32x6xf32> to vector<32x1xf32>
    %6 = vector.broadcast %5 : vector<32x1xf32> to vector<32x128xf32>
    %7 = arith.mulf %4, %6 : vector<32x128xf32>
    %8 = vector.extract_strided_slice %1 {offsets = [0, 5], sizes = [32, 1], strides = [1, 1]} : vector<32x6xf32> to vector<32x1xf32>
    %9 = vector.broadcast %8 : vector<32x1xf32> to vector<32x128xf32>
    %10 = arith.addf %7, %9 : vector<32x128xf32>
    %11 = arith.truncf %10 : vector<32x128xf32> to vector<32x128xbf16>
    %c0_5 = arith.constant 0 : index
    %c0_6 = arith.constant 0 : index
    %12 = vector.load %arg6[%c0_5, %c0_6] : memref<32x32xbf16, #tpu.memory_space<vmem>>, vector<32x32xbf16>
    %cst = arith.constant dense<0.000000e+00> : vector<32x128xf32>
    %13 = tpu.matmul %12, %11, %cst {dimension_numbers = #tpu.dot_dimension_numbers<[1], [0], [0], [1], [0, 0, 1, 1], [], []>} : vector<32x32xbf16>, vector<32x128xbf16>, vector<32x128xf32> -> vector<32x128xf32>
    %c0_7 = arith.constant 0 : index
    %c0_8 = arith.constant 0 : index
    %14 = vector.load %arg10[%c0_7, %c0_8] : memref<32x2xf32, #tpu.memory_space<vmem>>, vector<32x1xf32>
    %15 = vector.broadcast %14 : vector<32x1xf32> to vector<32x128xf32>
    %16 = arith.addf %13, %15 : vector<32x128xf32>
    %c0_9 = arith.constant 0 : index
    %c0_10 = arith.constant 0 : index
    %c0_11 = arith.constant 0 : index
    %17 = vector.load %arg3[%c0_9, %c0_10, %c0_11] : memref<1x32x128xbf16, #tpu.memory_space<vmem>>, vector<1x32x128xbf16>
    %18 = vector.shape_cast %17 : vector<1x32x128xbf16> to vector<32x128xbf16>
    %19 = arith.extf %18 : vector<32x128xbf16> to vector<32x128xf32>
    %20 = vector.extract_strided_slice %1 {offsets = [0, 2], sizes = [32, 1], strides = [1, 1]} : vector<32x6xf32> to vector<32x1xf32>
    %21 = vector.broadcast %20 : vector<32x1xf32> to vector<32x128xf32>
    %22 = arith.mulf %19, %21 : vector<32x128xf32>
    %23 = vector.extract_strided_slice %1 {offsets = [0, 3], sizes = [32, 1], strides = [1, 1]} : vector<32x6xf32> to vector<32x1xf32>
    %24 = vector.broadcast %23 : vector<32x1xf32> to vector<32x128xf32>
    %25 = arith.addf %22, %24 : vector<32x128xf32>
    %26 = arith.truncf %25 : vector<32x128xf32> to vector<32x128xbf16>
    %c0_12 = arith.constant 0 : index
    %c0_13 = arith.constant 0 : index
    %27 = vector.load %arg7[%c0_12, %c0_13] : memref<4x32xbf16, #tpu.memory_space<vmem>>, vector<4x32xbf16>
    %cst_14 = arith.constant dense<0.000000e+00> : vector<4x128xf32>
    %28 = tpu.matmul %27, %26, %cst_14 {dimension_numbers = #tpu.dot_dimension_numbers<[1], [0], [0], [1], [0, 0, 1, 1], [], []>} : vector<4x32xbf16>, vector<32x128xbf16>, vector<4x128xf32> -> vector<4x128xf32>
    %c0_15 = arith.constant 0 : index
    %c0_16 = arith.constant 0 : index
    %29 = vector.load %arg12[%c0_15, %c0_16] : memref<4x3xf32, #tpu.memory_space<vmem>>, vector<4x1xf32>
    %30 = vector.broadcast %29 : vector<4x1xf32> to vector<4x128xf32>
    %31 = arith.addf %28, %30 : vector<4x128xf32>
    %cst_17 = arith.constant 5.000000e-01 : f32
    %32 = vector.broadcast %cst_17 : f32 to vector<4x128xf32>
    %33 = arith.mulf %32, %31 : vector<4x128xf32>
    %cst_18 = arith.constant 4.471500e-02 : f32
    %34 = vector.broadcast %cst_18 : f32 to vector<4x128xf32>
    %35 = arith.mulf %34, %31 : vector<4x128xf32>
    %36 = arith.mulf %35, %31 : vector<4x128xf32>
    %37 = arith.mulf %36, %31 : vector<4x128xf32>
    %38 = arith.addf %31, %37 : vector<4x128xf32>
    %cst_19 = arith.constant 0.797884583 : f32
    %39 = vector.broadcast %cst_19 : f32 to vector<4x128xf32>
    %40 = arith.mulf %39, %38 : vector<4x128xf32>
    %41 = math.tanh %40 : vector<4x128xf32>
    %cst_20 = arith.constant 1.000000e+00 : f32
    %42 = vector.broadcast %cst_20 : f32 to vector<4x128xf32>
    %43 = arith.addf %42, %41 : vector<4x128xf32>
    %44 = arith.mulf %33, %43 : vector<4x128xf32>
    %c0_21 = arith.constant 0 : index
    %c1 = arith.constant 1 : index
    %45 = vector.load %arg12[%c0_21, %c1] : memref<4x3xf32, #tpu.memory_space<vmem>>, vector<4x1xf32>
    %46 = vector.broadcast %45 : vector<4x1xf32> to vector<4x128xf32>
    %47 = arith.mulf %44, %46 : vector<4x128xf32>
    %cst_22 = arith.constant dense<0.000000e+00> : vector<128xf32>
    %48 = vector.multi_reduction <add>, %47, %cst_22 [0] : vector<4x128xf32> to vector<128xf32>
    %49 = vector.shape_cast %48 : vector<128xf32> to vector<1x128xf32>
    %c0_23 = arith.constant 0 : index
    %c2 = arith.constant 2 : index
    %50 = vector.load %arg12[%c0_23, %c2] : memref<4x3xf32, #tpu.memory_space<vmem>>, vector<1x1xf32>
    %51 = vector.broadcast %50 : vector<1x1xf32> to vector<1x128xf32>
    %52 = arith.addf %49, %51 : vector<1x128xf32>
    %c0_24 = arith.constant 0 : index
    %c0_25 = arith.constant 0 : index
    %c0_26 = arith.constant 0 : index
    %53 = vector.load %arg5[%c0_24, %c0_25, %c0_26] : memref<1x32x1xf32, #tpu.memory_space<vmem>>, vector<1x32x1xf32>
    %54 = vector.shape_cast %53 : vector<1x32x1xf32> to vector<32x1xf32>
    %55 = vector.broadcast %54 : vector<32x1xf32> to vector<32x128xf32>
    %56 = vector.broadcast %52 : vector<1x128xf32> to vector<32x128xf32>
    %57 = arith.mulf %55, %56 : vector<32x128xf32>
    %cst_27 = arith.constant 0.000000e+00 : f32
    %58 = vector.broadcast %cst_27 : f32 to vector<32x128xf32>
    %59 = arith.subf %58, %57 : vector<32x128xf32>
    %60 = math.exp %59 : vector<32x128xf32>
    %cst_28 = arith.constant 1.000000e+00 : f32
    %61 = vector.broadcast %cst_28 : f32 to vector<32x128xf32>
    %62 = arith.addf %61, %60 : vector<32x128xf32>
    %63 = tpu.reciprocal %62 {approx = true} : vector<32x128xf32> -> vector<32x128xf32>
    %64 = arith.mulf %16, %63 : vector<32x128xf32>
    %65 = arith.truncf %64 : vector<32x128xf32> to vector<32x128xbf16>
    %c0_29 = arith.constant 0 : index
    %c0_30 = arith.constant 0 : index
    %66 = vector.load %arg8[%c0_29, %c0_30] : memref<256x32xbf16, #tpu.memory_space<vmem>>, vector<128x32xbf16>
    %cst_31 = arith.constant dense<0.000000e+00> : vector<128x128xf32>
    %67 = tpu.matmul %66, %11, %cst_31 {dimension_numbers = #tpu.dot_dimension_numbers<[1], [0], [0], [1], [0, 0, 1, 1], [], []>} : vector<128x32xbf16>, vector<32x128xbf16>, vector<128x128xf32> -> vector<128x128xf32>
    %c128 = arith.constant 128 : index
    %c0_32 = arith.constant 0 : index
    %68 = vector.load %arg8[%c128, %c0_32] : memref<256x32xbf16, #tpu.memory_space<vmem>>, vector<128x32xbf16>
    %cst_33 = arith.constant dense<0.000000e+00> : vector<128x128xf32>
    %69 = tpu.matmul %68, %65, %cst_33 {dimension_numbers = #tpu.dot_dimension_numbers<[1], [0], [0], [1], [0, 0, 1, 1], [], []>} : vector<128x32xbf16>, vector<32x128xbf16>, vector<128x128xf32> -> vector<128x128xf32>
    %70 = arith.addf %67, %69 : vector<128x128xf32>
    %c0_34 = arith.constant 0 : index
    %c0_35 = arith.constant 0 : index
    %71 = vector.load %arg11[%c0_34, %c0_35] : memref<128x1xf32, #tpu.memory_space<vmem>>, vector<128x1xf32>
    %72 = vector.broadcast %71 : vector<128x1xf32> to vector<128x128xf32>
    %73 = arith.addf %70, %72 : vector<128x128xf32>
    %cst_36 = arith.constant 5.000000e-01 : f32
    %74 = vector.broadcast %cst_36 : f32 to vector<128x128xf32>
    %75 = arith.mulf %74, %73 : vector<128x128xf32>
    %cst_37 = arith.constant 4.471500e-02 : f32
    %76 = vector.broadcast %cst_37 : f32 to vector<128x128xf32>
    %77 = arith.mulf %76, %73 : vector<128x128xf32>
    %78 = arith.mulf %77, %73 : vector<128x128xf32>
    %79 = arith.mulf %78, %73 : vector<128x128xf32>
    %80 = arith.addf %73, %79 : vector<128x128xf32>
    %cst_38 = arith.constant 0.797884583 : f32
    %81 = vector.broadcast %cst_38 : f32 to vector<128x128xf32>
    %82 = arith.mulf %81, %80 : vector<128x128xf32>
    %83 = math.tanh %82 : vector<128x128xf32>
    %cst_39 = arith.constant 1.000000e+00 : f32
    %84 = vector.broadcast %cst_39 : f32 to vector<128x128xf32>
    %85 = arith.addf %84, %83 : vector<128x128xf32>
    %86 = arith.mulf %75, %85 : vector<128x128xf32>
    %c0_40 = arith.constant 0 : index
    %c0_41 = arith.constant 0 : index
    %87 = vector.load %arg9[%c0_40, %c0_41] : memref<32x128xbf16, #tpu.memory_space<vmem>>, vector<32x128xbf16>
    %88 = arith.truncf %86 : vector<128x128xf32> to vector<128x128xbf16>
    %cst_42 = arith.constant dense<0.000000e+00> : vector<32x128xf32>
    %89 = tpu.matmul %87, %88, %cst_42 {dimension_numbers = #tpu.dot_dimension_numbers<[1], [0], [0], [1], [0, 0, 1, 1], [], []>} : vector<32x128xbf16>, vector<128x128xbf16>, vector<32x128xf32> -> vector<32x128xf32>
    %c0_43 = arith.constant 0 : index
    %c1_44 = arith.constant 1 : index
    %90 = vector.load %arg10[%c0_43, %c1_44] : memref<32x2xf32, #tpu.memory_space<vmem>>, vector<32x1xf32>
    %91 = vector.broadcast %90 : vector<32x1xf32> to vector<32x128xf32>
    %92 = arith.addf %89, %91 : vector<32x128xf32>
    %c0_45 = arith.constant 0 : index
    %c0_46 = arith.constant 0 : index
    %c0_47 = arith.constant 0 : index
    %93 = vector.load %arg2[%c0_45, %c0_46, %c0_47] : memref<1x32x128xbf16, #tpu.memory_space<vmem>>, vector<1x32x128xbf16>
    %94 = vector.shape_cast %93 : vector<1x32x128xbf16> to vector<32x128xbf16>
    %95 = arith.extf %94 : vector<32x128xbf16> to vector<32x128xf32>
    %96 = arith.addf %95, %92 : vector<32x128xf32>
    %97 = arith.truncf %96 : vector<32x128xf32> to vector<32x128xbf16>
    %c0_48 = arith.constant 0 : index
    %c0_49 = arith.constant 0 : index
    %c0_50 = arith.constant 0 : index
    %98 = vector.load %arg13[%c0_48, %c0_49, %c0_50] : memref<1x32x128xbf16, #tpu.memory_space<vmem>>, vector<1x32x128xbf16>
    %99 = vector.shape_cast %98 : vector<1x32x128xbf16> to vector<32x128xbf16>
    %100 = vector.shape_cast %97 : vector<32x128xbf16> to vector<1x32x128xbf16>
    tpu.vector_store %arg13[%c0_48, %c0_49, %c0_50], %100 {strides = array<i32>} : memref<1x32x128xbf16, #tpu.memory_space<vmem>>, vector<1x32x128xbf16>,
    return
  }
  func.func @transform_0(%arg0: i32, %arg1: i32) -> (i32, i32, i32) {
    %c0_i32 = arith.constant 0 : i32
    %c0_i32_0 = arith.constant 0 : i32
    return %arg0, %c0_i32, %arg1 : i32, i32, i32
  }
  func.func @transform_1(%arg0: i32, %arg1: i32) -> (i32, i32, i32) {
    %c0_i32 = arith.constant 0 : i32
    %c0_i32_0 = arith.constant 0 : i32
    return %arg0, %c0_i32, %arg1 : i32, i32, i32
  }
  func.func @transform_2(%arg0: i32, %arg1: i32) -> (i32, i32, i32) {
    %c0_i32 = arith.constant 0 : i32
    %c0_i32_0 = arith.constant 0 : i32
    %c0_i32_1 = arith.constant 0 : i32
    return %arg0, %c0_i32, %c0_i32_0 : i32, i32, i32
  }
  func.func @transform_3(%arg0: i32, %arg1: i32) -> (i32, i32, i32) {
    %c0_i32 = arith.constant 0 : i32
    %c0_i32_0 = arith.constant 0 : i32
    %c0_i32_1 = arith.constant 0 : i32
    return %arg0, %c0_i32, %c0_i32_0 : i32, i32, i32
  }
  func.func @transform_4(%arg0: i32, %arg1: i32) -> (i32, i32) {
    %c0_i32 = arith.constant 0 : i32
    %c0_i32_0 = arith.constant 0 : i32
    %c0_i32_1 = arith.constant 0 : i32
    return %c0_i32, %c0_i32_0 : i32, i32
  }
  func.func @transform_5(%arg0: i32, %arg1: i32) -> (i32, i32) {
    %c0_i32 = arith.constant 0 : i32
    %c0_i32_0 = arith.constant 0 : i32
    %c0_i32_1 = arith.constant 0 : i32
    return %c0_i32, %c0_i32_0 : i32, i32
  }
  func.func @transform_6(%arg0: i32, %arg1: i32) -> (i32, i32) {
    %c0_i32 = arith.constant 0 : i32
    %c0_i32_0 = arith.constant 0 : i32
    %c0_i32_1 = arith.constant 0 : i32
    return %c0_i32, %c0_i32_0 : i32, i32
  }
  func.func @transform_7(%arg0: i32, %arg1: i32) -> (i32, i32) {
    %c0_i32 = arith.constant 0 : i32
    %c0_i32_0 = arith.constant 0 : i32
    %c0_i32_1 = arith.constant 0 : i32
    return %c0_i32, %c0_i32_0 : i32, i32
  }
  func.func @transform_8(%arg0: i32, %arg1: i32) -> (i32, i32) {
    %c0_i32 = arith.constant 0 : i32
    %c0_i32_0 = arith.constant 0 : i32
    %c0_i32_1 = arith.constant 0 : i32
    return %c0_i32, %c0_i32_0 : i32, i32
  }
  func.func @transform_9(%arg0: i32, %arg1: i32) -> (i32, i32) {
    %c0_i32 = arith.constant 0 : i32
    %c0_i32_0 = arith.constant 0 : i32
    %c0_i32_1 = arith.constant 0 : i32
    return %c0_i32, %c0_i32_0 : i32, i32
  }
  func.func @transform_10(%arg0: i32, %arg1: i32) -> (i32, i32) {
    %c0_i32 = arith.constant 0 : i32
    %c0_i32_0 = arith.constant 0 : i32
    %c0_i32_1 = arith.constant 0 : i32
    return %c0_i32, %c0_i32_0 : i32, i32
  }
  func.func @transform_11(%arg0: i32, %arg1: i32) -> (i32, i32, i32) {
    %c0_i32 = arith.constant 0 : i32
    %c0_i32_0 = arith.constant 0 : i32
    return %arg0, %c0_i32, %arg1 : i32, i32, i32
  }
}

</mosaic_0001>

<bundles_post_ra>
// kernel: dff_block_pallas.3
= control target key start
LH: loop header
LB: loop body
LE: loop exit
PB: predicated region body
PF: predicated region fallthrough
CT: control target
= control target key end

     0   :  { %s1024_s18 = smov 0   ;;  %s1026_s19 = smov 0   ;;  %s1168_s0 = inlined_call_operand.vmem [shape: bf16[2,32,256], index: 0, kind: input, shape index: {}]   ;;  %s1169_s1 = inlined_call_operand.vmem [shape: bf16[2,32,256], index: 1, kind: input, shape index: {}]   ;;  %s1170_s2 = inlined_call_operand.vmem [shape: f32[2,32,6], index: 2, kind: input, shape index: {}]   ;;  %s1171_s3 = inlined_call_operand.vmem [shape: bf16[32,32], index: 3, kind: input, shape index: {}]   ;;  %s1172_s4 = inlined_call_operand.vmem [shape: f32[32,1], index: 4, kind: input, shape index: {}]   ;;  %s1173_s5 = inlined_call_operand.vmem [shape: bf16[2,32,256], index: 5, kind: output, shape index: {}]  }
   0x1   :  { %s1028_s20 = smov 0   ;;  %s1030_s21 = smov 0  }
   0x2   :  { %s1032_s22 = smov 0   ;;  %s1034_s23 = smov 0  }
   0x3   :  { %s1036_s24 = smov 0  }
   0x4 LB: > { %s24_s25 = sadd.s32 1, %s980_s22  ;;  %s27_s26 = sadd.s32 1, %s984_s23  ;;  %s988_s24 = sphi %s1036_s24, %s15_s24   ;;  %s984_s23 = sphi %s1034_s23, %s1181_s23   ;;  %s980_s22 = sphi %s1032_s22, %s1180_s22   ;;  %s976_s21 = sphi %s1030_s21, %s1179_s21   ;;  %s972_s20 = sphi %s1028_s20, %s1178_s20   ;;  %s968_s19 = sphi %s1026_s19, %s1177_s19   ;;  %s964_s18 = sphi %s1024_s18, %s1176_s18  }
   0x5   : > { %p25_p0 = scmp.ge.s32.totalorder %s24_s25, 2  ;;  %s784_s27 = sadd.s32 4294967295, %s988_s24  }
   0x6   : > { %p43_p1 = scmp.ne.s32.totalorder %s968_s19, %s964_s18  ;;  %p44_p2 = scmp.eq.s32.totalorder %s988_s24, 0 }
   0x7   : > { %s1183_s25 = smov (%p25_p0, %s24_s25), 0  ;;  %s1185_s26 = smov (!%p25_p0, %s27_s26), %s984_s23 }
   0x8   : > { %p29_p3 = scmp.ge.s32.totalorder %s1185_s26, 2  ;;  %p171_p4 = scmp.eq.s32.totalorder %s784_s27, 3 }
   0x9   : > { %s32_s28 = ssub.s32 %s980_s22, %s1183_s25  ;;  %p1070_p5 = por %p44_p2, %p43_p1 }
   0xa   : > { %s1187_s26 = smov (%p29_p3, %s1185_s26), 0  ;;  %p1076_p6 = por %p171_p4, %p43_p1 }
   0xb   : > { %s31_s6 = ssub.s32 %s984_s23, %s1187_s26  ;;  %s36_s8 = sadd.s32 1, %s968_s19 }
   0xc   : > { %s33_s7 = sor.u32 %s32_s28, %s31_s6  ;;  %p787_p8 = scmp.ge.s32.totalorder %s988_s24, 4 }
   0xd   : > { %p34_p7 = scmp.eq.s32.totalorder %s33_s7, 0 }
   0xe   : > { %199 = sbr.rel (%p787_p8) target bundleno = 35 (0x23), region = 24 }
   0xf   : > { %s1084_s9 = scalar_select %p34_p7, %s968_s19, %s36_s8  }
  0x13   : > { %202 = sbr.rel (!%p1070_p5) target bundleno = 27 (0x1b), region = 28  ;;  %s204_s10 = sand.u32 (%p1070_p5), 1, %s968_s19  }
  0x14   : > { %s789_s11 = sshll.u32 (%p1070_p5), %s984_s23, 3  ;;  %s788_s12 = sshll.u32 (%p1070_p5), %s204_s10, 4 }
  0x15   : > { %s208_s13 = sadd.s32 (%p1070_p5), %s980_s22, %s789_s11  ;;  %s206_s27 = scalar_lea.vmem (%p1070_p5), [#allocation2], %s788_s12 }
  0x16   : > { %s790_s14 = sshll.u32 (%p1070_p5), %s208_s13, 2 }
  0x17   : > { %s210_s17 = scalar_lea.vmem (%p1070_p5), %s1168_s0, %s790_s14 }
  0x18   : > { %v227_v0 = vld [vmem:[%s210_s17] sm:$0xf]  ;;  %v229_v1 = vld [vmem:[%s210_s17 + $0x8] sm:$0xf]  ;;  %v231_v2 = vld [vmem:[%s210_s17 + $0x10] sm:$0xf] }
  0x19   : > { %228 = vst [vmem:[%s206_s27] sm:$0xf] %v227_v0  ;;  %230 = vst [vmem:[%s206_s27 + $0x4] sm:$0xf] %v229_v1  ;;  %v233_v3 = vld [vmem:[%s210_s17 + $0x18] sm:$0xf] }
  0x1a   : > { %232 = vst [vmem:[%s206_s27 + $0x8] sm:$0xf] %v231_v2  ;;  %234 = vst [vmem:[%s206_s27 + $0xc] sm:$0xf] %v233_v3 }
  0x1b PF: > { %266 = sbr.rel (!%p1070_p5) target bundleno = 35 (0x23), region = 69  ;;  %s268_s28 = sand.u32 (%p1070_p5), 1, %s968_s19  }
  0x1c   : > { %s792_s6 = sshll.u32 (%p1070_p5), %s984_s23, 3  ;;  %s791_s7 = sshll.u32 (%p1070_p5), %s268_s28, 4 }
  0x1d   : > { %s272_s8 = sadd.s32 (%p1070_p5), %s980_s22, %s792_s6  ;;  %s270_s14 = scalar_lea.vmem (%p1070_p5), [#allocation3], %s791_s7 }
  0x1e   : > { %s793_s10 = sshll.u32 (%p1070_p5), %s272_s8, 2 }
  0x1f   : > { %s274_s12 = scalar_lea.vmem (%p1070_p5), %s1169_s1, %s793_s10 }
  0x20   : > { %v291_v4 = vld [vmem:[%s274_s12] sm:$0xf]  ;;  %v293_v5 = vld [vmem:[%s274_s12 + $0x8] sm:$0xf]  ;;  %v295_v6 = vld [vmem:[%s274_s12 + $0x10] sm:$0xf] }
  0x21   : > { %292 = vst [vmem:[%s270_s14] sm:$0xf] %v291_v4  ;;  %294 = vst [vmem:[%s270_s14 + $0x4] sm:$0xf] %v293_v5  ;;  %v297_v7 = vld [vmem:[%s274_s12 + $0x18] sm:$0xf] }
  0x22   : > { %296 = vst [vmem:[%s270_s14 + $0x8] sm:$0xf] %v295_v6  ;;  %298 = vst [vmem:[%s270_s14 + $0xc] sm:$0xf] %v297_v7 }
  0x23 PF: > { %p794_p9 = scmp.ge.s32.totalorder %s988_s24, 1  ;;  %p337_p10 = scmp.lt.s32.totalorder %s988_s24, 5 }
  0x25   : > { %p338_p11 = pnand %p794_p9, %p337_p10 }
  0x26   : > { %p386_p12 = scmp.lt.s32.totalorder (!%p338_p11), %s976_s21, 1 }
  0x27   : > { %341 = sbr.rel (%p338_p11) target bundleno = 437 (0x1b5), region = 114 }
  0x2c   : > { %v990_v8 = vmov 2   ;;  %v991_v9 = vmov 0   ;;  %s387_s29 = scalar_select %p386_p12, %s976_s21, 1  ;;  %v992_v12 = vmov 1   ;;  %v993_v13 = vmov 3   ;;  %v932_v16 = vld [vmem:[%s1171_s3] sm:$0xff]  }
  0x2d   : > { %920 = vset.pattern.permute.xlu1 %v990_v8  ;;  %919 = vset.pattern.permute.xlu0 %v991_v9  ;;  %vm540_vm0 = vcmask 261120   ;;  %v507_v17 = vld [vmem:[%s1172_s4 + $0x8] sm:$0xff]  ;;  %v506_v18 = vld [vmem:[%s1172_s4] sm:$0xff]  ;;  %v508_v19 = vld [vmem:[%s1172_s4 + $0x10] sm:$0xff]  ;;  %s809_s7 = sshll.u32 (%p1076_p6), %s976_s21, 3 }
  0x2e   : > { %s813_s15 = sshll.u32 %s387_s29, 5  ;;  %855 = vmatprep.mubr.msk.bf16.mxu0 %vm540_vm0, %v932_v16  ;;  %v509_v20 = vld [vmem:[%s1172_s4 + $0x18] sm:$0xff]  ;;  %v933_v7 = vld [vmem:[%s1171_s3 + $0x8] sm:$0xff]   ;;  %s624_s8 = sadd.s32 (%p1076_p6), %s972_s20, %s809_s7 }
  0x2f   : > { %s390_s27 = scalar_lea.vmem %s1170_s2, %s813_s15  ;;  %s344_s15 = sand.u32 1, %s964_s18  }
  0x30   : > { %v394_v10 = vld [vmem:[%s390_s27 + $0x10] sm:$0xff]  ;;  %v395_v11 = vld [vmem:[%s390_s27 + $0x18] sm:$0xff]  ;;  %v392_v14 = vld [vmem:[%s390_s27] sm:$0xff]  ;;  %s1127_s16 = sshll.u32 %s344_s15, 4  ;;  %s810_s10 = sshll.u32 (%p1076_p6), %s624_s8, 2 }
  0x31   : > { %465 = vperm.xlu1 %920, %v394_v10   ;;  %416 = vperm.xlu0 %919, %v394_v10   ;;  %v393_v15 = vld [vmem:[%s390_s27 + $0x8] sm:$0xff]  ;;  %s346_s17 = scalar_lea.vmem [#allocation2], %s1127_s16  ;;  %s353_s27 = scalar_lea.vmem [#allocation3], %s1127_s16 }
  0x32   : > { %v844_v25 = vld [vmem:[%s346_s17 + $0x8] sm:$0xff]   ;;  %v827_v51 = vld [vmem:[%s353_s27] sm:$0xff]   ;;  %s385_s6 = scalar_lea.vmem [#allocation4], %s1127_s16  ;;  %s626_s12 = scalar_lea.vmem (%p1076_p6), %s1173_s5, %s810_s10 }
  0x33   : > { %v825_v27 = vunpack.c.h.bf16 %v844_v25  ;;  %v845_v29 = vld [vmem:[%s353_s27 + $0x8] sm:$0xff]   ;;  %v824_v30 = vunpack.c.l.bf16 %v844_v25  ;;  %v819_v52 = vld [vmem:[%s346_s17] sm:$0xff]   ;;  %v828_v53 = vunpack.c.l.bf16 %v827_v51  ;;  %v829_v56 = vunpack.c.h.bf16 %v827_v51 }
  0x34   : > { %v833_v31 = vunpack.c.h.bf16 %v845_v29  ;;  %v832_v32 = vunpack.c.l.bf16 %v845_v29  ;;  %v821_v54 = vunpack.c.h.bf16 %v819_v52  ;;  %v820_v55 = vunpack.c.l.bf16 %v819_v52 }
  0x35   : > { %469 = vperm.xlu1 %920, %v395_v11   ;;  %421 = vperm.xlu0 %919, %v395_v11  }
  0x39   : > { %921 = vset.pattern.permute.xlu1 %v992_v12  ;;  %923 = vset.pattern.permute.xlu0 %v993_v13 }
  0x3a   : > { %441 = vperm.xlu1 %921, %v395_v11   ;;  %489 = vperm.xlu0 %923, %v395_v11  }
  0x3e   : > { %922 = vset.pattern.permute.xlu1 %v993_v13  ;;  %925 = vset.pattern.permute.xlu0 %v990_v8 }
  0x3f   : > { %485 = vperm.xlu1 %922, %v394_v10   ;;  %457 = vperm.xlu0 %925, %v392_v14  }
  0x43   : > { %924 = vset.pattern.permute.xlu1 %v991_v9  ;;  %926 = vset.pattern.permute.xlu0 %v992_v12 }
  0x44   : > { %437 = vperm.xlu0 %926, %v394_v10   ;;  %406 = vperm.xlu1 %924, %v392_v14  }
  0x48   : > { %411 = vperm.xlu1 %924, %v393_v15   ;;  %433 = vperm.xlu0 %926, %v393_v15  }
  0x4c   : > { %927 = vset.pattern.permute.xlu1 %v990_v8  ;;  %930 = vset.pattern.permute.xlu0 %v991_v9 }
  0x4d   : > { %461 = vperm.xlu1 %927, %v393_v15   ;;  %512 = vperm.xlu0 %930, %v506_v18  }
  0x51   : > { %928 = vset.pattern.permute.xlu1 %v992_v12  ;;  %527 = vperm.xlu0 %930, %v509_v20  }
  0x52   : > { %429 = vperm.xlu1 %928, %v392_v14  }
  0x56   : > { %929 = vset.pattern.permute.xlu1 %v993_v13 }
  0x57   : > { %477 = vperm.xlu1 %929, %v392_v14  }
  0x5b   : > { %481 = vperm.xlu1 %929, %v393_v15  }
  0x5f   : > { %931 = vset.pattern.permute.xlu1 %v991_v9 }
  0x60   : > { %517 = vperm.xlu1 %931, %v507_v17  }
  0x64   : > { %522 = vperm.xlu1 %931, %v508_v19  }
  0xac   : > { %v466_v21 = vpop.permute.xlu1 %465  ;;  %v417_v22 = vpop.permute.xlu0 %416 }
  0xad   : > { %v426_v36 = vmul.f32 %v824_v30, %v417_v22  ;;  %v474_v38 = vmul.f32 %v832_v32, %v466_v21 }
  0xb0   : > { %v470_v23 = vpop.permute.xlu1 %469  ;;  %v422_v24 = vpop.permute.xlu0 %421 }
  0xb1   : > { %v427_v33 = vmul.f32 %v825_v27, %v422_v24  ;;  %v475_v37 = vmul.f32 %v833_v31, %v470_v23 }
  0xb5   : > { %v442_v26 = vpop.permute.xlu1 %441  ;;  %v490_v28 = vpop.permute.xlu0 %489 }
  0xb6   : > { %v447_v39 = vadd.f32 %v442_v26, %v427_v33  ;;  %v495_v40 = vadd.f32 %v490_v28, %v475_v37 }
  0xb8   : > { %v499_v45 = vmul.f32 %v495_v40, %v447_v39 }
  0xba   : > { %v486_v34 = vpop.permute.xlu1 %485  ;;  %v458_v35 = vpop.permute.xlu0 %457 }
  0xbb   : > { %v494_v43 = vadd.f32 %v486_v34, %v474_v38  ;;  %v472_v58 = vmul.f32 %v828_v53, %v458_v35 }
  0xbf   : > { %v438_v41 = vpop.permute.xlu0 %437  ;;  %v407_v42 = vpop.permute.xlu1 %406 }
  0xc0   : > { %v446_v44 = vadd.f32 %v438_v41, %v426_v36  ;;  %v424_v61 = vmul.f32 %v820_v55, %v407_v42 }
  0xc2   : > { %v498_v46 = vmul.f32 %v494_v43, %v446_v44 }
  0xc3   : > { %v412_v47 = vpop.permute.xlu1 %411  ;;  %v434_v60 = vpop.permute.xlu0 %433 }
  0xc4   : > { %v501_v48 = vpack.c.bf16 %v499_v45, %v498_v46  ;;  %v425_v59 = vmul.f32 %v821_v54, %v412_v47 }
  0xc6   : > { %851 = vmatprep.subr.bf16.mxu0 %v501_v48  ;;  %v445_v1 = vadd.f32 %v434_v60, %v425_v59 }
  0xc7   : > { %852 = vmatpush3.bf16.msra.mxu0 %v501_v48 }
  0xc8   : > { %v462_v49 = vpop.permute.xlu1 %461  ;;  %v513_v9 = vpop.permute.xlu0 %512 }
  0xc9   : > { %v473_v62 = vmul.f32 %v829_v56, %v462_v49 }
  0xcc   : > { %v528_v13 = vpop.permute.xlu0 %527 }
  0xcd   : > { %v430_v50 = vpop.permute.xlu1 %429 }
  0xce   : > { %v444_v2 = vadd.f32 %v430_v50, %v424_v61 }
  0xd2   : > { %v478_v57 = vpop.permute.xlu1 %477 }
  0xd3   : > { %v492_v63 = vadd.f32 %v478_v57, %v472_v58 }
  0xd5   : > { %v496_v4 = vmul.f32 %v492_v63, %v444_v2 }
  0xd6   : > { %v482_v0 = vpop.permute.xlu1 %481 }
  0xd7   : > { %v493_v3 = vadd.f32 %v482_v0, %v473_v62 }
  0xd9   : > { %v497_v5 = vmul.f32 %v493_v3, %v445_v1 }
  0xdb   : > { %v500_v6 = vpack.c.bf16 %v497_v5, %v496_v4  ;;  %v518_v8 = vpop.permute.xlu1 %517 }
  0xdd   : > { %853 = vmatprep.subr.bf16.mxu0 %v500_v6 }
  0xde   : > { %854 = vmatpush3.bf16.msra.mxu0 %v500_v6 }
  0xdf   : > { %v523_v11 = vpop.permute.xlu1 %522 }
  0xe1   : > { %856 = vmatmul.mubr.msk.bf16.vlgmr.msra.gmra.mxu0 %vm540_vm0, %v933_v7 }
 0x1a1   : > { %v857_v10 = vpop.f32.mrf.mxu0 }
 0x1a2   : > { %v590_v15 = vadd.f32 %v857_v10, %v523_v11 }
 0x1a3   : > { %v581_v12 = vpop.f32.mrf.mxu0 }
 0x1a4   : > { %v582_v18 = vadd.f32 %v581_v12, %v513_v9 }
 0x1a5   : > { %v858_v14 = vpop.f32.mrf.mxu0 }
 0x1a6   : > { %v593_v16 = vadd.f32 %v858_v14, %v528_v13 }
 0x1a7   : > { %v584_v17 = vpop.f32.mrf.mxu0 }
 0x1a8   : > { %v842_v19 = vpack.c.bf16 %v593_v16, %v590_v15  ;;  %v585_v20 = vadd.f32 %v584_v17, %v518_v8  ;;  %622 = sbr.rel (!%p1076_p6) target bundleno = 437 (0x1b5), region = 126 }
 0x1aa   : > { %846 = vst [vmem:[%s385_s6 + $0x8] sm:$0xff] %v842_v19   ;;  %v837_v21 = vpack.c.bf16 %v585_v20, %v582_v18 }
 0x1ac   : > { %838 = vst [vmem:[%s385_s6] sm:$0xff] %v837_v21  }
 0x1b1   : > { %v647_v24 = vld [vmem:[%s385_s6 + $0x8] sm:$0xf]  ;;  %v649_v25 = vld [vmem:[%s385_s6 + $0xc] sm:$0xf] }
 0x1b2   : > { %648 = vst [vmem:[%s626_s12 + $0x10] sm:$0xf] %v647_v24  ;;  %650 = vst [vmem:[%s626_s12 + $0x18] sm:$0xf] %v649_v25 }
 0x1b3   : > { %v643_v22 = vld [vmem:[%s385_s6] sm:$0xf]  ;;  %v645_v23 = vld [vmem:[%s385_s6 + $0x4] sm:$0xf] }
 0x1b4   : > { %644 = vst [vmem:[%s626_s12] sm:$0xf] %v643_v22  ;;  %646 = vst [vmem:[%s626_s12 + $0x8] sm:$0xf] %v645_v23 }
 0x1b5 PF: > { %s15_s24 = sadd.s32 1, %s988_s24   ;;  %s1176_s18 = smov %s968_s19 }
 0x1b6   : > { %p12_p13 = scmp.ge.s32.totalorder %s15_s24, 6   ;;  %s1177_s19 = smov %s1084_s9 }
 0x1b7   : > { %s1178_s20 = smov %s980_s22  ;;  %s1179_s21 = smov %s984_s23 }
 0x1b8   : > { %s1180_s22 = smov %s1183_s25  ;;  %s1181_s23 = smov %s1187_s26 }
 0x1b9   :  { %14 = sbr.rel (!%p12_p13) target bundleno = 4 (0x4), region = 209 }

// kernel: dff_block_pallas.4
= control target key start
LH: loop header
LB: loop body
LE: loop exit
PB: predicated region body
PF: predicated region fallthrough
CT: control target
= control target key end

     0   :  { %s2954_s0 = inlined_call_operand.vmem [shape: bf16[2,32,256], index: 0, kind: input, shape index: {}]   ;;  %s2955_s1 = inlined_call_operand.vmem [shape: f32[2,32,6], index: 1, kind: input, shape index: {}]   ;;  %s2956_s2 = inlined_call_operand.vmem [shape: bf16[2,32,256], index: 2, kind: input, shape index: {}]   ;;  %s2957_s3 = inlined_call_operand.vmem [shape: bf16[2,32,256], index: 3, kind: input, shape index: {}]   ;;  %s2958_s4 = inlined_call_operand.vmem [shape: bf16[64,32], index: 4, kind: input, shape index: {}]   ;;  %s2959_s5 = inlined_call_operand.vmem [shape: bf16[256,32], index: 5, kind: input, shape index: {}]   ;;  %s2960_s6 = inlined_call_operand.vmem [shape: bf16[32,128], index: 6, kind: input, shape index: {}]   ;;  %s2961_s7 = inlined_call_operand.vmem [shape: f32[32,3], index: 7, kind: input, shape index: {}]   ;;  %s2962_s8 = inlined_call_operand.vmem [shape: f32[128,1], index: 8, kind: input, shape index: {}]   ;;  %s2963_s9 = inlined_call_operand.vmem [shape: bf16[2,32,256], index: 9, kind: output, shape index: {0}]   ;;  %s2964_s10 = inlined_call_operand.vmem [shape: f32[2,32,1], index: 10, kind: output, shape index: {1}]  }
   0x1   :  { %2967 = sst [smem:[#allocation8_spill]] %s2954_s0 }
   0x2   :  { %s2424_s13 = smov 0   ;;  %s2426_s14 = smov 0  }
   0x3   :  { %s2428_s15 = smov 0   ;;  %s2430_s16 = smov 0  }
   0x4   :  { %s2432_s17 = smov 0   ;;  %s2434_s18 = smov 0  }
   0x5   :  { %s2436_s19 = smov 0  }
   0x6 LB: > { %s30_s20 = sadd.s32 1, %s2353_s17  ;;  %s33_s21 = sadd.s32 1, %s2357_s18  ;;  %s2361_s19 = sphi %s2436_s19, %s21_s19   ;;  %s2357_s18 = sphi %s2434_s18, %s2980_s18   ;;  %s2353_s17 = sphi %s2432_s17, %s2979_s17   ;;  %s2349_s16 = sphi %s2430_s16, %s2978_s16   ;;  %s2345_s15 = sphi %s2428_s15, %s2977_s15   ;;  %s2341_s14 = sphi %s2426_s14, %s2976_s14   ;;  %s2337_s13 = sphi %s2424_s13, %s2975_s13  }
   0x7   : > { %p31_p0 = scmp.ge.s32.totalorder %s30_s20, 2  ;;  %s1930_s22 = sadd.s32 4294967295, %s2361_s19  }
   0x8   : > { %p49_p1 = scmp.ne.s32.totalorder %s2341_s14, %s2337_s13  ;;  %p50_p2 = scmp.eq.s32.totalorder %s2361_s19, 0 }
   0x9   : > { %s2982_s20 = smov (%p31_p0, %s30_s20), 0  ;;  %s2984_s21 = smov (!%p31_p0, %s33_s21), %s2357_s18 }
   0xa   : > { %2968 = sst [smem:[#allocation6_spill]] %s2982_s20  ;;  %p35_p3 = scmp.ge.s32.totalorder %s2984_s21, 2 }
   0xb   : > { %p268_p4 = scmp.eq.s32.totalorder %s1930_s22, 3  ;;  %s38_s23 = ssub.s32 %s2353_s17, %s2982_s20 }
   0xc   : > { %p2470_p5 = por %p50_p2, %p49_p1  ;;  %s2986_s21 = smov (%p35_p3, %s2984_s21), 0 }
   0xd   : > { %2970 = sst [smem:[#allocation7_spill]] %s2986_s21  ;;  %p2476_p6 = por %p268_p4, %p49_p1 }
   0xe   : > { %s37_s26 = ssub.s32 %s2357_s18, %s2986_s21  ;;  %s42_s28 = sadd.s32 1, %s2341_s14 }
   0xf   : > { %s39_s27 = sor.u32 %s38_s23, %s37_s26  ;;  %p1933_p8 = scmp.ge.s32.totalorder %s2361_s19, 4 }
  0x10   : > { %p40_p7 = scmp.eq.s32.totalorder %s39_s27, 0 }
  0x11   : > { %331 = sbr.rel (%p1933_p8) target bundleno = 50 (0x32), region = 36 }
  0x12   : > { %s2484_s29 = scalar_select %p40_p7, %s2341_s14, %s42_s28  }
  0x16   : > { %334 = sbr.rel (!%p2470_p5) target bundleno = 34 (0x22), region = 40  ;;  %s336_s30 = sand.u32 (%p2470_p5), 1, %s2341_s14  }
  0x17   : > { %s1935_s11 = sshll.u32 (%p2470_p5), %s2357_s18, 3  ;;  %s1934_s12 = sshll.u32 (%p2470_p5), %s336_s30, 4 }
  0x18   : > { %s340_s22 = sadd.s32 (%p2470_p5), %s2353_s17, %s1935_s11  ;;  %s2972_s0 = sld [smem:[#allocation8_spill]] (%p2470_p5) }
  0x19   : > { %s1936_s20 = sshll.u32 (%p2470_p5), %s340_s22, 2  ;;  %s338_s27 = scalar_lea.vmem (%p2470_p5), [#allocation2], %s1934_s12 }
  0x1e   : > { %s342_s26 = scalar_lea.vmem %s2972_s0, %s1936_s20 }
  0x1f   : > { %v359_v0 = vld [vmem:[%s342_s26] sm:$0xf]  ;;  %v361_v1 = vld [vmem:[%s342_s26 + $0x8] sm:$0xf]  ;;  %v363_v2 = vld [vmem:[%s342_s26 + $0x10] sm:$0xf] }
  0x20   : > { %360 = vst [vmem:[%s338_s27] sm:$0xf] %v359_v0  ;;  %362 = vst [vmem:[%s338_s27 + $0x4] sm:$0xf] %v361_v1  ;;  %v365_v3 = vld [vmem:[%s342_s26 + $0x18] sm:$0xf] }
  0x21   : > { %364 = vst [vmem:[%s338_s27 + $0x8] sm:$0xf] %v363_v2  ;;  %366 = vst [vmem:[%s338_s27 + $0xc] sm:$0xf] %v365_v3 }
  0x22 PF: > { %406 = sbr.rel (!%p2470_p5) target bundleno = 42 (0x2a), region = 85  ;;  %s408_s28 = sand.u32 (%p2470_p5), 1, %s2341_s14  }
  0x23   : > { %s1938_s30 = sshll.u32 (%p2470_p5), %s2357_s18, 3  ;;  %s1937_s21 = sshll.u32 (%p2470_p5), %s408_s28, 4 }
  0x24   : > { %s412_s20 = sadd.s32 (%p2470_p5), %s2353_s17, %s1938_s30  ;;  %s410_s26 = scalar_lea.vmem (%p2470_p5), [#allocation3], %s1937_s21 }
  0x25   : > { %s1939_s11 = sshll.u32 (%p2470_p5), %s412_s20, 2 }
  0x26   : > { %s414_s12 = scalar_lea.vmem (%p2470_p5), %s2956_s2, %s1939_s11 }
  0x27   : > { %v431_v4 = vld [vmem:[%s414_s12] sm:$0xf]  ;;  %v433_v5 = vld [vmem:[%s414_s12 + $0x8] sm:$0xf]  ;;  %v435_v6 = vld [vmem:[%s414_s12 + $0x10] sm:$0xf] }
  0x28   : > { %432 = vst [vmem:[%s410_s26] sm:$0xf] %v431_v4  ;;  %434 = vst [vmem:[%s410_s26 + $0x4] sm:$0xf] %v433_v5  ;;  %v437_v7 = vld [vmem:[%s414_s12 + $0x18] sm:$0xf] }
  0x29   : > { %436 = vst [vmem:[%s410_s26 + $0x8] sm:$0xf] %v435_v6  ;;  %438 = vst [vmem:[%s410_s26 + $0xc] sm:$0xf] %v437_v7 }
  0x2a PF: > { %470 = sbr.rel (!%p2470_p5) target bundleno = 50 (0x32), region = 126  ;;  %s472_s27 = sand.u32 (%p2470_p5), 1, %s2341_s14  }
  0x2b   : > { %s1941_s28 = sshll.u32 (%p2470_p5), %s2357_s18, 3  ;;  %s1940_s30 = sshll.u32 (%p2470_p5), %s472_s27, 4 }
  0x2c   : > { %s476_s20 = sadd.s32 (%p2470_p5), %s2353_s17, %s1941_s28  ;;  %s474_s12 = scalar_lea.vmem (%p2470_p5), [#allocation4], %s1940_s30 }
  0x2d   : > { %s1942_s11 = sshll.u32 (%p2470_p5), %s476_s20, 2 }
  0x2e   : > { %s478_s21 = scalar_lea.vmem (%p2470_p5), %s2957_s3, %s1942_s11 }
  0x2f   : > { %v495_v8 = vld [vmem:[%s478_s21] sm:$0xf]  ;;  %v497_v9 = vld [vmem:[%s478_s21 + $0x8] sm:$0xf]  ;;  %v499_v10 = vld [vmem:[%s478_s21 + $0x10] sm:$0xf] }
  0x30   : > { %496 = vst [vmem:[%s474_s12] sm:$0xf] %v495_v8  ;;  %498 = vst [vmem:[%s474_s12 + $0x4] sm:$0xf] %v497_v9  ;;  %v501_v11 = vld [vmem:[%s478_s21 + $0x18] sm:$0xf] }
  0x31   : > { %500 = vst [vmem:[%s474_s12 + $0x8] sm:$0xf] %v499_v10  ;;  %502 = vst [vmem:[%s474_s12 + $0xc] sm:$0xf] %v501_v11 }
  0x32 PF: > { %p1943_p9 = scmp.ge.s32.totalorder %s2361_s19, 1  ;;  %p533_p10 = scmp.lt.s32.totalorder %s2361_s19, 5 }
  0x34   : > { %p534_p11 = pnand %p1943_p9, %p533_p10 }
  0x35   : > { %s540_s24 = sand.u32 (!%p534_p11), 1, %s2337_s13   ;;  %p608_p12 = scmp.lt.s32.totalorder (!%p534_p11), %s2349_s16, 1 }
  0x36   : > { %537 = sbr.rel (%p534_p11) target bundleno = 1175 (0x497), region = 167  ;;  %s2517_s28 = sshll.u32 (!%p534_p11), %s540_s24, 4 }
  0x37   : > { %s549_s11 = scalar_lea.vmem (!%p534_p11), [#allocation3], %s2517_s28  ;;  %s542_s22 = scalar_lea.vmem (!%p534_p11), [#allocation2], %s2517_s28 }
  0x38   : > { %s2901_s26 = scalar_lea.vmem (!%p534_p11), [#allocation5], %s2517_s28  ;;  %p2000_p13 = scmp.ne.s32.totalorder (!%p534_p11), %s2345_s15, 0 }
  0x3b   : > { %v2237_v12 = vld [vmem:[%s2958_s4] sm:$0xff]   ;;  %vm677_vm0 = vcmask 261120   ;;  %v2523_v13 = vld [vmem:[%s2961_s7 + $0x10] sm:$0xff]  ;;  %v2235_v14 = vld [vmem:[%s549_s11 + $0x8] sm:$0xff]   ;;  %v2363_v15 = vmov 0   ;;  %s609_s12 = scalar_select %p608_p12, %s2349_s16, 1 }
  0x3c   : > { %2083 = vmatprep.mubr.msk.bf16.mxu0 %vm677_vm0, %v2237_v12  ;;  %2217 = vset.pattern.permute.xlu0 %v2363_v15  ;;  %v2236_v16 = vld [vmem:[%s549_s11] sm:$0xff]   ;;  %v2531_v17 = vld [vmem:[%s2961_s7 + $0x18] sm:$0xff]  ;;  %v2543_v19 = vld [vmem:[%s2961_s7 + $0x8] sm:$0xff]  ;;  %v2364_v23 = vmov 1  }
  0x3d   : > { %2218 = vset.pattern.permute.xlu1 %v2363_v15  ;;  %647 = vperm.xlu0 %2217, %v2523_v13   ;;  %v2536_v18 = vld [vmem:[%s2961_s7] sm:$0xff]  ;;  %s2006_s27 = sshll.u32 %s609_s12, 5  ;;  %v2238_v20 = vld [vmem:[%s2958_s4 + $0x8] sm:$0xff]   ;;  %v1189_v26 = vld [vmem:[%s2962_s8 + $0x70] sm:$0xff] }
  0x3e   : > { %2079 = vmatprep.subr.bf16.mxu0 %v2235_v14  ;;  %637 = vperm.xlu1 %2218, %v2536_v18   ;;  %s612_s11 = scalar_lea.vmem %s2955_s1, %s2006_s27  ;;  %s2552_s23 = scalar_lea.vmem %s2964_s10, %s2006_s27  ;;  %v1187_v27 = vld [vmem:[%s2962_s8 + $0x60] sm:$0xff]  ;;  %v1185_v28 = vld [vmem:[%s2962_s8 + $0x50] sm:$0xff]  ;;  %v2617_v39 = vld [vmem:[%s542_s22 + $0x8] sm:$0xff]  }
  0x3f   : > { %2080 = vmatpush3.bf16.msra.mxu0 %v2235_v14  ;;  %v2557_v21 = vld [vmem:[%s612_s11 + $0x10] sm:$0xff]  ;;  %v2560_v22 = vld [vmem:[%s612_s11 + $0x18] sm:$0xff]  ;;  %v2566_v24 = vld [vmem:[%s612_s11 + $0x8] sm:$0xff]  ;;  %v2027_v41 = vunpack.c.h.bf16 %v2617_v39  ;;  %v2026_v44 = vunpack.c.l.bf16 %v2617_v39 }
  0x40   : > { %2081 = vmatprep.subr.bf16.mxu0 %v2236_v16  ;;  %v2571_v25 = vld [vmem:[%s612_s11] sm:$0xff]  ;;  %v1181_v30 = vld [vmem:[%s2962_s8 + $0x30] sm:$0xff]  ;;  %v1190_v60 = vld [vmem:[%s2962_s8 + $0x78] sm:$0xff]  ;;  %s556_s11 = scalar_lea.vmem [#allocation4], %s2517_s28 }
  0x41   : > { %652 = vperm.xlu0 %2217, %v2531_v17   ;;  %v1183_v29 = vld [vmem:[%s2962_s8 + $0x40] sm:$0xff]  ;;  %v1177_v32 = vld [vmem:[%s2962_s8 + $0x10] sm:$0xff]  ;;  %v1188_v63 = vld [vmem:[%s2962_s8 + $0x68] sm:$0xff] }
  0x42   : > { %642 = vperm.xlu1 %2218, %v2543_v19   ;;  %v1179_v31 = vld [vmem:[%s2962_s8 + $0x20] sm:$0xff]  ;;  %v1186_v2 = vld [vmem:[%s2962_s8 + $0x58] sm:$0xff]  ;;  %v2240_v3 = vld [vmem:[%s2959_s5 + $0x8] sm:$0xff]  }
  0x43   : > { %2082 = vmatpush3.bf16.msra.mxu0 %v2236_v16  ;;  %v1175_v33 = vld [vmem:[%s2962_s8] sm:$0xff]  ;;  %v2243_v4 = vld [vmem:[%s2959_s5 + $0x10] sm:$0xff]   ;;  %v1184_v5 = vld [vmem:[%s2962_s8 + $0x48] sm:$0xff] }
  0x44   : > { %v2239_v34 = vld [vmem:[%s2959_s5] sm:$0xff]   ;;  %v1182_v6 = vld [vmem:[%s2962_s8 + $0x38] sm:$0xff]  ;;  %v1180_v9 = vld [vmem:[%s2962_s8 + $0x28] sm:$0xff] }
  0x45   : > { %2219 = vset.pattern.permute.xlu0 %v2364_v23  ;;  %v2241_v36 = vld [vmem:[%s2959_s5 + $0x40] sm:$0xff]   ;;  %v2244_v7 = vld [vmem:[%s2959_s5 + $0x18] sm:$0xff]   ;;  %v2248_v11 = vld [vmem:[%s2959_s5 + $0x28] sm:$0xff]  }
  0x46   : > { %2084 = vmatmul.mubr.msk.bf16.vlgmr.msra.gmra.mxu0 %vm677_vm0, %v2238_v20  ;;  %808 = vperm.xlu0 %2219, %v2557_v21   ;;  %v2627_v51 = vld [vmem:[%s542_s22] sm:$0xff]   ;;  %v1178_v10 = vld [vmem:[%s2962_s8 + $0x18] sm:$0xff]  ;;  %v1176_v14 = vld [vmem:[%s2962_s8 + $0x8] sm:$0xff] }
  0x47   : > { %792 = vperm.xlu1 %2218, %v2560_v22   ;;  %2111 = vmatprep.mubr.msk.bf16.mxu0 %vm677_vm0, %v2239_v34  ;;  %v2022_v54 = vunpack.c.l.bf16 %v2627_v51  ;;  %v2023_v55 = vunpack.c.h.bf16 %v2627_v51  ;;  %v2247_v8 = vld [vmem:[%s2959_s5 + $0x20] sm:$0xff]   ;;  %v2251_v12 = vld [vmem:[%s2959_s5 + $0x30] sm:$0xff]   ;;  %v2258_v51 = vld [vmem:[%s2958_s4 + $0x18] sm:$0xff]  }
  0x48   : > { %2091 = vmatprep.mubr.msk.bf16.mxu1 %vm677_vm0, %v2241_v36 }
  0x4a   : > { %2220 = vset.pattern.permute.xlu0 %v2363_v15 }
  0x4b   : > { %787 = vperm.xlu0 %2220, %v2557_v21   ;;  %2221 = vset.pattern.permute.xlu1 %v2364_v23 }
  0x4c   : > { %812 = vperm.xlu1 %2221, %v2560_v22  }
  0x4f   : > { %782 = vperm.xlu0 %2220, %v2566_v24  }
  0x50   : > { %2222 = vset.pattern.permute.xlu1 %v2363_v15 }
  0x51   : > { %777 = vperm.xlu1 %2222, %v2571_v25  }
  0x53   : > { %1263 = vperm.xlu0 %2220, %v1189_v26  }
  0x55   : > { %2223 = vset.pattern.permute.xlu1 %v2364_v23 }
  0x56   : > { %800 = vperm.xlu1 %2223, %v2571_v25  }
  0x57   : > { %1253 = vperm.xlu0 %2220, %v1187_v27  }
  0x5a   : > { %804 = vperm.xlu1 %2223, %v2566_v24  }
  0x5b   : > { %1243 = vperm.xlu0 %2220, %v1185_v28  }
  0x5e   : > { %2224 = vset.pattern.permute.xlu1 %v2363_v15  ;;  %v2252_v15 = vld [vmem:[%s2959_s5 + $0x38] sm:$0xff]  }
  0x5f   : > { %1233 = vperm.xlu0 %2220, %v1183_v29   ;;  %1268 = vperm.xlu1 %2224, %v1190_v60  }
  0x63   : > { %1223 = vperm.xlu0 %2220, %v1181_v30   ;;  %1258 = vperm.xlu1 %2224, %v1188_v63  }
  0x67   : > { %1213 = vperm.xlu0 %2220, %v1179_v31   ;;  %1248 = vperm.xlu1 %2224, %v1186_v2  }
  0x6b   : > { %1203 = vperm.xlu0 %2220, %v1177_v32   ;;  %1238 = vperm.xlu1 %2224, %v1184_v5  }
  0x6f   : > { %1193 = vperm.xlu0 %2220, %v1175_v33   ;;  %1228 = vperm.xlu1 %2224, %v1182_v6   ;;  %v2242_v6 = vld [vmem:[%s2959_s5 + $0x48] sm:$0xff]  }
  0x73   : > { %1218 = vperm.xlu1 %2224, %v1180_v9   ;;  %v2249_v9 = vld [vmem:[%s2959_s5 + $0x60] sm:$0xff]  }
  0x77   : > { %1208 = vperm.xlu1 %2224, %v1178_v10   ;;  %v2250_v10 = vld [vmem:[%s2959_s5 + $0x68] sm:$0xff]  }
  0x7b   : > { %1198 = vperm.xlu1 %2224, %v1176_v14   ;;  %v2255_v14 = vld [vmem:[%s2960_s6] sm:$0xff]  }
  0xb8   : > { %v2606_v35 = vpop.permute.xlu0 %647 }
  0xb9   : > { %v2611_v37 = vpop.permute.xlu1 %637 }
  0xbc   : > { %v2614_v38 = vpop.permute.xlu0 %652 }
  0xbd   : > { %v2619_v40 = vpop.permute.xlu1 %642 }
  0xc1   : > { %v809_v42 = vpop.permute.xlu0 %808 }
  0xc2   : > { %v793_v43 = vpop.permute.xlu1 %792 }
  0xc3   : > { %v798_v45 = vmul.f32 %v2027_v41, %v793_v43 }
  0xc6   : > { %v788_v46 = vpop.permute.xlu0 %787 }
  0xc7   : > { %v797_v47 = vmul.f32 %v2026_v44, %v788_v46  ;;  %v813_v48 = vpop.permute.xlu1 %812 }
  0xc8   : > { %v818_v49 = vadd.f32 %v813_v48, %v798_v45 }
  0xc9   : > { %v817_v50 = vadd.f32 %v809_v42, %v797_v47 }
  0xca   : > { %v783_v57 = vpop.permute.xlu0 %782 }
  0xcb   : > { %v820_v52 = vpack.c.bf16 %v818_v49, %v817_v50  ;;  %v796_v59 = vmul.f32 %v2023_v55, %v783_v57 }
  0xcc   : > { %v778_v53 = vpop.permute.xlu1 %777 }
  0xcd   : > { %2107 = vmatprep.subr.bf16.mxu0 %v820_v52  ;;  %v795_v56 = vmul.f32 %v2022_v54, %v778_v53  ;;  %v2013_v53 = vld [vmem:[%s556_s11] sm:$0xff]  }
  0xce   : > { %2108 = vmatpush3.bf16.msra.mxu0 %v820_v52  ;;  %v2014_v60 = vunpack.c.l.bf16 %v2013_v53 }
  0xd1   : > { %v801_v58 = vpop.permute.xlu1 %800 }
  0xd2   : > { %v815_v61 = vadd.f32 %v801_v58, %v795_v56 }
  0xd5   : > { %v805_v62 = vpop.permute.xlu1 %804 }
  0xd6   : > { %v816_v0 = vadd.f32 %v805_v62, %v796_v59 }
  0xd8   : > { %v819_v1 = vpack.c.bf16 %v816_v0, %v815_v61  ;;  %v2015_v61 = vunpack.c.h.bf16 %v2013_v53 }
  0xda   : > { %2109 = vmatprep.subr.bf16.mxu0 %v819_v1 }
  0xdb   : > { %2110 = vmatpush3.bf16.msra.mxu0 %v819_v1 }
  0xde   : > { %2112 = vmatmul.mubr.msk.bf16.vlgmr.msra.gmra.mxu0 %vm677_vm0, %v2240_v3 }
  0xdf   : > { %2115 = vmatprep.mubr.msk.bf16.mxu0 %vm677_vm0, %v2243_v4 }
  0xe6   : > { %2116 = vmatmul.mubr.msk.bf16.gmra.mxu0 %vm677_vm0, %v2244_v7  ;;  %v2245_v7 = vld [vmem:[%s2959_s5 + $0x50] sm:$0xff]  }
  0xe7   : > { %2119 = vmatprep.mubr.msk.bf16.mxu0 %vm677_vm0, %v2247_v8  ;;  %v2246_v8 = vld [vmem:[%s2959_s5 + $0x58] sm:$0xff]  }
  0xee   : > { %2120 = vmatmul.mubr.msk.bf16.gmra.mxu0 %vm677_vm0, %v2248_v11  ;;  %v2253_v11 = vld [vmem:[%s2959_s5 + $0x70] sm:$0xff]  }
  0xef   : > { %2123 = vmatprep.mubr.msk.bf16.mxu0 %vm677_vm0, %v2251_v12  ;;  %v2254_v12 = vld [vmem:[%s2959_s5 + $0x78] sm:$0xff]  }
  0xf6   : > { %2124 = vmatmul.mubr.msk.bf16.gmra.mxu0 %vm677_vm0, %v2252_v15  ;;  %v2365_v15 = vmov 2  }
  0xf7   : > { %2226 = vset.pattern.permute.xlu1 %v2365_v15  ;;  %2225 = vset.pattern.permute.xlu0 %v2365_v15 }
  0xf8   : > { %1456 = vperm.xlu1 %2226, %v2531_v17   ;;  %1452 = vperm.xlu0 %2225, %v2523_v13   ;;  %v2732_v13 = vpop.permute.xlu0 %1263 }
  0xfc   : > { %1444 = vperm.xlu1 %2226, %v2536_v18   ;;  %1448 = vperm.xlu0 %2225, %v2543_v19   ;;  %v2735_v18 = vpop.permute.xlu1 %1268  ;;  %v2739_v19 = vpop.permute.xlu0 %1253 }
 0x106   : > { %v2085_v16 = vpop.f32.mrf.mxu0 }
 0x107   : > { %v727_v20 = vadd.f32 %v2085_v16, %v2606_v35 }
 0x108   : > { %v718_v26 = vpop.f32.mrf.mxu0 }
 0x109   : > { %v735_v27 = vsub.f32 0.0, %v727_v20  ;;  %v719_v28 = vadd.f32 %v718_v26, %v2611_v37  ;;  %v2366_v26 = vmov 4  }
 0x10a   : > { %v2086_v29 = vpop.f32.mrf.mxu0  ;;  %2227 = vset.pattern.permute.xlu1 %v2366_v26  ;;  %2228 = vset.pattern.permute.xlu0 %v2366_v26 }
 0x10b   : > { %v741_v30 = vmul.f32 1.442695, %v735_v27  ;;  %v733_v31 = vsub.f32 0.0, %v719_v28  ;;  %v730_v32 = vadd.f32 %v2086_v29, %v2614_v38  ;;  %1553 = vperm.xlu1 %2227, %v2557_v21   ;;  %1557 = vperm.xlu0 %2228, %v2560_v22   ;;  %v2367_v29 = vmov 5  }
 0x10c   : > { %v721_v33 = vpop.f32.mrf.mxu0 }
 0x10d   : > { %2259 = vpow2.f32 %v741_v30  ;;  %v737_v34 = vmul.f32 1.442695, %v733_v31  ;;  %v736_v36 = vsub.f32 0.0, %v730_v32  ;;  %v722_v42 = vadd.f32 %v721_v33, %v2619_v40  ;;  %v2038_v40 = vld [vmem:[%s556_s11 + $0x8] sm:$0xff]   ;;  %v2745_v31 = vpop.permute.xlu1 %1258  ;;  %v1244_v32 = vpop.permute.xlu0 %1243 }
 0x10e   : > { %v2018_v56 = vunpack.c.l.bf16 %v2038_v40  ;;  %v2019_v57 = vunpack.c.h.bf16 %v2038_v40 }
 0x10f   : > { %2261 = vpow2.f32 %v737_v34  ;;  %v743_v43 = vmul.f32 1.442695, %v736_v36  ;;  %v734_v45 = vsub.f32 0.0, %v722_v42  ;;  %2229 = vset.pattern.permute.xlu1 %v2367_v29  ;;  %1545 = vperm.xlu0 %2228, %v2571_v25  }
 0x110   : > { %1573 = vperm.xlu1 %2229, %v2557_v21  }
 0x111   : > { %2263 = vpow2.f32 %v743_v43  ;;  %v739_v35 = vmul.f32 1.442695, %v734_v45 }
 0x113   : > { %2265 = vpow2.f32 %v739_v35  ;;  %2231 = vset.pattern.permute.xlu0 %v2367_v29 }
 0x114   : > { %1577 = vperm.xlu1 %2229, %v2560_v22   ;;  %1565 = vperm.xlu0 %2231, %v2571_v25   ;;  %v1249_v22 = vpop.permute.xlu1 %1248  ;;  %v1234_v25 = vpop.permute.xlu0 %1233 }
 0x118   : > { %2230 = vset.pattern.permute.xlu1 %v2366_v26  ;;  %2234 = vset.pattern.permute.xlu0 %v2364_v23  ;;  %v1239_v45 = vpop.permute.xlu1 %1238 }
 0x119   : > { %1549 = vperm.xlu1 %2230, %v2566_v24  }
 0x11a   : > { %v2260_v46 = vpop.eup %2259 }
 0x11b   : > { %v747_v37 = vadd.f32 1.0, %v2260_v46 }
 0x11c   : > { %v2262_v47 = vpop.eup %2261 }
 0x11d   : > { %v745_v48 = vadd.f32 1.0, %v2262_v47  ;;  %2267 = vrcp.f32 %v747_v37  ;;  %2232 = vset.pattern.permute.xlu1 %v2367_v29  ;;  %v1224_v37 = vpop.permute.xlu0 %1223 }
 0x11e   : > { %v2264_v49 = vpop.eup %2263  ;;  %1569 = vperm.xlu1 %2232, %v2566_v24  }
 0x11f   : > { %v748_v38 = vadd.f32 1.0, %v2264_v49  ;;  %2269 = vrcp.f32 %v745_v48 }
 0x120   : > { %v2266_v50 = vpop.eup %2265 }
 0x121   : > { %2271 = vrcp.f32 %v748_v38  ;;  %v746_v52 = vadd.f32 1.0, %v2266_v50  ;;  %v1229_v38 = vpop.permute.xlu1 %1228 }
 0x122   : > { %2233 = vset.pattern.permute.xlu1 %v2364_v23 }
 0x123   : > { %2273 = vrcp.f32 %v746_v52  ;;  %v2749_v52 = vpop.permute.xlu0 %1213 }
 0x12a   : > { %v2268_v58 = vpop.eup %2267 }
 0x12b   : > { %v763_v63 = vmul.f32 %v2268_v58, %v2018_v56 }
 0x12c   : > { %v2270_v59 = vpop.eup %2269 }
 0x12d   : > { %v761_v3 = vmul.f32 %v2270_v59, %v2014_v60  ;;  %v1204_v60 = vpop.permute.xlu0 %1203 }
 0x12e   : > { %v2272_v62 = vpop.eup %2271 }
 0x12f   : > { %v764_v0 = vmul.f32 %v2272_v62, %v2019_v57  ;;  %v1219_v57 = vpop.permute.xlu1 %1218 }
 0x130   : > { %v2274_v1 = vpop.eup %2273 }
 0x131   : > { %v766_v2 = vpack.c.bf16 %v764_v0, %v763_v63  ;;  %v762_v4 = vmul.f32 %v2274_v1, %v2015_v61 }
 0x133   : > { %2087 = vmatprep.subr.bf16.mxu1 %v766_v2  ;;  %v765_v5 = vpack.c.bf16 %v762_v4, %v761_v3 }
 0x134   : > { %2088 = vmatpush3.bf16.msra.mxu1 %v766_v2 }
 0x135   : > { %2089 = vmatprep.subr.bf16.mxu1 %v765_v5 }
 0x138   : > { %2090 = vmatpush3.bf16.msra.mxu1 %v765_v5 }
 0x13b   : > { %2092 = vmatmul.mubr.msk.bf16.vlgmr.msra.gmra.mxu1 %vm677_vm0, %v2242_v6 }
 0x13c   : > { %2095 = vmatprep.mubr.msk.bf16.mxu1 %vm677_vm0, %v2245_v7  ;;  %v1209_v7 = vpop.permute.xlu1 %1208 }
 0x143   : > { %2096 = vmatmul.mubr.msk.bf16.gmra.mxu1 %vm677_vm0, %v2246_v8 }
 0x144   : > { %2099 = vmatprep.mubr.msk.bf16.mxu1 %vm677_vm0, %v2249_v9 }
 0x14b   : > { %2100 = vmatmul.mubr.msk.bf16.gmra.mxu1 %vm677_vm0, %v2250_v10 }
 0x14c   : > { %2103 = vmatprep.mubr.msk.bf16.mxu1 %vm677_vm0, %v2253_v11 }
 0x153   : > { %2104 = vmatmul.mubr.msk.bf16.gmra.mxu1 %vm677_vm0, %v2254_v12 }
 0x154   : > { %2143 = vmatprep.mubr.bf16.mxu1 %v2255_v14 }
 0x19e   : > { %v2113_v16 = vpop.f32.mrf.mxu0 }
 0x1a0   : > { %v1112_v20 = vpop.f32.mrf.mxu0 }
 0x1a2   : > { %v2114_v27 = vpop.f32.mrf.mxu0 }
 0x1a4   : > { %v2729_v28 = vpop.f32.mrf.mxu0 }
 0x1a6   : > { %v2117_v17 = vpop.f32.mrf.mxu0 }
 0x1a8   : > { %v2741_v30 = vpop.f32.mrf.mxu0 }
 0x1aa   : > { %v2118_v21 = vpop.f32.mrf.mxu0 }
 0x1ac   : > { %v1131_v33 = vpop.f32.mrf.mxu0 }
 0x1ae   : > { %v2121_v42 = vpop.f32.mrf.mxu0 }
 0x1b0   : > { %v1144_v46 = vpop.f32.mrf.mxu0 }
 0x1b2   : > { %v2122_v49 = vpop.f32.mrf.mxu0 }
 0x1b4   : > { %v1147_v40 = vpop.f32.mrf.mxu0 }
 0x1b6   : > { %v2125_v59 = vpop.f32.mrf.mxu0 }
 0x1b8   : > { %v1160_v5 = vpop.f32.mrf.mxu0 }
 0x1fb   : > { %v2093_v34 = vpop.f32.mrf.mxu1 }
 0x1fc   : > { %v1121_v53 = vadd.f32 %v2113_v16, %v2093_v34  ;;  %v1194_v16 = vpop.permute.xlu0 %1193 }
 0x1fd   : > { %v951_v36 = vpop.f32.mrf.mxu1 }
 0x1fe   : > { %v2751_v61 = vadd.f32 %v1204_v60, %v1121_v53  ;;  %v1113_v3 = vadd.f32 %v1112_v20, %v951_v36  ;;  %v2126_v36 = vpop.f32.mrf.mxu0 }
 0x1ff   : > { %v2094_v43 = vpop.f32.mrf.mxu1 }
 0x200   : > { %v1124_v62 = vadd.f32 %v2114_v27, %v2094_v43  ;;  %v2758_v10 = vmul.f32 0.044715, %v2751_v61 }
 0x201   : > { %v954_v35 = vpop.f32.mrf.mxu1 }
 0x202   : > { %v2760_v11 = vadd.f32 %v1209_v7, %v1124_v62 }
 0x203   : > { %v2097_v47 = vpop.f32.mrf.mxu1 }
 0x204   : > { %v1137_v12 = vadd.f32 %v2117_v17, %v2097_v47 }
 0x205   : > { %v967_v48 = vpop.f32.mrf.mxu1 }
 0x206   : > { %v2779_v47 = vadd.f32 %v1224_v37, %v1137_v12 }
 0x207   : > { %v2098_v50 = vpop.f32.mrf.mxu1 }
 0x208   : > { %v1140_v4 = vadd.f32 %v2118_v21, %v2098_v50  ;;  %v2768_v21 = vadd.f32 %v1194_v16, %v1113_v3  ;;  %v1309_v62 = vmul.f32 0.044715, %v2779_v47 }
 0x209   : > { %v970_v24 = vpop.f32.mrf.mxu1 }
 0x20a   : > { %v1132_v34 = vadd.f32 %v1131_v33, %v970_v24  ;;  %v1199_v33 = vpop.permute.xlu1 %1198 }
 0x20b   : > { %v2101_v56 = vpop.f32.mrf.mxu1 }
 0x20c   : > { %v1153_v23 = vadd.f32 %v2121_v42, %v2101_v56  ;;  %v2789_v53 = vadd.f32 %v1219_v57, %v1132_v34  ;;  %v1163_v56 = vpop.f32.mrf.mxu0 }
 0x20d   : > { %v983_v58 = vpop.f32.mrf.mxu1 }
 0x20e   : > { %v2753_v63 = vadd.f32 %v1244_v32, %v1153_v23  ;;  %v1145_v1 = vadd.f32 %v1144_v46, %v983_v58  ;;  %v1116_v32 = vadd.f32 %v2729_v28, %v954_v35 }
 0x20f   : > { %v2102_v0 = vpop.f32.mrf.mxu1 }
 0x210   : > { %v1156_v2 = vadd.f32 %v2122_v49, %v2102_v0  ;;  %v1313_v14 = vmul.f32 0.044715, %v2753_v63  ;;  %v2763_v26 = vadd.f32 %v1234_v25, %v1145_v1  ;;  %v1129_v49 = vadd.f32 %v2741_v30, %v967_v48 }
 0x211   : > { %v986_v6 = vpop.f32.mrf.mxu1  ;;  %v2798_v60 = vadd.f32 %v1199_v33, %v1116_v32 }
 0x212   : > { %v2755_v8 = vadd.f32 %v1249_v22, %v1156_v2  ;;  %v1148_v9 = vadd.f32 %v1147_v40, %v986_v6  ;;  %v2771_v22 = vadd.f32 %v1229_v38, %v1140_v4  ;;  %v1329_v28 = vmul.f32 %v1313_v14, %v2753_v63 }
 0x213   : > { %v2105_v15 = vpop.f32.mrf.mxu1  ;;  %v1311_v38 = vmul.f32 0.044715, %v2763_v26  ;;  %v2802_v57 = vadd.f32 %v2749_v52, %v1129_v49 }
 0x214   : > { %v1314_v20 = vmul.f32 0.044715, %v2755_v8  ;;  %v2766_v27 = vadd.f32 %v1239_v45, %v1148_v9  ;;  %v1169_v29 = vadd.f32 %v2125_v59, %v2105_v15  ;;  %v1306_v45 = vmul.f32 0.044715, %v2760_v11 }
 0x215   : > { %v999_v17 = vpop.f32.mrf.mxu1  ;;  %v1310_v40 = vmul.f32 0.044715, %v2771_v22  ;;  %v1345_v0 = vmul.f32 %v1329_v28, %v2753_v63  ;;  %v1327_v1 = vmul.f32 %v1311_v38, %v2763_v26  ;;  %v1325_v15 = vmul.f32 %v1309_v62, %v2779_v47 }
 0x216   : > { %v1330_v42 = vmul.f32 %v1314_v20, %v2755_v8  ;;  %v1312_v43 = vmul.f32 0.044715, %v2766_v27  ;;  %v2776_v25 = vadd.f32 %v2732_v13, %v1169_v29  ;;  %v1161_v46 = vadd.f32 %v1160_v5, %v999_v17 }
 0x217   : > { %v2106_v35 = vpop.f32.mrf.mxu1  ;;  %v1308_v5 = vmul.f32 0.044715, %v2789_v53  ;;  %v1361_v20 = vadd.f32 %v1345_v0, %v2753_v63  ;;  %v1321_v0 = vmul.f32 %v2758_v10, %v2751_v61 }
 0x218   : > { %v1317_v50 = vmul.f32 0.044715, %v2776_v25  ;;  %v2786_v24 = vadd.f32 %v2739_v19, %v1161_v46  ;;  %v1172_v13 = vadd.f32 %v2126_v36, %v2106_v35  ;;  %v1328_v37 = vmul.f32 %v1312_v43, %v2766_v27 }
 0x219   : > { %v1002_v30 = vpop.f32.mrf.mxu1  ;;  %v1346_v48 = vmul.f32 %v1330_v42, %v2755_v8  ;;  %v1343_v36 = vmul.f32 %v1327_v1, %v2763_v26  ;;  %v1324_v17 = vmul.f32 %v1308_v5, %v2789_v53  ;;  %v1303_v1 = vmul.f32 0.044715, %v2768_v21 }
 0x21a   : > { %v1333_v23 = vmul.f32 %v1317_v50, %v2776_v25  ;;  %v1315_v58 = vmul.f32 0.044715, %v2786_v24  ;;  %v2796_v59 = vadd.f32 %v2735_v18, %v1172_v13  ;;  %v1164_v19 = vadd.f32 %v1163_v56, %v1002_v30 }
 0x21b   : > { %v1326_v18 = vmul.f32 %v1310_v40, %v2771_v22  ;;  %v1362_v52 = vadd.f32 %v1346_v48, %v2755_v8  ;;  %v1344_v14 = vmul.f32 %v1328_v37, %v2766_v27  ;;  %v1377_v50 = vmul.f32 0.7978846, %v1361_v20 }
 0x21c   : > { %v1331_v2 = vmul.f32 %v1315_v58, %v2786_v24  ;;  %v1318_v3 = vmul.f32 0.044715, %v2796_v59  ;;  %v2809_v4 = vadd.f32 %v2745_v31, %v1164_v19  ;;  %v1349_v6 = vmul.f32 %v1333_v23, %v2776_v25 }
 0x21d   : > { %v1307_v31 = vmul.f32 0.044715, %v2802_v57  ;;  %v1378_v43 = vmul.f32 0.7978846, %v1362_v52  ;;  %v1342_v46 = vmul.f32 %v1326_v18, %v2771_v22  ;;  %v1360_v33 = vadd.f32 %v1344_v14, %v2766_v27 }
 0x21e   : > { %v1334_v7 = vmul.f32 %v1318_v3, %v2796_v59  ;;  %v1316_v9 = vmul.f32 0.044715, %v2809_v4  ;;  %v1347_v12 = vmul.f32 %v1331_v2, %v2786_v24  ;;  %v1365_v16 = vadd.f32 %v1349_v6, %v2776_v25 }
 0x21f   : > { %v1323_v38 = vmul.f32 %v1307_v31, %v2802_v57  ;;  %v1341_v13 = vmul.f32 %v1325_v15, %v2779_v47  ;;  %v1359_v56 = vadd.f32 %v1343_v36, %v2763_v26  ;;  %v1322_v30 = vmul.f32 %v1306_v45, %v2760_v11 }
 0x220   : > { %v1332_v29 = vmul.f32 %v1316_v9, %v2809_v4  ;;  %v1350_v32 = vmul.f32 %v1334_v7, %v2796_v59  ;;  %v1363_v34 = vadd.f32 %v1347_v12, %v2786_v24  ;;  %v1381_v42 = vmul.f32 0.7978846, %v1365_v16 }
 0x221   : > { %v1304_v48 = vmul.f32 0.044715, %v2798_v60  ;;  %v1358_v23 = vadd.f32 %v1342_v46, %v2771_v22  ;;  %v1376_v19 = vmul.f32 0.7978846, %v1360_v33  ;;  %v1340_v62 = vmul.f32 %v1324_v17, %v2789_v53 }
 0x222   : > { %v1366_v49 = vadd.f32 %v1350_v32, %v2796_v59  ;;  %v1348_v28 = vmul.f32 %v1332_v29, %v2809_v4  ;;  %v1379_v35 = vmul.f32 0.7978846, %v1363_v34  ;;  %2275 = vtanh.f32 %v1381_v42 }
 0x223   : > { %v1375_v2 = vmul.f32 0.7978846, %v1359_v56  ;;  %v1357_v45 = vadd.f32 %v1341_v13, %v2779_v47  ;;  %v1339_v3 = vmul.f32 %v1323_v38, %v2802_v57  ;;  %v1320_v18 = vmul.f32 %v1304_v48, %v2798_v60 }
 0x224   : > { %v1382_v40 = vmul.f32 0.7978846, %v1366_v49  ;;  %v1364_v37 = vadd.f32 %v1348_v28, %v2809_v4  ;;  %2277 = vtanh.f32 %v1379_v35  ;;  %v1338_v5 = vmul.f32 %v1322_v30, %v2760_v11 }
 0x225   : > { %2279 = vtanh.f32 %v1378_v43  ;;  %v1374_v6 = vmul.f32 0.7978846, %v1358_v23  ;;  %v1356_v52 = vadd.f32 %v1340_v62, %v2789_v53  ;;  %v1319_v7 = vmul.f32 %v1303_v1, %v2768_v21 }
 0x226   : > { %2281 = vtanh.f32 %v1382_v40  ;;  %v1380_v58 = vmul.f32 0.7978846, %v1364_v37  ;;  %v1337_v10 = vmul.f32 %v1321_v0, %v2751_v61  ;;  %v1373_v9 = vmul.f32 0.7978846, %v1357_v45 }
 0x227   : > { %2283 = vtanh.f32 %v1377_v50  ;;  %v1355_v12 = vadd.f32 %v1339_v3, %v2802_v57  ;;  %v1336_v14 = vmul.f32 %v1320_v18, %v2798_v60  ;;  %v1354_v15 = vadd.f32 %v1338_v5, %v2760_v11 }
 0x228   : > { %2285 = vtanh.f32 %v1380_v58  ;;  %v1372_v31 = vmul.f32 0.7978846, %v1356_v52  ;;  %v1353_v16 = vadd.f32 %v1337_v10, %v2751_v61  ;;  %v1335_v20 = vmul.f32 %v1319_v7, %v2768_v21 }
 0x229   : > { %2287 = vtanh.f32 %v1376_v19  ;;  %v1371_v32 = vmul.f32 0.7978846, %v1355_v12  ;;  %v1370_v36 = vmul.f32 0.7978846, %v1354_v15  ;;  %v1352_v17 = vadd.f32 %v1336_v14, %v2798_v60 }
 0x22a   : > { %2289 = vtanh.f32 %v1375_v2  ;;  %v1301_v49 = vmul.f32 0.5, %v2776_v25  ;;  %v1369_v28 = vmul.f32 0.7978846, %v1353_v16  ;;  %v1351_v35 = vadd.f32 %v1335_v20, %v2768_v21 }
 0x22b   : > { %2291 = vtanh.f32 %v1374_v6  ;;  %v1302_v38 = vmul.f32 0.5, %v2796_v59  ;;  %v1299_v37 = vmul.f32 0.5, %v2786_v24  ;;  %v1300_v56 = vmul.f32 0.5, %v2809_v4 }
 0x22c   : > { %2293 = vtanh.f32 %v1373_v9  ;;  %v1368_v30 = vmul.f32 0.7978846, %v1352_v17  ;;  %v1298_v62 = vmul.f32 0.5, %v2755_v8  ;;  %v1367_v0 = vmul.f32 0.7978846, %v1351_v35 }
 0x22d   : > { %2295 = vtanh.f32 %v1372_v31  ;;  %v1297_v24 = vmul.f32 0.5, %v2753_v63  ;;  %v1296_v8 = vmul.f32 0.5, %v2766_v27  ;;  %v1295_v12 = vmul.f32 0.5, %v2763_v26 }
 0x22e   : > { %2297 = vtanh.f32 %v1371_v32  ;;  %v1294_v16 = vmul.f32 0.5, %v2771_v22  ;;  %v1293_v27 = vmul.f32 0.5, %v2779_v47  ;;  %v1290_v47 = vmul.f32 0.5, %v2760_v11 }
 0x22f   : > { %v2276_v29 = vpop.eup %2275  ;;  %2299 = vtanh.f32 %v1370_v36 }
 0x230   : > { %v1413_v43 = vadd.f32 1.0, %v2276_v29  ;;  %2301 = vtanh.f32 %v1369_v28  ;;  %v1291_v28 = vmul.f32 0.5, %v2802_v57  ;;  %v1288_v57 = vmul.f32 0.5, %v2798_v60  ;;  %v2257_v60 = vld [vmem:[%s2958_s4 + $0x10] sm:$0xff]  }
 0x231   : > { %v2278_v34 = vpop.eup %2277  ;;  %2303 = vtanh.f32 %v1368_v30  ;;  %2151 = vmatprep.mubr.msk.bf16.mxu0 %vm677_vm0, %v2257_v60 }
 0x232   : > { %v2280_v42 = vpop.eup %2279  ;;  %v1411_v13 = vadd.f32 1.0, %v2278_v34  ;;  %v1429_v48 = vmul.f32 %v1413_v43, %v1301_v49  ;;  %2305 = vtanh.f32 %v1367_v0  ;;  %v1292_v43 = vmul.f32 0.5, %v2789_v53  ;;  %v1592_v0 = vld [vmem:[%s2961_s7 + $0x10] sm:$0xff] }
 0x233   : > { %v2282_v46 = vpop.eup %2281  ;;  %v1410_v25 = vadd.f32 1.0, %v2280_v42 }
 0x234   : > { %v2284_v33 = vpop.eup %2283  ;;  %v1414_v50 = vadd.f32 1.0, %v2282_v46  ;;  %v1427_v1 = vmul.f32 %v1411_v13, %v1299_v37  ;;  %v1289_v37 = vmul.f32 0.5, %v2751_v61  ;;  %v2256_v61 = vld [vmem:[%s2960_s6 + $0x8] sm:$0xff]  }
 0x235   : > { %v2286_v40 = vpop.eup %2285  ;;  %v1409_v45 = vadd.f32 1.0, %v2284_v33  ;;  %v1426_v18 = vmul.f32 %v1410_v25, %v1298_v62  ;;  %v1591_v62 = vld [vmem:[%s2961_s7 + $0x8] sm:$0xff] }
 0x236   : > { %v1430_v23 = vmul.f32 %v1414_v50, %v1302_v38  ;;  %v1412_v58 = vadd.f32 1.0, %v2286_v40  ;;  %v2288_v19 = vpop.eup %2287  ;;  %1601 = vperm.xlu0 %2234, %v1591_v62  }
 0x237   : > { %v2290_v3 = vpop.eup %2289  ;;  %v1408_v5 = vadd.f32 1.0, %v2288_v19  ;;  %v1425_v52 = vmul.f32 %v1409_v45, %v1297_v24  ;;  %v1453_v45 = vpop.permute.xlu0 %1452 }
 0x238   : > { %v1442_v59 = vpack.c.bf16 %v1430_v23, %v1429_v48  ;;  %v1428_v2 = vmul.f32 %v1412_v58, %v1300_v56  ;;  %v2292_v6 = vpop.eup %2291  ;;  %v1407_v7 = vadd.f32 1.0, %v2290_v3  ;;  %v1287_v58 = vmul.f32 0.5, %v2768_v21  ;;  %v1590_v21 = vld [vmem:[%s2961_s7] sm:$0xff] }
 0x239   : > { %v2294_v10 = vpop.eup %2293  ;;  %v1440_v9 = vpack.c.bf16 %v1426_v18, %v1425_v52  ;;  %v1424_v14 = vmul.f32 %v1408_v5, %v1296_v8  ;;  %v1406_v15 = vadd.f32 1.0, %v2292_v6  ;;  %1596 = vperm.xlu1 %2233, %v1590_v21  }
 0x23a   : > { %2127 = vmatprep.subr.bf16.mxu1 %v1442_v59  ;;  %v1441_v4 = vpack.c.bf16 %v1428_v2, %v1427_v1  ;;  %v2296_v63 = vpop.eup %2295  ;;  %v1423_v31 = vmul.f32 %v1407_v7, %v1295_v12  ;;  %v1405_v20 = vadd.f32 1.0, %v2294_v10  ;;  %v1457_v1 = vpop.permute.xlu1 %1456 }
 0x23b   : > { %2128 = vmatpush3.bf16.msra.mxu1 %v1442_v59  ;;  %v2298_v29 = vpop.eup %2297  ;;  %v1422_v36 = vmul.f32 %v1406_v15, %v1294_v16  ;;  %v1404_v17 = vadd.f32 1.0, %v2296_v63  ;;  %v1593_v59 = vld [vmem:[%s2961_s7 + $0x18] sm:$0xff]  ;;  %v1449_v24 = vpop.permute.xlu0 %1448 }
 0x23c   : > { %2129 = vmatprep.subr.bf16.mxu1 %v1441_v4  ;;  %v2300_v32 = vpop.eup %2299  ;;  %v1439_v34 = vpack.c.bf16 %v1424_v14, %v1423_v31  ;;  %v1421_v26 = vmul.f32 %v1405_v20, %v1293_v27  ;;  %v1403_v46 = vadd.f32 1.0, %v2298_v29 }
 0x23d   : > { %v2302_v42 = vpop.eup %2301  ;;  %v1420_v35 = vmul.f32 %v1404_v17, %v1292_v43  ;;  %v1402_v22 = vadd.f32 1.0, %v2300_v32  ;;  %1606 = vperm.xlu1 %2233, %v1592_v0  }
 0x23e   : > { %v1438_v49 = vpack.c.bf16 %v1422_v36, %v1421_v26  ;;  %v2304_v33 = vpop.eup %2303  ;;  %v1419_v38 = vmul.f32 %v1403_v46, %v1291_v28  ;;  %v1401_v50 = vadd.f32 1.0, %v2302_v42  ;;  %v1445_v2 = vpop.permute.xlu1 %1444 }
 0x23f   : > { %2130 = vmatpush3.bf16.msra.mxu1 %v1441_v4  ;;  %v2306_v13 = vpop.eup %2305  ;;  %v1418_v56 = vmul.f32 %v1402_v22, %v1290_v47  ;;  %v1400_v30 = vadd.f32 1.0, %v2304_v33  ;;  %v1558_v18 = vpop.permute.xlu0 %1557 }
 0x240   : > { %2131 = vmatprep.subr.bf16.mxu1 %v1440_v9  ;;  %v1437_v40 = vpack.c.bf16 %v1420_v35, %v1419_v38  ;;  %v1417_v53 = vmul.f32 %v1401_v50, %v1289_v37  ;;  %v1399_v48 = vadd.f32 1.0, %v2306_v13 }
 0x241   : > { %v1416_v25 = vmul.f32 %v1400_v30, %v1288_v57  ;;  %1611 = vperm.xlu1 %2233, %v1593_v59  }
 0x242   : > { %v1436_v23 = vpack.c.bf16 %v1418_v56, %v1417_v53  ;;  %v1415_v11 = vmul.f32 %v1399_v48, %v1287_v58  ;;  %v1554_v3 = vpop.permute.xlu1 %1553 }
 0x243   : > { %2132 = vmatpush3.bf16.msra.mxu1 %v1440_v9  ;;  %v1546_v9 = vpop.permute.xlu0 %1545 }
 0x244   : > { %2133 = vmatprep.subr.bf16.mxu1 %v1439_v34  ;;  %v1435_v19 = vpack.c.bf16 %v1416_v25, %v1415_v11 }
 0x246   : > { %v1574_v4 = vpop.permute.xlu1 %1573 }
 0x247   : > { %2134 = vmatpush3.bf16.msra.mxu1 %v1439_v34  ;;  %v1566_v36 = vpop.permute.xlu0 %1565 }
 0x248   : > { %2135 = vmatprep.subr.bf16.mxu1 %v1438_v49 }
 0x24a   : > { %v1578_v6 = vpop.permute.xlu1 %1577 }
 0x24b   : > { %2136 = vmatpush3.bf16.msra.mxu1 %v1438_v49 }
 0x24c   : > { %2137 = vmatprep.subr.bf16.mxu1 %v1437_v40 }
 0x24e   : > { %v1550_v14 = vpop.permute.xlu1 %1549 }
 0x24f   : > { %2138 = vmatpush3.bf16.msra.mxu1 %v1437_v40 }
 0x250   : > { %2139 = vmatprep.subr.bf16.mxu1 %v1436_v23 }
 0x252   : > { %v1570_v17 = vpop.permute.xlu1 %1569 }
 0x253   : > { %2140 = vmatpush3.bf16.msra.mxu1 %v1436_v23 }
 0x254   : > { %2141 = vmatprep.subr.bf16.mxu1 %v1435_v19 }
 0x257   : > { %2142 = vmatpush3.bf16.msra.mxu1 %v1435_v19 }
 0x25a   : > { %2144 = vmatmul.mubr.bf16.vlgmr.msra.gmra.mxu1 %v2256_v61 }
 0x2b1   : > { %v1602_v47 = vpop.permute.xlu0 %1601 }
 0x31a   : > { %v2145_v5 = vpop.f32.mrf.mxu1 }
 0x31b   : > { %v1514_v52 = vadd.f32 %v2145_v5, %v1453_v45 }
 0x31c   : > { %v1505_v8 = vpop.f32.mrf.mxu1 }
 0x31d   : > { %v1522_v7 = vadd.f32 %v2026_v44, %v1514_v52  ;;  %v1506_v10 = vadd.f32 %v1505_v8, %v1445_v2 }
 0x31e   : > { %v2146_v12 = vpop.f32.mrf.mxu1 }
 0x31f   : > { %v1520_v15 = vadd.f32 %v2022_v54, %v1506_v10  ;;  %v1517_v63 = vadd.f32 %v2146_v12, %v1457_v1  ;;  %v1562_v16 = vmul.f32 %v1554_v3, %v1522_v7 }
 0x320   : > { %v1508_v31 = vpop.f32.mrf.mxu1 }
 0x321   : > { %v1523_v20 = vadd.f32 %v2027_v41, %v1517_v63  ;;  %v1509_v29 = vadd.f32 %v1508_v31, %v1449_v24  ;;  %v1560_v32 = vmul.f32 %v1546_v9, %v1520_v15  ;;  %v1582_v26 = vadd.f32 %v1574_v4, %v1562_v16 }
 0x323   : > { %v2036_v34 = vpack.c.bf16 %v1523_v20, %v1522_v7  ;;  %v1563_v27 = vmul.f32 %v1558_v18, %v1523_v20  ;;  %v1521_v44 = vadd.f32 %v2023_v55, %v1509_v29  ;;  %v1580_v39 = vadd.f32 %v1566_v36, %v1560_v32  ;;  %v1597_v55 = vpop.permute.xlu1 %1596 }
 0x325   : > { %2040 = vst [vmem:[%s2901_s26 + $0x8] sm:$0xff] %v2036_v34   ;;  %v2031_v54 = vpack.c.bf16 %v1521_v44, %v1520_v15  ;;  %v1561_v42 = vmul.f32 %v1550_v14, %v1521_v44  ;;  %v1583_v43 = vadd.f32 %v1578_v6, %v1563_v27 }
 0x327   : > { %2032 = vst [vmem:[%s2901_s26] sm:$0xff] %v2031_v54   ;;  %v1581_v41 = vadd.f32 %v1570_v17, %v1561_v42  ;;  %v1585_v46 = vpack.c.bf16 %v1583_v43, %v1582_v26  ;;  %v1607_v33 = vpop.permute.xlu1 %1606 }
 0x329   : > { %v1584_v49 = vpack.c.bf16 %v1581_v41, %v1580_v39  ;;  %2147 = vmatprep.subr.bf16.mxu0 %v1585_v46 }
 0x32a   : > { %2148 = vmatpush3.bf16.msra.mxu0 %v1585_v46 }
 0x32b   : > { %2149 = vmatprep.subr.bf16.mxu0 %v1584_v49  ;;  %v1612_v37 = vpop.permute.xlu1 %1611 }
 0x32e   : > { %2150 = vmatpush3.bf16.msra.mxu0 %v1584_v49 }
 0x331   : > { %2152 = vmatmul.mubr.msk.bf16.vlgmr.msra.gmra.mxu0 %vm677_vm0, %v2258_v51 }
 0x3f1   : > { %v2153_v28 = vpop.f32.mrf.mxu0 }
 0x3f2   : > { %v1673_v13 = vadd.f32 %v2153_v28, %v1607_v33 }
 0x3f3   : > { %v1664_v35 = vpop.f32.mrf.mxu0 }
 0x3f4   : > { %v1665_v22 = vadd.f32 %v1664_v35, %v1597_v55 }
 0x3f5   : > { %v2154_v38 = vpop.f32.mrf.mxu0 }
 0x3f6   : > { %1679 = vadd.xlane.f32.xlu0 %v1665_v22  ;;  %v1676_v56 = vadd.f32 %v2154_v38, %v1612_v37 }
 0x3f7   : > { %v1667_v50 = vpop.f32.mrf.mxu0 }
 0x3f8   : > { %v1668_v40 = vadd.f32 %v1667_v50, %v1602_v47 }
 0x3fa   : > { %1683 = vadd.xlane.f32.xlu0 %v1673_v13  ;;  %1681 = vadd.xlane.f32.xlu1 %v1668_v40 }
 0x3fe   : > { %1685 = vadd.xlane.f32.xlu0 %v1676_v56 }
 0x47f   : > { %v1680_v30 = vpop.xlane.xlu0 %1679 }
 0x483   : > { %v1684_v53 = vpop.xlane.xlu0 %1683  ;;  %v1682_v57 = vpop.xlane.xlu1 %1681  ;;  %1690 = sbr.rel (%p2000_p13) target bundleno = 1163 (0x48b), region = 183 }
 0x487   : > { %v1686_v48 = vpop.xlane.xlu0 %1685 }
 0x488   : > { %vm1691_vm1 = vcmask 7168   ;;  %v2368_v23 = vmov 0.0  }
 0x489   : > { %1692 = vst.msk [vmem:[%s2552_s23] sm:$0xff] %vm1691_vm1, %v2368_v23  ;;  %1693 = vst.msk [vmem:[%s2552_s23 + $0x8] sm:$0xff] %vm1691_vm1, %v2368_v23 }
 0x48a   : > { %1694 = vst.msk [vmem:[%s2552_s23 + $0x10] sm:$0xff] %vm1691_vm1, %v2368_v23  ;;  %1695 = vst.msk [vmem:[%s2552_s23 + $0x18] sm:$0xff] %vm1691_vm1, %v2368_v23 }
 0x48b PF: > { %vm1704_vm2 = vcmask 7168   ;;  %s2002_s28 = sshll.u32 (%p2476_p6), %s2349_s16, 3  ;;  %v1741_v0 = vld [vmem:[%s2901_s26] sm:$0xf] (%p2476_p6)  ;;  %v1743_v59 = vld [vmem:[%s2901_s26 + $0x4] sm:$0xf] (%p2476_p6) }
 0x48c   : > { %s1722_s20 = sadd.s32 (%p2476_p6), %s2345_s15, %s2002_s28  ;;  %v1745_v1 = vld [vmem:[%s2901_s26 + $0x8] sm:$0xf] (%p2476_p6)  ;;  %v1747_v2 = vld [vmem:[%s2901_s26 + $0xc] sm:$0xf] (%p2476_p6) }
 0x48d   : > { %s2003_s11 = sshll.u32 (%p2476_p6), %s1722_s20, 2 }
 0x490   : > { %v1696_v58 = vld [vmem:[%s2552_s23] sm:$0xff]  ;;  %v1697_v25 = vld [vmem:[%s2552_s23 + $0x8] sm:$0xff]  ;;  %1720 = sbr.rel (!%p2476_p6) target bundleno = 1175 (0x497), region = 187 }
 0x491   : > { %v1698_v11 = vld [vmem:[%s2552_s23 + $0x10] sm:$0xff]  ;;  %v1700_v19 = vadd.f32 %v1696_v58, %v1680_v30  ;;  %v1701_v61 = vadd.f32 %v1697_v25, %v1682_v57  ;;  %v1699_v21 = vld [vmem:[%s2552_s23 + $0x18] sm:$0xff] }
 0x492   : > { %v1702_v60 = vadd.f32 %v1698_v11, %v1684_v53  ;;  %v1703_v62 = vadd.f32 %v1699_v21, %v1686_v48 }
 0x493   : > { %1705 = vst.msk [vmem:[%s2552_s23] sm:$0xff] %vm1704_vm2, %v1700_v19  ;;  %1706 = vst.msk [vmem:[%s2552_s23 + $0x8] sm:$0xff] %vm1704_vm2, %v1701_v61 }
 0x494   : > { %1707 = vst.msk [vmem:[%s2552_s23 + $0x10] sm:$0xff] %vm1704_vm2, %v1702_v60  ;;  %1708 = vst.msk [vmem:[%s2552_s23 + $0x18] sm:$0xff] %vm1704_vm2, %v1703_v62  ;;  %s1724_s23 = scalar_lea.vmem (%p2476_p6), %s2963_s9, %s2003_s11 }
 0x495   : > { %1742 = vst [vmem:[%s1724_s23] sm:$0xf] %v1741_v0  ;;  %1744 = vst [vmem:[%s1724_s23 + $0x8] sm:$0xf] %v1743_v59 }
 0x496   : > { %1746 = vst [vmem:[%s1724_s23 + $0x10] sm:$0xf] %v1745_v1  ;;  %1748 = vst [vmem:[%s1724_s23 + $0x18] sm:$0xf] %v1747_v2 }
 0x497 PF: > { %s21_s19 = sadd.s32 1, %s2361_s19   ;;  %s2973_s25 = sld [smem:[#allocation6_spill]] }
 0x498   : > { %p18_p0 = scmp.ge.s32.totalorder %s21_s19, 6   ;;  %s2974_s21 = sld [smem:[#allocation7_spill]] }
 0x499   : > { %s2975_s13 = smov %s2341_s14  ;;  %s2976_s14 = smov %s2484_s29 }
 0x49a   : > { %s2977_s15 = smov %s2353_s17  ;;  %s2978_s16 = smov %s2357_s18 }
 0x49b   :  { %20 = sbr.rel (!%p18_p0) target bundleno = 6 (0x6), region = 290 }
 0x49d   : > { %s2979_s17 = smov %s2973_s25 }
 0x49e   : > { %s2980_s18 = smov %s2974_s21 }

// kernel: dff_block_pallas.5
= control target key start
LH: loop header
LB: loop body
LE: loop exit
PB: predicated region body
PF: predicated region fallthrough
CT: control target
= control target key end

     0   :  { %s2744_s0 = inlined_call_operand.vmem [shape: bf16[2,32,256], index: 0, kind: input, shape index: {}]   ;;  %s2745_s1 = inlined_call_operand.vmem [shape: bf16[2,32,256], index: 1, kind: input, shape index: {}]   ;;  %s2746_s2 = inlined_call_operand.vmem [shape: f32[2,32,6], index: 2, kind: input, shape index: {}]   ;;  %s2747_s3 = inlined_call_operand.vmem [shape: f32[2,32,1], index: 3, kind: input, shape index: {}]   ;;  %s2748_s4 = inlined_call_operand.vmem [shape: bf16[32,32], index: 4, kind: input, shape index: {}]   ;;  %s2749_s5 = inlined_call_operand.vmem [shape: bf16[4,32], index: 5, kind: input, shape index: {}]   ;;  %s2750_s6 = inlined_call_operand.vmem [shape: bf16[256,32], index: 6, kind: input, shape index: {}]   ;;  %s2751_s7 = inlined_call_operand.vmem [shape: bf16[32,128], index: 7, kind: input, shape index: {}]   ;;  %s2752_s8 = inlined_call_operand.vmem [shape: f32[32,2], index: 8, kind: input, shape index: {}]   ;;  %s2753_s9 = inlined_call_operand.vmem [shape: f32[128,1], index: 9, kind: input, shape index: {}]   ;;  %s2754_s10 = inlined_call_operand.vmem [shape: f32[4,3], index: 10, kind: input, shape index: {}]   ;;  %s2755_s11 = inlined_call_operand.vmem [shape: bf16[2,32,256], index: 11, kind: output, shape index: {}]  }
   0x1   :  { %2758 = sst [smem:[#allocation7_spill]] %s2755_s11 }
   0x2   :  { %s2306_s17 = smov 0   ;;  %s2308_s18 = smov 0  }
   0x3   :  { %s2310_s19 = smov 0   ;;  %s2312_s20 = smov 0  }
   0x4   :  { %s2314_s21 = smov 0   ;;  %s2316_s22 = smov 0  }
   0x5   :  { %s2318_s23 = smov 0  }
   0x6 LB: > { %s30_s24 = sadd.s32 1, %s2228_s21  ;;  %s33_s25 = sadd.s32 1, %s2232_s22  ;;  %s2236_s23 = sphi %s2318_s23, %s21_s23   ;;  %s2232_s22 = sphi %s2316_s22, %s2771_s22   ;;  %s2228_s21 = sphi %s2314_s21, %s2770_s21   ;;  %s2224_s20 = sphi %s2312_s20, %s2769_s20   ;;  %s2220_s19 = sphi %s2310_s19, %s2768_s19   ;;  %s2216_s18 = sphi %s2308_s18, %s2767_s18   ;;  %s2212_s17 = sphi %s2306_s17, %s2766_s17  }
   0x7   : > { %p31_p0 = scmp.ge.s32.totalorder %s30_s24, 2  ;;  %s1816_s26 = sadd.s32 4294967295, %s2236_s23  }
   0x8   : > { %p49_p1 = scmp.ne.s32.totalorder %s2216_s18, %s2212_s17  ;;  %p50_p2 = scmp.eq.s32.totalorder %s2236_s23, 0 }
   0x9   : > { %s2773_s24 = smov (%p31_p0, %s30_s24), 0  ;;  %s2775_s25 = smov (!%p31_p0, %s33_s25), %s2232_s22 }
   0xa   : > { %2759 = sst [smem:[#allocation5_spill]] %s2773_s24  ;;  %p35_p3 = scmp.ge.s32.totalorder %s2775_s25, 2 }
   0xb   : > { %p308_p4 = scmp.eq.s32.totalorder %s1816_s26, 3  ;;  %s38_s27 = ssub.s32 %s2228_s21, %s2773_s24 }
   0xc   : > { %p2352_p5 = por %p50_p2, %p49_p1  ;;  %s2777_s25 = smov (%p35_p3, %s2775_s25), 0 }
   0xd   : > { %2761 = sst [smem:[#allocation6_spill]] %s2777_s25  ;;  %p2358_p6 = por %p308_p4, %p49_p1 }
   0xe   : > { %s37_s30 = ssub.s32 %s2232_s22, %s2777_s25  ;;  %s42_s13 = sadd.s32 1, %s2216_s18 }
   0xf   : > { %s39_s12 = sor.u32 %s38_s27, %s37_s30  ;;  %p1819_p8 = scmp.ge.s32.totalorder %s2236_s23, 4 }
  0x10   : > { %p40_p7 = scmp.eq.s32.totalorder %s39_s12, 0 }
  0x11   : > { %351 = sbr.rel (%p1819_p8) target bundleno = 38 (0x26), region = 44 }
  0x12   : > { %s2366_s14 = scalar_select %p40_p7, %s2216_s18, %s42_s13  }
  0x16   : > { %354 = sbr.rel (!%p2352_p5) target bundleno = 30 (0x1e), region = 48  ;;  %s356_s15 = sand.u32 (%p2352_p5), 1, %s2216_s18  }
  0x17   : > { %s1821_s16 = sshll.u32 (%p2352_p5), %s2232_s22, 3  ;;  %s1820_s26 = sshll.u32 (%p2352_p5), %s356_s15, 4 }
  0x18   : > { %s360_s24 = sadd.s32 (%p2352_p5), %s2228_s21, %s1821_s16  ;;  %s358_s12 = scalar_lea.vmem (%p2352_p5), [#allocation2], %s1820_s26 }
  0x19   : > { %s1822_s11 = sshll.u32 (%p2352_p5), %s360_s24, 2 }
  0x1a   : > { %s362_s30 = scalar_lea.vmem (%p2352_p5), %s2744_s0, %s1822_s11 }
  0x1b   : > { %v379_v0 = vld [vmem:[%s362_s30] sm:$0xf]  ;;  %v381_v1 = vld [vmem:[%s362_s30 + $0x8] sm:$0xf]  ;;  %v383_v2 = vld [vmem:[%s362_s30 + $0x10] sm:$0xf] }
  0x1c   : > { %380 = vst [vmem:[%s358_s12] sm:$0xf] %v379_v0  ;;  %382 = vst [vmem:[%s358_s12 + $0x4] sm:$0xf] %v381_v1  ;;  %v385_v3 = vld [vmem:[%s362_s30 + $0x18] sm:$0xf] }
  0x1d   : > { %384 = vst [vmem:[%s358_s12 + $0x8] sm:$0xf] %v383_v2  ;;  %386 = vst [vmem:[%s358_s12 + $0xc] sm:$0xf] %v385_v3 }
  0x1e PF: > { %418 = sbr.rel (!%p2352_p5) target bundleno = 38 (0x26), region = 89  ;;  %s420_s24 = sand.u32 (%p2352_p5), 1, %s2216_s18  }
  0x1f   : > { %s1824_s13 = sshll.u32 (%p2352_p5), %s2232_s22, 3  ;;  %s1823_s25 = sshll.u32 (%p2352_p5), %s420_s24, 4 }
  0x20   : > { %s424_s11 = sadd.s32 (%p2352_p5), %s2228_s21, %s1824_s13  ;;  %s422_s30 = scalar_lea.vmem (%p2352_p5), [#allocation3], %s1823_s25 }
  0x21   : > { %s1825_s15 = sshll.u32 (%p2352_p5), %s424_s11, 2 }
  0x22   : > { %s426_s26 = scalar_lea.vmem (%p2352_p5), %s2745_s1, %s1825_s15 }
  0x23   : > { %v443_v4 = vld [vmem:[%s426_s26] sm:$0xf]  ;;  %v445_v5 = vld [vmem:[%s426_s26 + $0x8] sm:$0xf]  ;;  %v447_v6 = vld [vmem:[%s426_s26 + $0x10] sm:$0xf] }
  0x24   : > { %444 = vst [vmem:[%s422_s30] sm:$0xf] %v443_v4  ;;  %446 = vst [vmem:[%s422_s30 + $0x4] sm:$0xf] %v445_v5  ;;  %v449_v7 = vld [vmem:[%s426_s26 + $0x18] sm:$0xf] }
  0x25   : > { %448 = vst [vmem:[%s422_s30 + $0x8] sm:$0xf] %v447_v6  ;;  %450 = vst [vmem:[%s422_s30 + $0xc] sm:$0xf] %v449_v7 }
  0x26 PF: > { %p1826_p9 = scmp.ge.s32.totalorder %s2236_s23, 1  ;;  %p497_p10 = scmp.lt.s32.totalorder %s2236_s23, 5 }
  0x28   : > { %p498_p11 = pnand %p1826_p9, %p497_p10 }
  0x29   : > { %p563_p12 = scmp.lt.s32.totalorder (!%p498_p11), %s2224_s20, 1  ;;  %s504_s30 = sand.u32 (!%p498_p11), 1, %s2212_s17  }
  0x2a   : > { %501 = sbr.rel (%p498_p11) target bundleno = 991 (0x3df), region = 138  ;;  %s2475_s13 = sshll.u32 (!%p498_p11), %s504_s30, 4 }
  0x2b   : > { %s506_s17 = scalar_lea.vmem (!%p498_p11), [#allocation2], %s2475_s13  ;;  %s562_s26 = scalar_lea.vmem (!%p498_p11), [#allocation4], %s2475_s13 }
  0x2f   : > { %v2238_v8 = vmov 3   ;;  %v2239_v9 = vmov 2   ;;  %s2389_s28 = scalar_select %p563_p12, %s2224_s20, 1  ;;  %v2240_v14 = vmov 0.0   ;;  %vm2241_vm0 = vmmov 0   ;;  %v2112_v17 = vld [vmem:[%s2748_s4] sm:$0xff]  }
  0x30   : > { %2095 = vset.pattern.permute.xlu1 %v2238_v8  ;;  %2094 = vset.pattern.permute.xlu0 %v2239_v9  ;;  %v2242_v15 = vmov 4   ;;  %v2243_v16 = vmov 5   ;;  %vm670_vm1 = vcmask 261120   ;;  %v777_v18 = vld [vmem:[%s2754_s10] sm:$0xf]  ;;  %v2244_v19 = vmov 0  }
  0x31   : > { %s1882_s12 = sshll.u32 %s2389_s28, 5  ;;  %1962 = vmatprep.subr.bf16.mxu1 %v2240_v14  ;;  %1966 = vmatprep.mubr.msk.bf16.mxu1 %vm2241_vm0, %v2240_v14  ;;  %v2245_v20 = vmov 1   ;;  %v848_v21 = vld [vmem:[%s2754_s10] sm:$0x1]  ;;  %v638_v23 = vld [vmem:[%s2752_s8 + $0x10] sm:$0xff]  ;;  %v639_v30 = vld [vmem:[%s2752_s8 + $0x18] sm:$0xff] }
  0x32   : > { %s567_s25 = scalar_lea.vmem %s2746_s2, %s1882_s12  ;;  %1958 = vmatprep.mubr.msk.bf16.mxu0 %vm670_vm1, %v2112_v17  ;;  %s572_s24 = scalar_lea.vmem %s2747_s3, %s1882_s12  ;;  %v636_v25 = vld [vmem:[%s2752_s8] sm:$0xff]  ;;  %v1281_v27 = vld [vmem:[%s2753_s9 + $0x70] sm:$0xff]  ;;  %v637_v32 = vld [vmem:[%s2752_s8 + $0x8] sm:$0xff]  ;;  %vm840_vm2 = vcmask 1043456  }
  0x33   : > { %v576_v10 = vld [vmem:[%s567_s25 + $0x10] sm:$0xff]  ;;  %v577_v11 = vld [vmem:[%s567_s25 + $0x18] sm:$0xff]  ;;  %v574_v12 = vld [vmem:[%s567_s25] sm:$0xff]  ;;  %s1878_s30 = sshll.u32 (%p2358_p6), %s2224_s20, 3  ;;  %s2763_s28 = sld [smem:[#allocation7_spill]] (%p2358_p6) }
  0x34   : > { %763 = vperm.xlu1 %2095, %v576_v10   ;;  %743 = vperm.xlu0 %2094, %v576_v10   ;;  %v575_v13 = vld [vmem:[%s567_s25 + $0x8] sm:$0xff]  ;;  %v858_v22 = vld [vmem:[%s572_s24 + $0x18] sm:$0xff]  ;;  %v857_v24 = vld [vmem:[%s572_s24 + $0x10] sm:$0xff]  ;;  %s513_s25 = scalar_lea.vmem [#allocation3], %s2475_s13 }
  0x35   : > { %v855_v26 = vld [vmem:[%s572_s24] sm:$0xff]  ;;  %v856_v28 = vld [vmem:[%s572_s24 + $0x8] sm:$0xff]  ;;  %v1277_v31 = vld [vmem:[%s2753_s9 + $0x50] sm:$0xff] }
  0x36   : > { %v1279_v29 = vld [vmem:[%s2753_s9 + $0x60] sm:$0xff]  ;;  %v1282_v34 = vld [vmem:[%s2753_s9 + $0x78] sm:$0xff]  ;;  %v1273_v35 = vld [vmem:[%s2753_s9 + $0x30] sm:$0xff] }
  0x37   : > { %v1275_v33 = vld [vmem:[%s2753_s9 + $0x40] sm:$0xff]  ;;  %v1280_v36 = vld [vmem:[%s2753_s9 + $0x68] sm:$0xff]  ;;  %v1278_v38 = vld [vmem:[%s2753_s9 + $0x58] sm:$0xff] }
  0x38   : > { %767 = vperm.xlu1 %2095, %v577_v11   ;;  %747 = vperm.xlu0 %2094, %v577_v11   ;;  %v1271_v37 = vld [vmem:[%s2753_s9 + $0x20] sm:$0xff]  ;;  %v1269_v39 = vld [vmem:[%s2753_s9 + $0x10] sm:$0xff]  ;;  %v1276_v40 = vld [vmem:[%s2753_s9 + $0x48] sm:$0xff] }
  0x39   : > { %v1267_v41 = vld [vmem:[%s2753_s9] sm:$0xff]  ;;  %v1274_v42 = vld [vmem:[%s2753_s9 + $0x38] sm:$0xff]  ;;  %v1272_v43 = vld [vmem:[%s2753_s9 + $0x28] sm:$0xff] }
  0x3a   : > { %v1270_v44 = vld [vmem:[%s2753_s9 + $0x18] sm:$0xff]  ;;  %v1268_v45 = vld [vmem:[%s2753_s9 + $0x8] sm:$0xff]  ;;  %v1897_v55 = vld [vmem:[%s513_s25] sm:$0xff]  }
  0x3b   : > { %v1915_v46 = vld [vmem:[%s513_s25 + $0x8] sm:$0xff]   ;;  %v1898_v59 = vunpack.c.l.bf16 %v1897_v55  ;;  %v1899_v61 = vunpack.c.h.bf16 %v1897_v55  ;;  %v776_v7 = vld [vmem:[%s2749_s5] sm:$0x3]  ;;  %s1644_s25 = sadd.s32 (%p2358_p6), %s2220_s19, %s1878_s30 }
  0x3c   : > { %2096 = vset.pattern.permute.xlu1 %v2239_v9  ;;  %735 = vperm.xlu0 %2094, %v574_v12   ;;  %v1902_v47 = vunpack.c.l.bf16 %v1915_v46  ;;  %v1903_v50 = vunpack.c.h.bf16 %v1915_v46  ;;  %v2480_v5 = vld [vmem:[%s506_s17 + $0x8] sm:$0xff]  }
  0x3d   : > { %739 = vperm.xlu1 %2096, %v575_v13  }
  0x40   : > { %2097 = vset.pattern.permute.xlu0 %v2238_v8 }
  0x41   : > { %2098 = vset.pattern.permute.xlu1 %v2238_v8  ;;  %755 = vperm.xlu0 %2097, %v574_v12  }
  0x42   : > { %759 = vperm.xlu1 %2098, %v575_v13  }
  0x45   : > { %2100 = vset.pattern.permute.xlu0 %v2242_v15 }
  0x46   : > { %2099 = vset.pattern.permute.xlu1 %v2242_v15  ;;  %603 = vperm.xlu0 %2100, %v577_v11  }
  0x47   : > { %598 = vperm.xlu1 %2099, %v576_v10  }
  0x4a   : > { %588 = vperm.xlu0 %2100, %v574_v12  }
  0x4b   : > { %2101 = vset.pattern.permute.xlu1 %v2243_v16 }
  0x4c   : > { %619 = vperm.xlu1 %2101, %v576_v10   ;;  %v1895_v10 = vunpack.c.h.bf16 %v2480_v5 }
  0x4e   : > { %2103 = vset.pattern.permute.xlu0 %v2243_v16 }
  0x4f   : > { %611 = vperm.xlu0 %2103, %v574_v12  }
  0x50   : > { %623 = vperm.xlu1 %2101, %v577_v11  }
  0x53   : > { %2106 = vset.pattern.permute.xlu0 %v2245_v20 }
  0x54   : > { %2102 = vset.pattern.permute.xlu1 %v2242_v15  ;;  %836 = vperm.xlu0 %2106, %v777_v18   ;;  %v2492_v15 = vld [vmem:[%s506_s17] sm:$0xff]   ;;  %s1879_s17 = sshll.u32 (%p2358_p6), %s1644_s25, 2 }
  0x55   : > { %593 = vperm.xlu1 %2102, %v575_v13   ;;  %s1646_s16 = scalar_lea.vmem (%p2358_p6), %s2763_s28, %s1879_s17 }
  0x58   : > { %2109 = vset.pattern.permute.xlu0 %v2244_v19 }
  0x59   : > { %2104 = vset.pattern.permute.xlu1 %v2243_v16  ;;  %876 = vperm.xlu0 %2109, %v858_v22   ;;  %v1891_v22 = vunpack.c.h.bf16 %v2492_v15 }
  0x5a   : > { %615 = vperm.xlu1 %2104, %v575_v13  }
  0x5d   : > { %652 = vperm.xlu0 %2109, %v638_v23  }
  0x5e   : > { %2105 = vset.pattern.permute.xlu1 %v2244_v19 }
  0x5f   : > { %780 = vperm.xlu1 %2105, %v777_v18  }
  0x61   : > { %642 = vperm.xlu0 %2109, %v636_v25  }
  0x63   : > { %2107 = vset.pattern.permute.xlu1 %v2239_v9  ;;  %v1894_v9 = vunpack.c.l.bf16 %v2480_v5 }
  0x64   : > { %851 = vperm.xlu1 %2107, %v848_v21  }
  0x65   : > { %1355 = vperm.xlu0 %2109, %v1281_v27  }
  0x68   : > { %2108 = vset.pattern.permute.xlu1 %v2244_v19 }
  0x69   : > { %871 = vperm.xlu1 %2108, %v857_v24   ;;  %1345 = vperm.xlu0 %2109, %v1279_v29  }
  0x6d   : > { %861 = vperm.xlu1 %2108, %v855_v26   ;;  %1335 = vperm.xlu0 %2109, %v1277_v31   ;;  %v2113_v31 = vld [vmem:[%s2748_s4 + $0x8] sm:$0xff]  }
  0x71   : > { %866 = vperm.xlu1 %2108, %v856_v28   ;;  %1325 = vperm.xlu0 %2109, %v1275_v33   ;;  %v2115_v33 = vld [vmem:[%s2750_s6 + $0x8] sm:$0xff]  }
  0x75   : > { %657 = vperm.xlu1 %2108, %v639_v30   ;;  %1315 = vperm.xlu0 %2109, %v1273_v35   ;;  %v2118_v35 = vld [vmem:[%s2750_s6 + $0x10] sm:$0xff]  }
  0x79   : > { %647 = vperm.xlu1 %2108, %v637_v32   ;;  %1305 = vperm.xlu0 %2109, %v1271_v37   ;;  %v2122_v37 = vld [vmem:[%s2750_s6 + $0x20] sm:$0xff]  }
  0x7d   : > { %1360 = vperm.xlu1 %2108, %v1282_v34   ;;  %1295 = vperm.xlu0 %2109, %v1269_v39   ;;  %v2116_v34 = vld [vmem:[%s2750_s6 + $0x40] sm:$0xff]   ;;  %v2126_v39 = vld [vmem:[%s2750_s6 + $0x30] sm:$0xff]  }
  0x81   : > { %1350 = vperm.xlu1 %2108, %v1280_v36   ;;  %1285 = vperm.xlu0 %2109, %v1267_v41   ;;  %v2119_v36 = vld [vmem:[%s2750_s6 + $0x18] sm:$0xff]  }
  0x85   : > { %1340 = vperm.xlu1 %2108, %v1278_v38   ;;  %2110 = vset.pattern.permute.xlu0 %v2245_v20  ;;  %v2123_v38 = vld [vmem:[%s2750_s6 + $0x28] sm:$0xff]  }
  0x86   : > { %1536 = vperm.xlu0 %2110, %v636_v25  }
  0x89   : > { %1330 = vperm.xlu1 %2108, %v1276_v40   ;;  %v2127_v40 = vld [vmem:[%s2750_s6 + $0x38] sm:$0xff]  }
  0x8a   : > { %1548 = vperm.xlu0 %2110, %v639_v30  }
  0x8d   : > { %1320 = vperm.xlu1 %2108, %v1274_v42  }
  0x91   : > { %1310 = vperm.xlu1 %2108, %v1272_v43  }
  0x95   : > { %1300 = vperm.xlu1 %2108, %v1270_v44  }
  0x99   : > { %1290 = vperm.xlu1 %2108, %v1268_v45  }
  0x9d   : > { %2111 = vset.pattern.permute.xlu1 %v2245_v20  ;;  %v1890_v20 = vunpack.c.l.bf16 %v2492_v15 }
  0x9e   : > { %1540 = vperm.xlu1 %2111, %v637_v32   ;;  %v2114_v32 = vld [vmem:[%s2750_s6] sm:$0xff]  }
  0xa2   : > { %1544 = vperm.xlu1 %2111, %v638_v23  }
  0xaf   : > { %v764_v48 = vpop.permute.xlu1 %763  ;;  %v744_v49 = vpop.permute.xlu0 %743 }
  0xb0   : > { %v752_v51 = vmul.f32 %v1902_v47, %v744_v49 }
  0xb2   : > { %v772_v56 = vadd.f32 %v764_v48, %v752_v51 }
  0xb3   : > { %v768_v52 = vpop.permute.xlu1 %767  ;;  %v748_v53 = vpop.permute.xlu0 %747 }
  0xb4   : > { %v753_v54 = vmul.f32 %v1903_v50, %v748_v53 }
  0xb6   : > { %v773_v57 = vadd.f32 %v768_v52, %v753_v54 }
  0xb7   : > { %v736_v58 = vpop.permute.xlu0 %735 }
  0xb8   : > { %v740_v60 = vpop.permute.xlu1 %739  ;;  %v775_v62 = vpack.c.bf16 %v773_v57, %v772_v56  ;;  %v750_v63 = vmul.f32 %v1898_v59, %v736_v58 }
  0xb9   : > { %v751_v0 = vmul.f32 %v1899_v61, %v740_v60 }
  0xba   : > { %1963 = vmatpush3.bf16.msra.mxu1 %v775_v62  ;;  %v879_v62 = vlaneseq }
  0xbb   : > { %1964 = vmatprep.subr.bf16.mxu1 %v2240_v14 }
  0xbc   : > { %v756_v1 = vpop.permute.xlu0 %755 }
  0xbd   : > { %v770_v2 = vadd.f32 %v756_v1, %v750_v63  ;;  %v760_v3 = vpop.permute.xlu1 %759 }
  0xbe   : > { %v771_v4 = vadd.f32 %v760_v3, %v751_v0 }
  0xc0   : > { %v774_v6 = vpack.c.bf16 %v771_v4, %v770_v2  ;;  %v880_v2 = vshrl.u32 %v879_v62, 7  ;;  %v2124_v62 = vld [vmem:[%s2750_s6 + $0x60] sm:$0xff]  }
  0xc1   : > { %v604_v11 = vpop.permute.xlu0 %603 }
  0xc2   : > { %1965 = vmatpush3.bf16.msra.mxu1 %v774_v6  ;;  %v599_v8 = vpop.permute.xlu1 %598  ;;  %v609_v14 = vmul.f32 %v1895_v10, %v604_v11 }
  0xc3   : > { %v608_v12 = vmul.f32 %v1894_v9, %v599_v8 }
  0xc5   : > { %1967 = vmatmul.mubr.msk.bf16.vlgmr.msra.gmra.mxu1 %vm670_vm1, %v776_v7  ;;  %v589_v18 = vpop.permute.xlu0 %588  ;;  %v881_v7 = vsub.s32 0, %v880_v2  ;;  %v2130_v2 = vld [vmem:[%s2751_s7] sm:$0xff]  }
  0xc6   : > { %v606_v24 = vmul.f32 %v1890_v20, %v589_v18  ;;  %1994 = vmatprep.mubr.msk.bf16.mxu1 %vm670_vm1, %v2114_v32 }
  0xc7   : > { %v620_v13 = vpop.permute.xlu1 %619 }
  0xc8   : > { %v628_v16 = vadd.f32 %v620_v13, %v608_v12 }
  0xca   : > { %v612_v25 = vpop.permute.xlu0 %611 }
  0xcb   : > { %v624_v17 = vpop.permute.xlu1 %623  ;;  %v626_v27 = vadd.f32 %v612_v25, %v606_v24 }
  0xcc   : > { %v629_v19 = vadd.f32 %v624_v17, %v609_v14 }
  0xce   : > { %v631_v21 = vpack.c.bf16 %v629_v19, %v628_v16 }
  0xcf   : > { %v837_v56 = vpop.permute.xlu0 %836 }
  0xd0   : > { %v594_v23 = vpop.permute.xlu1 %593  ;;  %1954 = vmatprep.subr.bf16.mxu0 %v631_v21  ;;  %1990 = vmatprep.subr.bf16.mxu1 %v631_v21 }
  0xd1   : > { %1955 = vmatpush3.bf16.msra.mxu0 %v631_v21  ;;  %1991 = vmatpush3.bf16.msra.mxu1 %v631_v21  ;;  %v607_v26 = vmul.f32 %v1891_v22, %v594_v23 }
  0xd4   : > { %v877_v13 = vpop.permute.xlu0 %876 }
  0xd5   : > { %v616_v28 = vpop.permute.xlu1 %615 }
  0xd6   : > { %v627_v29 = vadd.f32 %v616_v28, %v607_v26 }
  0xd8   : > { %v630_v30 = vpack.c.bf16 %v627_v29, %v626_v27 }
  0xda   : > { %1956 = vmatprep.subr.bf16.mxu0 %v630_v30  ;;  %1992 = vmatprep.subr.bf16.mxu1 %v630_v30  ;;  %v781_v41 = vpop.permute.xlu1 %780 }
  0xdb   : > { %1957 = vmatpush3.bf16.msra.mxu0 %v630_v30  ;;  %1993 = vmatpush3.bf16.msra.mxu1 %v630_v30 }
  0xde   : > { %1959 = vmatmul.mubr.msk.bf16.vlgmr.msra.gmra.mxu0 %vm670_vm1, %v2113_v31  ;;  %1995 = vmatmul.mubr.msk.bf16.vlgmr.msra.gmra.mxu1 %vm670_vm1, %v2115_v33 }
  0xdf   : > { %1974 = vmatprep.mubr.msk.bf16.mxu0 %vm670_vm1, %v2116_v34  ;;  %1998 = vmatprep.mubr.msk.bf16.mxu1 %vm670_vm1, %v2118_v35  ;;  %v852_v57 = vpop.permute.xlu1 %851 }
  0xe4   : > { %v872_v63 = vpop.permute.xlu1 %871 }
  0xe6   : > { %1999 = vmatmul.mubr.msk.bf16.gmra.mxu1 %vm670_vm1, %v2119_v36 }
  0xe7   : > { %2002 = vmatprep.mubr.msk.bf16.mxu1 %vm670_vm1, %v2122_v37 }
  0xe8   : > { %v862_v4 = vpop.permute.xlu1 %861 }
  0xec   : > { %v867_v12 = vpop.permute.xlu1 %866 }
  0xee   : > { %2003 = vmatmul.mubr.msk.bf16.gmra.mxu1 %vm670_vm1, %v2123_v38 }
  0xef   : > { %2006 = vmatprep.mubr.msk.bf16.mxu1 %vm670_vm1, %v2126_v39 }
  0xf0   : > { %v658_v39 = vpop.permute.xlu1 %657 }
  0xf6   : > { %2007 = vmatmul.mubr.msk.bf16.gmra.mxu1 %vm670_vm1, %v2127_v40  ;;  %v653_v40 = vpop.permute.xlu0 %652 }
 0x185   : > { %v820_v42 = vpop.f32.mrf.mxu1 }
 0x186   : > { %v821_v43 = vadd.f32 %v820_v42, %v781_v41 }
 0x187   : > { %v1968_v44 = vpop.f32.mrf.mxu1 }
 0x188   : > { %v827_v45 = vmul.f32 0.044715, %v821_v43  ;;  %v826_v53 = vmul.f32 0.5, %v821_v43 }
 0x189   : > { %v823_v46 = vpop.f32.mrf.mxu1 }
 0x18a   : > { %v828_v47 = vmul.f32 %v827_v45, %v821_v43  ;;  %v648_v45 = vpop.permute.xlu1 %647  ;;  %v643_v46 = vpop.permute.xlu0 %642 }
 0x18b   : > { %v1969_v48 = vpop.f32.mrf.mxu1 }
 0x18c   : > { %v829_v49 = vmul.f32 %v828_v47, %v821_v43 }
 0x18e   : > { %v830_v50 = vadd.f32 %v829_v49, %v821_v43 }
 0x190   : > { %v831_v51 = vmul.f32 0.7978846, %v830_v50 }
 0x192   : > { %2132 = vtanh.f32 %v831_v51 }
 0x19e   : > { %v1960_v35 = vpop.f32.mrf.mxu0 }
 0x19f   : > { %v2133_v52 = vpop.eup %2132  ;;  %v720_v47 = vadd.f32 %v1960_v35, %v653_v40 }
 0x1a0   : > { %v833_v54 = vadd.f32 1.0, %v2133_v52  ;;  %v711_v38 = vpop.f32.mrf.mxu0 }
 0x1a1   : > { %v712_v49 = vadd.f32 %v711_v38, %v643_v46 }
 0x1a2   : > { %v834_v55 = vmul.f32 %v833_v54, %v826_v53  ;;  %v1961_v41 = vpop.f32.mrf.mxu0 }
 0x1a3   : > { %v723_v50 = vadd.f32 %v1961_v41, %v658_v39 }
 0x1a4   : > { %v839_v58 = vmul.f32 %v837_v56, %v834_v55  ;;  %v714_v42 = vpop.f32.mrf.mxu0 }
 0x1a5   : > { %v715_v51 = vadd.f32 %v714_v42, %v648_v45 }
 0x1a6   : > { %v841_v59 = vsel %vm840_vm2, %v839_v58, 0.0 }
 0x1a7   : > { %v842_v60 = vrot.slane %v841_v59, 4 }
 0x1a9   : > { %v843_v61 = vadd.f32 %v842_v60, %v841_v59  ;;  %v2117_v59 = vld [vmem:[%s2750_s6 + $0x48] sm:$0xff]   ;;  %v2120_v60 = vld [vmem:[%s2750_s6 + $0x50] sm:$0xff]  }
 0x1ab   : > { %v844_v0 = vrot.slane %v843_v61, 2 }
 0x1ad   : > { %v845_v1 = vadd.f32 %v844_v0, %v843_v61  ;;  %v2121_v61 = vld [vmem:[%s2750_s6 + $0x58] sm:$0xff]   ;;  %v2128_v0 = vld [vmem:[%s2750_s6 + $0x70] sm:$0xff]  }
 0x1af   : > { %v846_v3 = vrot.slane %v845_v1, 1 }
 0x1b1   : > { %v847_v6 = vadd.f32 %v846_v3, %v845_v1  ;;  %v2129_v1 = vld [vmem:[%s2750_s6 + $0x78] sm:$0xff]   ;;  %v1996_v3 = vpop.f32.mrf.mxu1 }
 0x1b3   : > { %v854_v8 = vadd.f32 %v852_v57, %v847_v6 }
 0x1b5   : > { %v882_v11 = vrot.slane %v854_v8, %v881_v7  ;;  %v2571_v8 = vpop.permute.xlu0 %1355 }
 0x1b7   : > { %v883_v14 = vmul.f32 %v882_v11, %v862_v4  ;;  %v884_v16 = vmul.f32 %v882_v11, %v867_v12  ;;  %v885_v17 = vmul.f32 %v882_v11, %v872_v63  ;;  %v886_v18 = vmul.f32 %v882_v11, %v877_v13  ;;  %v2125_v63 = vld [vmem:[%s2750_s6 + $0x68] sm:$0xff]   ;;  %v1204_v4 = vpop.f32.mrf.mxu1  ;;  %v2573_v12 = vpop.permute.xlu1 %1360 }
 0x1b9   : > { %v887_v19 = vsub.f32 0.0, %v883_v14  ;;  %v888_v21 = vsub.f32 0.0, %v884_v16  ;;  %v889_v23 = vsub.f32 0.0, %v885_v17  ;;  %v890_v24 = vsub.f32 0.0, %v886_v18  ;;  %v1997_v6 = vpop.f32.mrf.mxu1  ;;  %v2575_v13 = vpop.permute.xlu0 %1345 }
 0x1bb   : > { %v891_v25 = vmul.f32 1.442695, %v887_v19  ;;  %v893_v26 = vmul.f32 1.442695, %v888_v21  ;;  %v895_v27 = vmul.f32 1.442695, %v889_v23  ;;  %v1207_v7 = vpop.f32.mrf.mxu1  ;;  %v2579_v16 = vpop.permute.xlu1 %1350 }
 0x1bc   : > { %v897_v28 = vmul.f32 1.442695, %v890_v24 }
 0x1bd   : > { %2134 = vpow2.f32 %v891_v25  ;;  %v2000_v11 = vpop.f32.mrf.mxu1  ;;  %v1336_v18 = vpop.permute.xlu0 %1335 }
 0x1be   : > { %2136 = vpow2.f32 %v893_v26 }
 0x1bf   : > { %2138 = vpow2.f32 %v895_v27  ;;  %v2577_v14 = vpop.f32.mrf.mxu1  ;;  %v1341_v21 = vpop.permute.xlu1 %1340 }
 0x1c0   : > { %2140 = vpow2.f32 %v897_v28 }
 0x1c1   : > { %v2001_v17 = vpop.f32.mrf.mxu1  ;;  %v1326_v24 = vpop.permute.xlu0 %1325 }
 0x1c3   : > { %v1223_v19 = vpop.f32.mrf.mxu1  ;;  %v1331_v28 = vpop.permute.xlu1 %1330 }
 0x1c5   : > { %v2004_v26 = vpop.f32.mrf.mxu1 }
 0x1c7   : > { %v1321_v35 = vpop.permute.xlu1 %1320 }
 0x1ca   : > { %v2135_v29 = vpop.eup %2134 }
 0x1cb   : > { %v2137_v30 = vpop.eup %2136  ;;  %v899_v31 = vadd.f32 1.0, %v2135_v29  ;;  %v1311_v42 = vpop.permute.xlu1 %1310 }
 0x1cc   : > { %v2139_v32 = vpop.eup %2138  ;;  %v900_v33 = vadd.f32 1.0, %v2137_v30  ;;  %v1236_v30 = vpop.f32.mrf.mxu1 }
 0x1cd   : > { %v2141_v34 = vpop.eup %2140  ;;  %v901_v36 = vadd.f32 1.0, %v2139_v32  ;;  %2142 = vrcp.f32 %v899_v31  ;;  %v1316_v31 = vpop.permute.xlu0 %1315 }
 0x1ce   : > { %v902_v37 = vadd.f32 1.0, %v2141_v34  ;;  %2144 = vrcp.f32 %v900_v33  ;;  %v2005_v34 = vpop.f32.mrf.mxu1 }
 0x1cf   : > { %2146 = vrcp.f32 %v901_v36 }
 0x1d0   : > { %2148 = vrcp.f32 %v902_v37  ;;  %v1239_v39 = vpop.f32.mrf.mxu1 }
 0x1d1   : > { %v2581_v37 = vpop.permute.xlu0 %1305 }
 0x1d2   : > { %v2008_v45 = vpop.f32.mrf.mxu1 }
 0x1d5   : > { %v1296_v46 = vpop.permute.xlu0 %1295 }
 0x1da   : > { %v2143_v43 = vpop.eup %2142 }
 0x1db   : > { %v2145_v44 = vpop.eup %2144  ;;  %v907_v54 = vmul.f32 %v2143_v43, %v712_v49 }
 0x1dc   : > { %v2147_v48 = vpop.eup %2146  ;;  %v908_v56 = vmul.f32 %v2145_v44, %v715_v51 }
 0x1dd   : > { %v2149_v52 = vpop.eup %2148  ;;  %v909_v53 = vmul.f32 %v2147_v48, %v720_v47 }
 0x1de   : > { %v910_v55 = vmul.f32 %v2149_v52, %v723_v50  ;;  %v911_v58 = vpack.c.bf16 %v908_v56, %v907_v54 }
 0x1e0   : > { %v912_v57 = vpack.c.bf16 %v910_v55, %v909_v53  ;;  %v1252_v55 = vpop.f32.mrf.mxu1 }
 0x1e2   : > { %1970 = vmatprep.subr.bf16.mxu0 %v912_v57 }
 0x1e3   : > { %1971 = vmatpush3.bf16.msra.mxu0 %v912_v57  ;;  %v1301_v57 = vpop.permute.xlu1 %1300 }
 0x1e4   : > { %1972 = vmatprep.subr.bf16.mxu0 %v911_v58 }
 0x1e7   : > { %1973 = vmatpush3.bf16.msra.mxu0 %v911_v58 }
 0x1ea   : > { %1975 = vmatmul.mubr.msk.bf16.vlgmr.msra.gmra.mxu0 %vm670_vm1, %v2117_v59 }
 0x1eb   : > { %1978 = vmatprep.mubr.msk.bf16.mxu0 %vm670_vm1, %v2120_v60 }
 0x1f2   : > { %1979 = vmatmul.mubr.msk.bf16.gmra.mxu0 %vm670_vm1, %v2121_v61 }
 0x1f3   : > { %1982 = vmatprep.mubr.msk.bf16.mxu0 %vm670_vm1, %v2124_v62 }
 0x1fa   : > { %1983 = vmatmul.mubr.msk.bf16.gmra.mxu0 %vm670_vm1, %v2125_v63 }
 0x1fb   : > { %1986 = vmatprep.mubr.msk.bf16.mxu0 %vm670_vm1, %v2128_v0 }
 0x202   : > { %1987 = vmatmul.mubr.msk.bf16.gmra.mxu0 %vm670_vm1, %v2129_v1  ;;  %v1286_v1 = vpop.permute.xlu0 %1285 }
 0x203   : > { %2026 = vmatprep.mubr.bf16.mxu0 %v2130_v2 }
 0x2aa   : > { %v1976_v23 = vpop.f32.mrf.mxu0 }
 0x2ab   : > { %v1213_v40 = vadd.f32 %v1996_v3, %v1976_v23 }
 0x2ac   : > { %v1043_v25 = vpop.f32.mrf.mxu0 }
 0x2ad   : > { %v2583_v47 = vadd.f32 %v1296_v46, %v1213_v40  ;;  %v1205_v53 = vadd.f32 %v1204_v4, %v1043_v25  ;;  %v2009_v25 = vpop.f32.mrf.mxu1 }
 0x2ae   : > { %v1977_v27 = vpop.f32.mrf.mxu0 }
 0x2af   : > { %v1216_v48 = vadd.f32 %v1997_v6, %v1977_v27  ;;  %v2590_v60 = vmul.f32 0.044715, %v2583_v47  ;;  %v1255_v40 = vpop.f32.mrf.mxu1 }
 0x2b0   : > { %v1046_v29 = vpop.f32.mrf.mxu0 }
 0x2b1   : > { %v2592_v61 = vadd.f32 %v1301_v57, %v1216_v48 }
 0x2b2   : > { %v1980_v32 = vpop.f32.mrf.mxu0 }
 0x2b3   : > { %v1229_v62 = vadd.f32 %v2000_v11, %v1980_v32 }
 0x2b4   : > { %v1059_v33 = vpop.f32.mrf.mxu0 }
 0x2b5   : > { %v2610_v32 = vadd.f32 %v1316_v31, %v1229_v62 }
 0x2b6   : > { %v1981_v36 = vpop.f32.mrf.mxu0 }
 0x2b7   : > { %v1232_v54 = vadd.f32 %v2001_v17, %v1981_v36  ;;  %v2600_v17 = vadd.f32 %v1286_v1, %v1205_v53 }
 0x2b8   : > { %v1062_v38 = vpop.f32.mrf.mxu0 }
 0x2b9   : > { %v1224_v23 = vadd.f32 %v1223_v19, %v1062_v38 }
 0x2ba   : > { %v1984_v41 = vpop.f32.mrf.mxu0 }
 0x2bb   : > { %v1245_v43 = vadd.f32 %v2004_v26, %v1984_v41 }
 0x2bc   : > { %v1075_v44 = vpop.f32.mrf.mxu0 }
 0x2bd   : > { %v2585_v49 = vadd.f32 %v1336_v18, %v1245_v43  ;;  %v1237_v51 = vadd.f32 %v1236_v30, %v1075_v44  ;;  %v1208_v18 = vadd.f32 %v1207_v7, %v1046_v29 }
 0x2be   : > { %v1985_v50 = vpop.f32.mrf.mxu0 }
 0x2bf   : > { %v1248_v52 = vadd.f32 %v2005_v34, %v1985_v50  ;;  %v1405_v63 = vmul.f32 0.044715, %v2585_v49  ;;  %v2595_v2 = vadd.f32 %v1326_v24, %v1237_v51  ;;  %v1221_v34 = vadd.f32 %v2577_v14, %v1059_v33  ;;  %v1291_v33 = vpop.permute.xlu1 %1290 }
 0x2c0   : > { %v1078_v56 = vpop.f32.mrf.mxu0  ;;  %v2629_v46 = vadd.f32 %v1291_v33, %v1208_v18 }
 0x2c1   : > { %v2587_v58 = vadd.f32 %v1341_v21, %v1248_v52  ;;  %v1240_v59 = vadd.f32 %v1239_v39, %v1078_v56  ;;  %v2602_v21 = vadd.f32 %v1321_v35, %v1232_v54  ;;  %v1421_v7 = vmul.f32 %v1405_v63, %v2585_v49 }
 0x2c2   : > { %v1988_v0 = vpop.f32.mrf.mxu0  ;;  %v1403_v19 = vmul.f32 0.044715, %v2595_v2  ;;  %v2620_v39 = vadd.f32 %v1311_v42, %v1224_v23  ;;  %v1401_v42 = vmul.f32 0.044715, %v2610_v32  ;;  %v2633_v48 = vadd.f32 %v2581_v37, %v1221_v34 }
 0x2c3   : > { %v1406_v3 = vmul.f32 0.044715, %v2587_v58  ;;  %v2598_v4 = vadd.f32 %v1331_v28, %v1240_v59  ;;  %v1261_v6 = vadd.f32 %v2008_v45, %v1988_v0  ;;  %v1398_v28 = vmul.f32 0.044715, %v2592_v61 }
 0x2c4   : > { %v1091_v26 = vpop.f32.mrf.mxu0  ;;  %v1437_v50 = vmul.f32 %v1421_v7, %v2585_v49  ;;  %v1419_v51 = vmul.f32 %v1403_v19, %v2595_v2  ;;  %v1417_v0 = vmul.f32 %v1401_v42, %v2610_v32  ;;  %v1396_v33 = vmul.f32 0.044715, %v2629_v46 }
 0x2c5   : > { %v1422_v11 = vmul.f32 %v1406_v3, %v2587_v58  ;;  %v1404_v27 = vmul.f32 0.044715, %v2598_v4  ;;  %v2607_v24 = vadd.f32 %v2571_v8, %v1261_v6  ;;  %v1253_v30 = vadd.f32 %v1252_v55, %v1091_v26 }
 0x2c6   : > { %v1989_v29 = vpop.f32.mrf.mxu0  ;;  %v1402_v8 = vmul.f32 0.044715, %v2602_v21  ;;  %v1400_v55 = vmul.f32 0.044715, %v2620_v39  ;;  %v1453_v3 = vadd.f32 %v1437_v50, %v2585_v49  ;;  %v1413_v50 = vmul.f32 %v2590_v60, %v2583_v47 }
 0x2c7   : > { %v1409_v35 = vmul.f32 0.044715, %v2607_v24  ;;  %v2617_v36 = vadd.f32 %v2575_v13, %v1253_v30  ;;  %v1264_v38 = vadd.f32 %v2009_v25, %v1989_v29  ;;  %v1420_v31 = vmul.f32 %v1404_v27, %v2598_v4 }
 0x2c8   : > { %v1094_v41 = vpop.f32.mrf.mxu0  ;;  %v1438_v14 = vmul.f32 %v1422_v11, %v2587_v58  ;;  %v1435_v25 = vmul.f32 %v1419_v51, %v2595_v2  ;;  %v1416_v26 = vmul.f32 %v1400_v55, %v2620_v39  ;;  %v1395_v51 = vmul.f32 0.044715, %v2600_v17 }
 0x2c9   : > { %v1425_v43 = vmul.f32 %v1409_v35, %v2607_v24  ;;  %v1407_v44 = vmul.f32 0.044715, %v2617_v36  ;;  %v2627_v45 = vadd.f32 %v2573_v12, %v1264_v38  ;;  %v1256_v13 = vadd.f32 %v1255_v40, %v1094_v41 }
 0x2ca   : > { %v1418_v12 = vmul.f32 %v1402_v8, %v2602_v21  ;;  %v1454_v37 = vadd.f32 %v1438_v14, %v2587_v58  ;;  %v1436_v63 = vmul.f32 %v1420_v31, %v2598_v4  ;;  %v1469_v38 = vmul.f32 0.7978846, %v1453_v3 }
 0x2cb   : > { %v1423_v52 = vmul.f32 %v1407_v44, %v2617_v36  ;;  %v1410_v53 = vmul.f32 0.044715, %v2627_v45  ;;  %v2640_v54 = vadd.f32 %v2579_v16, %v1256_v13  ;;  %v1441_v56 = vmul.f32 %v1425_v43, %v2607_v24 }
 0x2cc   : > { %v1399_v16 = vmul.f32 0.044715, %v2633_v48  ;;  %v1470_v27 = vmul.f32 0.7978846, %v1454_v37  ;;  %v1434_v30 = vmul.f32 %v1418_v12, %v2602_v21  ;;  %v1452_v19 = vadd.f32 %v1436_v63, %v2598_v4 }
 0x2cd   : > { %v1426_v57 = vmul.f32 %v1410_v53, %v2627_v45  ;;  %v1408_v59 = vmul.f32 0.044715, %v2640_v54  ;;  %v1439_v62 = vmul.f32 %v1423_v52, %v2617_v36  ;;  %v1457_v1 = vadd.f32 %v1441_v56, %v2607_v24 }
 0x2ce   : > { %v1415_v35 = vmul.f32 %v1399_v16, %v2633_v48  ;;  %v1433_v8 = vmul.f32 %v1417_v0, %v2610_v32  ;;  %v1451_v41 = vadd.f32 %v1435_v25, %v2595_v2  ;;  %v1414_v14 = vmul.f32 %v1398_v28, %v2592_v61 }
 0x2cf   : > { %v1424_v6 = vmul.f32 %v1408_v59, %v2640_v54  ;;  %v1442_v18 = vmul.f32 %v1426_v57, %v2627_v45  ;;  %v1455_v23 = vadd.f32 %v1439_v62, %v2617_v36  ;;  %v1473_v11 = vmul.f32 0.7978846, %v1457_v1 }
 0x2d0   : > { %v1450_v43 = vadd.f32 %v1434_v30, %v2602_v21  ;;  %v1468_v13 = vmul.f32 0.7978846, %v1452_v19  ;;  %v1432_v42 = vmul.f32 %v1416_v26, %v2620_v39  ;;  %v1467_v52 = vmul.f32 0.7978846, %v1451_v41 }
 0x2d1   : > { %v1458_v34 = vadd.f32 %v1442_v18, %v2627_v45  ;;  %v1440_v7 = vmul.f32 %v1424_v6, %v2640_v54  ;;  %v1471_v29 = vmul.f32 0.7978846, %v1455_v23  ;;  %2150 = vtanh.f32 %v1473_v11 }
 0x2d2   : > { %v1449_v28 = vadd.f32 %v1433_v8, %v2610_v32  ;;  %v1431_v53 = vmul.f32 %v1415_v35, %v2633_v48  ;;  %v1412_v12 = vmul.f32 %v1396_v33, %v2629_v46  ;;  %v1430_v55 = vmul.f32 %v1414_v14, %v2592_v61 }
 0x2d3   : > { %v1474_v31 = vmul.f32 0.7978846, %v1458_v34  ;;  %v1456_v40 = vadd.f32 %v1440_v7, %v2640_v54  ;;  %2152 = vtanh.f32 %v1471_v29  ;;  %v1466_v56 = vmul.f32 0.7978846, %v1450_v43 }
 0x2d4   : > { %2154 = vtanh.f32 %v1470_v27  ;;  %v1448_v37 = vadd.f32 %v1432_v42, %v2620_v39  ;;  %v1411_v57 = vmul.f32 %v1395_v51, %v2600_v17  ;;  %v1429_v60 = vmul.f32 %v1413_v50, %v2583_v47 }
 0x2d5   : > { %2156 = vtanh.f32 %v1474_v31  ;;  %v1472_v44 = vmul.f32 0.7978846, %v1456_v40  ;;  %v1465_v59 = vmul.f32 0.7978846, %v1449_v28  ;;  %v1447_v62 = vadd.f32 %v1431_v53, %v2633_v48 }
 0x2d6   : > { %2158 = vtanh.f32 %v1469_v38  ;;  %v1446_v63 = vadd.f32 %v1430_v55, %v2592_v61  ;;  %v1428_v0 = vmul.f32 %v1412_v12, %v2629_v46  ;;  %v1464_v16 = vmul.f32 0.7978846, %v1448_v37 }
 0x2d7   : > { %2160 = vtanh.f32 %v1472_v44  ;;  %v1445_v1 = vadd.f32 %v1429_v60, %v2583_v47  ;;  %v1427_v3 = vmul.f32 %v1411_v57, %v2600_v17  ;;  %v1463_v18 = vmul.f32 0.7978846, %v1447_v62 }
 0x2d8   : > { %2162 = vtanh.f32 %v1468_v13  ;;  %v1462_v25 = vmul.f32 0.7978846, %v1446_v63  ;;  %v1444_v26 = vadd.f32 %v1428_v0, %v2629_v46  ;;  %v1393_v34 = vmul.f32 0.5, %v2607_v24 }
 0x2d9   : > { %2164 = vtanh.f32 %v1467_v52  ;;  %v1461_v7 = vmul.f32 0.7978846, %v1445_v1  ;;  %v1443_v29 = vadd.f32 %v1427_v3, %v2600_v17  ;;  %v1394_v35 = vmul.f32 0.5, %v2627_v45 }
 0x2da   : > { %2166 = vtanh.f32 %v1466_v56  ;;  %v1391_v40 = vmul.f32 0.5, %v2617_v36  ;;  %v1392_v41 = vmul.f32 0.5, %v2640_v54  ;;  %v1460_v14 = vmul.f32 0.7978846, %v1444_v26 }
 0x2db   : > { %2168 = vtanh.f32 %v1465_v59  ;;  %v1390_v42 = vmul.f32 0.5, %v2587_v58  ;;  %v1459_v50 = vmul.f32 0.7978846, %v1443_v29  ;;  %v1389_v36 = vmul.f32 0.5, %v2585_v49 }
 0x2dc   : > { %2170 = vtanh.f32 %v1464_v16  ;;  %v1388_v58 = vmul.f32 0.5, %v2598_v4  ;;  %v1387_v62 = vmul.f32 0.5, %v2595_v2  ;;  %v1386_v1 = vmul.f32 0.5, %v2602_v21 }
 0x2dd   : > { %2172 = vtanh.f32 %v1463_v18  ;;  %v1385_v4 = vmul.f32 0.5, %v2610_v32  ;;  %v1382_v32 = vmul.f32 0.5, %v2592_v61 }
 0x2de   : > { %v2151_v6 = vpop.eup %2150  ;;  %2174 = vtanh.f32 %v1462_v25 }
 0x2df   : > { %v1505_v27 = vadd.f32 1.0, %v2151_v6  ;;  %2176 = vtanh.f32 %v1461_v7  ;;  %v1383_v7 = vmul.f32 0.5, %v2633_v48  ;;  %v1380_v48 = vmul.f32 0.5, %v2629_v46 }
 0x2e0   : > { %v2153_v23 = vpop.eup %2152  ;;  %2178 = vtanh.f32 %v1460_v14 }
 0x2e1   : > { %v2155_v11 = vpop.eup %2154  ;;  %v1503_v8 = vadd.f32 1.0, %v2153_v23  ;;  %v1521_v33 = vmul.f32 %v1505_v27, %v1393_v34  ;;  %2180 = vtanh.f32 %v1459_v50  ;;  %v1384_v27 = vmul.f32 0.5, %v2620_v39  ;;  %v1537_v50 = vpop.permute.xlu0 %1536 }
 0x2e2   : > { %v2157_v30 = vpop.eup %2156  ;;  %v1502_v24 = vadd.f32 1.0, %v2155_v11 }
 0x2e3   : > { %v2159_v19 = vpop.eup %2158  ;;  %v1506_v38 = vadd.f32 1.0, %v2157_v30  ;;  %v1519_v51 = vmul.f32 %v1503_v8, %v1391_v40  ;;  %v1381_v40 = vmul.f32 0.5, %v2583_v47  ;;  %v2131_v47 = vld [vmem:[%s2751_s7 + $0x8] sm:$0xff]  }
 0x2e4   : > { %v2161_v31 = vpop.eup %2160  ;;  %v1501_v28 = vadd.f32 1.0, %v2159_v19  ;;  %v1518_v12 = vmul.f32 %v1502_v24, %v1390_v42  ;;  %v1541_v42 = vpop.permute.xlu1 %1540 }
 0x2e5   : > { %v1522_v43 = vmul.f32 %v1506_v38, %v1394_v35  ;;  %v1504_v44 = vadd.f32 1.0, %v2161_v31  ;;  %v2163_v13 = vpop.eup %2162 }
 0x2e6   : > { %v2165_v53 = vpop.eup %2164  ;;  %v1500_v55 = vadd.f32 1.0, %v2163_v13  ;;  %v1517_v37 = vmul.f32 %v1501_v28, %v1389_v36 }
 0x2e7   : > { %v1534_v45 = vpack.c.bf16 %v1522_v43, %v1521_v33  ;;  %v1520_v52 = vmul.f32 %v1504_v44, %v1392_v41  ;;  %v2167_v56 = vpop.eup %2166  ;;  %v1499_v57 = vadd.f32 1.0, %v2165_v53  ;;  %v1379_v44 = vmul.f32 0.5, %v2600_v17 }
 0x2e8   : > { %v2169_v60 = vpop.eup %2168  ;;  %v1532_v59 = vpack.c.bf16 %v1518_v12, %v1517_v37  ;;  %v1516_v63 = vmul.f32 %v1500_v55, %v1388_v58  ;;  %v1498_v0 = vadd.f32 1.0, %v2167_v56 }
 0x2e9   : > { %2010 = vmatprep.subr.bf16.mxu0 %v1534_v45  ;;  %v1533_v54 = vpack.c.bf16 %v1520_v52, %v1519_v51  ;;  %v2171_v49 = vpop.eup %2170  ;;  %v1515_v16 = vmul.f32 %v1499_v57, %v1387_v62  ;;  %v1497_v3 = vadd.f32 1.0, %v2169_v60  ;;  %v1549_v52 = vpop.permute.xlu0 %1548 }
 0x2ea   : > { %2011 = vmatpush3.bf16.msra.mxu0 %v1534_v45  ;;  %v2173_v6 = vpop.eup %2172  ;;  %v1514_v25 = vmul.f32 %v1498_v0, %v1386_v1  ;;  %v1496_v26 = vadd.f32 1.0, %v2171_v49  ;;  %v1545_v45 = vpop.permute.xlu1 %1544 }
 0x2eb   : > { %2012 = vmatprep.subr.bf16.mxu0 %v1533_v54  ;;  %v2175_v18 = vpop.eup %2174  ;;  %v1531_v23 = vpack.c.bf16 %v1516_v63, %v1515_v16  ;;  %v1513_v2 = vmul.f32 %v1497_v3, %v1385_v4  ;;  %v1495_v30 = vadd.f32 1.0, %v2173_v6 }
 0x2ec   : > { %v2177_v11 = vpop.eup %2176  ;;  %v1512_v29 = vmul.f32 %v1496_v26, %v1384_v27  ;;  %v1494_v21 = vadd.f32 1.0, %v2175_v18 }
 0x2ed   : > { %v1530_v34 = vpack.c.bf16 %v1514_v25, %v1513_v2  ;;  %v2179_v19 = vpop.eup %2178  ;;  %v1511_v35 = vmul.f32 %v1495_v30, %v1383_v7  ;;  %v1493_v38 = vadd.f32 1.0, %v2177_v11 }
 0x2ee   : > { %2013 = vmatpush3.bf16.msra.mxu0 %v1533_v54  ;;  %v2181_v8 = vpop.eup %2180  ;;  %v1510_v41 = vmul.f32 %v1494_v21, %v1382_v32  ;;  %v1492_v14 = vadd.f32 1.0, %v2179_v19 }
 0x2ef   : > { %2014 = vmatprep.subr.bf16.mxu0 %v1532_v59  ;;  %v1529_v31 = vpack.c.bf16 %v1512_v29, %v1511_v35  ;;  %v1509_v39 = vmul.f32 %v1493_v38, %v1381_v40  ;;  %v1491_v33 = vadd.f32 1.0, %v2181_v8 }
 0x2f0   : > { %v1508_v24 = vmul.f32 %v1492_v14, %v1380_v48 }
 0x2f1   : > { %v1528_v43 = vpack.c.bf16 %v1510_v41, %v1509_v39  ;;  %v1507_v61 = vmul.f32 %v1491_v33, %v1379_v44 }
 0x2f2   : > { %2015 = vmatpush3.bf16.msra.mxu0 %v1532_v59 }
 0x2f3   : > { %2016 = vmatprep.subr.bf16.mxu0 %v1531_v23  ;;  %v1527_v13 = vpack.c.bf16 %v1508_v24, %v1507_v61 }
 0x2f6   : > { %2017 = vmatpush3.bf16.msra.mxu0 %v1531_v23 }
 0x2f7   : > { %2018 = vmatprep.subr.bf16.mxu0 %v1530_v34 }
 0x2fa   : > { %2019 = vmatpush3.bf16.msra.mxu0 %v1530_v34 }
 0x2fb   : > { %2020 = vmatprep.subr.bf16.mxu0 %v1529_v31 }
 0x2fe   : > { %2021 = vmatpush3.bf16.msra.mxu0 %v1529_v31 }
 0x2ff   : > { %2022 = vmatprep.subr.bf16.mxu0 %v1528_v43 }
 0x302   : > { %2023 = vmatpush3.bf16.msra.mxu0 %v1528_v43 }
 0x303   : > { %2024 = vmatprep.subr.bf16.mxu0 %v1527_v13 }
 0x306   : > { %2025 = vmatpush3.bf16.msra.mxu0 %v1527_v13 }
 0x309   : > { %2027 = vmatmul.mubr.bf16.vlgmr.msra.gmra.mxu0 %v2131_v47 }
 0x3c9   : > { %v2028_v46 = vpop.f32.mrf.mxu0 }
 0x3ca   : > { %v1606_v17 = vadd.f32 %v2028_v46, %v1545_v45 }
 0x3cb   : > { %v1597_v51 = vpop.f32.mrf.mxu0 }
 0x3cc   : > { %v1598_v53 = vadd.f32 %v1597_v51, %v1537_v50  ;;  %v1614_v12 = vadd.f32 %v1894_v9, %v1606_v17 }
 0x3cd   : > { %v2029_v28 = vpop.f32.mrf.mxu0 }
 0x3ce   : > { %v1609_v36 = vadd.f32 %v2029_v28, %v1549_v52  ;;  %v1612_v37 = vadd.f32 %v1890_v20, %v1598_v53 }
 0x3cf   : > { %v1600_v54 = vpop.f32.mrf.mxu0 }
 0x3d0   : > { %v1615_v55 = vadd.f32 %v1895_v10, %v1609_v36  ;;  %v1601_v56 = vadd.f32 %v1600_v54, %v1541_v42 }
 0x3d2   : > { %v1912_v58 = vpack.c.bf16 %v1615_v55, %v1614_v12  ;;  %v1613_v57 = vadd.f32 %v1891_v22, %v1601_v56  ;;  %1642 = sbr.rel (!%p2358_p6) target bundleno = 991 (0x3df), region = 150 }
 0x3d4   : > { %1916 = vst [vmem:[%s562_s26 + $0x8] sm:$0xff] %v1912_v58   ;;  %v1907_v60 = vpack.c.bf16 %v1613_v57, %v1612_v37 }
 0x3d6   : > { %1908 = vst [vmem:[%s562_s26] sm:$0xff] %v1907_v60  }
 0x3db   : > { %v1667_v10 = vld [vmem:[%s562_s26 + $0x8] sm:$0xf]  ;;  %v1669_v59 = vld [vmem:[%s562_s26 + $0xc] sm:$0xf] }
 0x3dc   : > { %1668 = vst [vmem:[%s1646_s16 + $0x10] sm:$0xf] %v1667_v10  ;;  %1670 = vst [vmem:[%s1646_s16 + $0x18] sm:$0xf] %v1669_v59 }
 0x3dd   : > { %v1663_v5 = vld [vmem:[%s562_s26] sm:$0xf]  ;;  %v1665_v9 = vld [vmem:[%s562_s26 + $0x4] sm:$0xf] }
 0x3de   : > { %1664 = vst [vmem:[%s1646_s16] sm:$0xf] %v1663_v5  ;;  %1666 = vst [vmem:[%s1646_s16 + $0x8] sm:$0xf] %v1665_v9 }
 0x3df PF: > { %s21_s23 = sadd.s32 1, %s2236_s23   ;;  %s2764_s29 = sld [smem:[#allocation5_spill]] }
 0x3e0   : > { %p18_p13 = scmp.ge.s32.totalorder %s21_s23, 6   ;;  %s2765_s13 = sld [smem:[#allocation6_spill]] }
 0x3e1   : > { %s2766_s17 = smov %s2216_s18  ;;  %s2767_s18 = smov %s2366_s14 }
 0x3e2   : > { %s2768_s19 = smov %s2228_s21  ;;  %s2769_s20 = smov %s2232_s22 }
 0x3e3   :  { %20 = sbr.rel (!%p18_p13) target bundleno = 6 (0x6), region = 236 }
 0x3e5   : > { %s2770_s21 = smov %s2764_s29 }
 0x3e6   : > { %s2771_s22 = smov %s2765_s13 }

</bundles_post_ra>
